<compile_context>
chip_gen: v5e
topology: v5e:2x2
jax: 0.10.0
libtpu: 0.0.40
codegen_flags: <defaults>
</compile_context>

<pallas_src>
import functools

import jax
import jax.numpy as jnp
from jax.experimental import pallas as pl
from jax.experimental.pallas import tpu as pltpu


# ----------------------------------------------------------------------------------------
# Fused kernel: conv1(im2col from wrapper) -> conv2..n (in-kernel im2col) -> MLP head.
# Processes ONE sample per grid step (grid over batch N).
# ----------------------------------------------------------------------------------------
def _fused_kernel(xc_ref, *refs, n_conv, W, H_outs, KHs, C_outs):
    conv_w = [refs[2 * i] for i in range(n_conv)]        # (KH*C_in, C_out) bf16
    conv_b = [refs[2 * i + 1] for i in range(n_conv)]    # (1, C_out)       f32
    wl1_ref, bl1_ref, wl2_ref, bl2_ref, o_ref = refs[2 * n_conv:]

    # ---- conv1 + ReLU: single MXU matmul, f32 accumulate --------------------------------
    # xc_ref block: (1, W*H_outs[0], KH1*C_in) bf16 (im2col built by the wrapper)
    a = jnp.dot(xc_ref[0], conv_w[0][...], preferred_element_type=jnp.float32)
    a = jnp.maximum(a + conv_b[0][...], 0.0)             # (W*H1, C1) f32

    # ---- conv2..n + ReLU: lane-aligned in-kernel im2col, one matmul per layer -----------
    for i in range(1, n_conv):
        h_in, h_out, kh, c_in = H_outs[i - 1], H_outs[i], KHs[i], C_outs[i - 1]
        a3 = a.reshape(W, h_in, c_in)                    # rows are (w, h): w outer, h inner
        acol = jnp.concatenate([a3[:, k:k + h_out, :] for k in range(kh)], axis=2)
        acol = acol.reshape(W * h_out, kh * c_in).astype(jnp.bfloat16)
        a = jnp.dot(acol, conv_w[i][...], preferred_element_type=jnp.float32)
        a = jnp.maximum(a + conv_b[i][...], 0.0)         # (W*h_out, C_out) f32
        # TODO(synk): MaxPool2d((1,1)) / eval-mode Dropout are identities — omitted.

    # ---- flatten in natural (w, h, c) order; wl1 rows were pre-permuted to match --------
    feat = jnp.concatenate([a[p:p + 1, :] for p in range(W * H_outs[-1])], axis=1)
    feat = feat.astype(jnp.bfloat16)                     # (1, F), F = W*H_last*C_last

    # ---- Linear(F, 64) + ReLU ------------------------------------------------------------
    h = jnp.dot(feat, wl1_ref[...], preferred_element_type=jnp.float32)
    h = jnp.maximum(h + bl1_ref[...], 0.0)               # (1, 64) f32

    # ---- Linear(64, 1) on the VPU/XLU (avoid a lane-1 MXU matmul + masked stores) --------
    out = jnp.sum(h * wl2_ref[...], axis=-1, keepdims=True) + bl2_ref[...]   # (1, 1)
    o_ref[...] = out.reshape(1, 1, 1)


# ----------------------------------------------------------------------------------------
# Wrapper: layer-1 im2col (folds the NCHW permute) + one fused pallas_call.
# ----------------------------------------------------------------------------------------
def cnn_forward(x_nchw, params):
    N, C_in, H, W = x_nchw.shape
    convs = params["convs"]
    n_conv = len(convs)

    # Static per-layer geometry from weight shapes.
    KHs, C_outs, H_outs = [], [], []
    c_prev, h_prev = C_in, H
    for (wc, _) in convs:
        kh = wc.shape[0] // c_prev
        KHs.append(kh)
        C_outs.append(wc.shape[1])
        h_prev = h_prev - kh + 1
        H_outs.append(h_prev)
        c_prev = wc.shape[1]
    H1, KH1 = H_outs[0], KHs[0]
    assert params["wl1"].shape[0] == W * H_outs[-1] * C_outs[-1]

    # Layer-1 im2col + NCHW -> channels-last fold, done once in XLA before the kernel.
    x_t = jnp.transpose(x_nchw, (0, 3, 2, 1))                              # (N, W, H, C_in)
    xcol = jnp.stack([x_t[:, :, k:k + H1, :] for k in range(KH1)], axis=3)  # (N,W,H1,KH1,C)
    xcol = xcol.reshape(N, W * H1, KH1 * C_in).astype(jnp.bfloat16)

    flat_args = [xcol]
    in_specs = [pl.BlockSpec((1, W * H1, KH1 * C_in), lambda n: (n, 0, 0))]
    for (wc, bc) in convs:
        flat_args += [wc, bc]
        in_specs += [pl.BlockSpec(wc.shape, lambda n: (0, 0)),
                     pl.BlockSpec(bc.shape, lambda n: (0, 0))]
    for arr in (params["wl1"], params["bl1"], params["wl2"], params["bl2"]):
        flat_args.append(arr)
        in_specs.append(pl.BlockSpec(arr.shape, lambda n: (0, 0)))

    kernel = functools.partial(
        _fused_kernel, n_conv=n_conv, W=W,
        H_outs=tuple(H_outs), KHs=tuple(KHs), C_outs=tuple(C_outs))

    out = pl.pallas_call(
        kernel,
        grid=(N,),
        in_specs=in_specs,
        out_specs=pl.BlockSpec((1, 1, 1), lambda n: (n, 0, 0)),
        out_shape=jax.ShapeDtypeStruct((N, 1, 1), jnp.float32),
        compiler_params=pltpu.CompilerParams(
            dimension_semantics=("parallel",)),   # v7x: shard samples over both TCs
    )(*flat_args)
    return out.reshape(-1)   # torch.flatten -> (N,)


# ----------------------------------------------------------------------------------------
# Parameter init in PyTorch layout + conversion to kernel layout (im2col weights,
# flatten permutation folded into wl1).
# ----------------------------------------------------------------------------------------
def init_torch_params(key, *, input_channels, out_channels, kernels,
                      feature_height, feature_width, linear_output):
    n_conv = len(out_channels)
    keys = jax.random.split(key, 2 * n_conv + 4)
    convs = []
    c_in, h, w = input_channels, feature_height, feature_width
    for i, (c_out, (kh, kw)) in enumerate(zip(out_channels, kernels)):
        wt = 0.05 * jax.random.normal(keys[2 * i], (c_out, c_in, kh, kw), jnp.float32)
        b = 0.01 * jax.random.normal(keys[2 * i + 1], (c_out,), jnp.float32)
        convs.append((wt, b))
        c_in, h, w = c_out, h - kh + 1, w - kw + 1
    feat = out_channels[-1] * h * w
    h1 = linear_output[0]
    W1 = 0.02 * jax.random.normal(keys[-4], (h1, feat), jnp.float32)   # torch Linear.weight
    b1 = 0.01 * jax.random.normal(keys[-3], (h1,), jnp.float32)
    W2 = 0.02 * jax.random.normal(keys[-2], (1, h1), jnp.float32)
    b2 = 0.01 * jax.random.normal(keys[-1], (1,), jnp.float32)
    return {"convs": convs, "W1": W1, "b1": b1, "W2": W2, "b2": b2}, (h, w)


def pack_params(tparams, h_final, w_final):
    convs = []
    for (wt, b) in tparams["convs"]:
        c_out, c_in, kh, _ = wt.shape
        # (C_out, C_in, KH, 1) -> im2col layout (KH*C_in, C_out), row = k*C_in + c, bf16
        w_col = jnp.transpose(wt[:, :, :, 0], (2, 1, 0)).reshape(kh * c_in, c_out)
        convs.append((w_col.astype(jnp.bfloat16), b.reshape(1, c_out).astype(jnp.float32)))
    c_last = tparams["convs"][-1][0].shape[0]
    h1_dim = tparams["W1"].shape[0]
    # Fold torch flatten order (c, h, w) into the kernel's natural (w, h, c) row order.
    wl1 = jnp.transpose(tparams["W1"].T.reshape(c_last, h_final, w_final, h1_dim),
                        (2, 1, 0, 3)).reshape(w_final * h_final * c_last, h1_dim)
    return {
        "convs": convs,
        "wl1": wl1.astype(jnp.bfloat16),
        "bl1": tparams["b1"].reshape(1, h1_dim).astype(jnp.float32),
        "wl2": tparams["W2"].astype(jnp.float32),                 # (1, 64), stays f32 (VPU)
        "bl2": tparams["b2"].reshape(1, 1).astype(jnp.float32),
    }


# ----------------------------------------------------------------------------------------
# Pure-JAX reference on the torch-layout params (same bf16 cast points as the kernel).
# ----------------------------------------------------------------------------------------
def ref_forward(x_nchw, tparams):
    x = x_nchw.astype(jnp.float32)
    for (wt, b) in tparams["convs"]:
        c_out, c_in, kh, _ = wt.shape
        h_out = x.shape[2] - kh + 1
        xb = x.astype(jnp.bfloat16)
        wb = wt[:, :, :, 0].astype(jnp.bfloat16)                  # (C_out, C_in, KH)
        acc = jnp.zeros((x.shape[0], c_out, h_out, x.shape[3]), jnp.float32)
        for k in range(kh):
            acc = acc + jnp.einsum("nchw,dc->ndhw", xb[:, :, k:k + h_out, :], wb[:, :, k],
                                   preferred_element_type=jnp.float32)
        x = jnp.maximum(acc + b[None, :, None, None], 0.0)
    xflat = x.reshape(x.shape[0], -1)                             # torch .view(N, -1)
    h = jnp.dot(xflat.astype(jnp.bfloat16), tparams["W1"].T.astype(jnp.bfloat16),
                preferred_element_type=jnp.float32) + tparams["b1"][None, :]
    h = jnp.maximum(h, 0.0)
    out = h @ tparams["W2"].T + tparams["b2"][None, :]
    return out.reshape(-1)


# ----------------------------------------------------------------------------------------
if __name__ == "__main__":
    # Module defaults: input_channels=4, out_channels=[256,256,256],
    # kernels=[(12,1),(4,1),(4,1)], pool (1,1), no padding, stride 1, linear_output=[64].
    N, C, H, W = 2, 4, 20, 2   # feature_height=20 (>= 12+3+3), feature_width=2, batch=2
    key = jax.random.PRNGKey(0)
    kx, kp = jax.random.split(key)
    x = jax.random.normal(kx, (N, C, H, W), jnp.float32)

    tparams, (h_f, w_f) = init_torch_params(
        kp, input_channels=C, out_channels=(256, 256, 256),
        kernels=((12, 1), (4, 1), (4, 1)),
        feature_height=H, feature_width=W, linear_output=(64,))
    params = pack_params(tparams, h_f, w_f)

    fwd = jax.jit(cnn_forward)
    out = jax.block_until_ready(fwd(x, params))
    ref = jax.block_until_ready(ref_forward(x, tparams))

    assert out.shape == (N,), out.shape
    assert jnp.allclose(out, ref, rtol=2e-2, atol=2e-3), (out, ref)
    print("KERNEL_OK")
</pallas_src>

<mosaic_0001>
module attributes {stable_mosaic.version = 11 : i64} {
  func.func @_fused_kernel(%arg0: i32, %arg1: memref<1x18x48xbf16, #tpu.memory_space<vmem>>, %arg2: memref<48x256xbf16, #tpu.memory_space<vmem>>, %arg3: memref<1x256xf32, #tpu.memory_space<vmem>>, %arg4: memref<1024x256xbf16, #tpu.memory_space<vmem>>, %arg5: memref<1x256xf32, #tpu.memory_space<vmem>>, %arg6: memref<1024x256xbf16, #tpu.memory_space<vmem>>, %arg7: memref<1x256xf32, #tpu.memory_space<vmem>>, %arg8: memref<1536x64xbf16, #tpu.memory_space<vmem>>, %arg9: memref<1x64xf32, #tpu.memory_space<vmem>>, %arg10: memref<1x64xf32, #tpu.memory_space<vmem>>, %arg11: memref<1x1xf32, #tpu.memory_space<vmem>>, %arg12: memref<1x1x1xf32, #tpu.memory_space<vmem>>) attributes {dimension_semantics = [#tpu.dimension_semantics<parallel>], iteration_bounds = array<i64: 2>, scalar_prefetch = 0 : i64, scratch_operands = 0 : i64, tpu.core_type = #tpu.core_type<tc>, window_params = [{transform_indices = @transform_0, window_bounds = array<i64: 1, 18, 48>}, {pipeline_mode = #tpu.pipeline_mode<synchronous>, transform_indices = @transform_1, window_bounds = array<i64: 48, 256>}, {pipeline_mode = #tpu.pipeline_mode<synchronous>, transform_indices = @transform_2, window_bounds = array<i64: 1, 256>}, {pipeline_mode = #tpu.pipeline_mode<synchronous>, transform_indices = @transform_3, window_bounds = array<i64: 1024, 256>}, {pipeline_mode = #tpu.pipeline_mode<synchronous>, transform_indices = @transform_4, window_bounds = array<i64: 1, 256>}, {pipeline_mode = #tpu.pipeline_mode<synchronous>, transform_indices = @transform_5, window_bounds = array<i64: 1024, 256>}, {pipeline_mode = #tpu.pipeline_mode<synchronous>, transform_indices = @transform_6, window_bounds = array<i64: 1, 256>}, {pipeline_mode = #tpu.pipeline_mode<synchronous>, transform_indices = @transform_7, window_bounds = array<i64: 1536, 64>}, {pipeline_mode = #tpu.pipeline_mode<synchronous>, transform_indices = @transform_8, window_bounds = array<i64: 1, 64>}, {pipeline_mode = #tpu.pipeline_mode<synchronous>, transform_indices = @transform_9, window_bounds = array<i64: 1, 64>}, {pipeline_mode = #tpu.pipeline_mode<synchronous>, transform_indices = @transform_10, window_bounds = array<i64: 1, 1>}, {transform_indices = @transform_11, window_bounds = array<i64: 1, 1, 1>}]} {
    %c0 = arith.constant 0 : index
    %c0_0 = arith.constant 0 : index
    %c0_1 = arith.constant 0 : index
    %0 = vector.load %arg1[%c0, %c0_0, %c0_1] : memref<1x18x48xbf16, #tpu.memory_space<vmem>>, vector<1x18x48xbf16>
    %1 = vector.shape_cast %0 : vector<1x18x48xbf16> to vector<18x48xbf16>
    %c0_2 = arith.constant 0 : index
    %c0_3 = arith.constant 0 : index
    %2 = vector.load %arg2[%c0_2, %c0_3] : memref<48x256xbf16, #tpu.memory_space<vmem>>, vector<48x256xbf16>
    %cst = arith.constant dense<0.000000e+00> : vector<18x256xf32>
    %3 = tpu.matmul %1, %2, %cst {dimension_numbers = #tpu.dot_dimension_numbers<[1], [0], [0], [1], [0, 0, 1, 1], [], []>} : vector<18x48xbf16>, vector<48x256xbf16>, vector<18x256xf32> -> vector<18x256xf32>
    %c0_4 = arith.constant 0 : index
    %c0_5 = arith.constant 0 : index
    %4 = vector.load %arg3[%c0_4, %c0_5] : memref<1x256xf32, #tpu.memory_space<vmem>>, vector<1x256xf32>
    %5 = vector.broadcast %4 : vector<1x256xf32> to vector<18x256xf32>
    %6 = arith.addf %3, %5 : vector<18x256xf32>
    %cst_6 = arith.constant 0.000000e+00 : f32
    %7 = vector.broadcast %cst_6 : f32 to vector<18x256xf32>
    %8 = arith.maximumf %6, %7 : vector<18x256xf32>
    %9 = vector.shape_cast %8 : vector<18x256xf32> to vector<2x9x256xf32>
    %10 = vector.extract_strided_slice %9 {offsets = [0, 0, 0], sizes = [2, 6, 256], strides = [1, 1, 1]} : vector<2x9x256xf32> to vector<2x6x256xf32>
    %11 = vector.extract_strided_slice %9 {offsets = [0, 1, 0], sizes = [2, 6, 256], strides = [1, 1, 1]} : vector<2x9x256xf32> to vector<2x6x256xf32>
    %12 = vector.extract_strided_slice %9 {offsets = [0, 2, 0], sizes = [2, 6, 256], strides = [1, 1, 1]} : vector<2x9x256xf32> to vector<2x6x256xf32>
    %13 = vector.extract_strided_slice %9 {offsets = [0, 3, 0], sizes = [2, 6, 256], strides = [1, 1, 1]} : vector<2x9x256xf32> to vector<2x6x256xf32>
    %14 = tpu.concatenate %10, %11, %12, %13 in 2 : vector<2x6x256xf32>, vector<2x6x256xf32>, vector<2x6x256xf32>, vector<2x6x256xf32> -> vector<2x6x1024xf32>
    %15 = vector.shape_cast %14 : vector<2x6x1024xf32> to vector<12x1024xf32>
    %16 = arith.truncf %15 : vector<12x1024xf32> to vector<12x1024xbf16>
    %c0_7 = arith.constant 0 : index
    %c0_8 = arith.constant 0 : index
    %17 = vector.load %arg4[%c0_7, %c0_8] : memref<1024x256xbf16, #tpu.memory_space<vmem>>, vector<1024x256xbf16>
    %cst_9 = arith.constant dense<0.000000e+00> : vector<12x256xf32>
    %18 = tpu.matmul %16, %17, %cst_9 {dimension_numbers = #tpu.dot_dimension_numbers<[1], [0], [0], [1], [0, 0, 1, 1], [], []>} : vector<12x1024xbf16>, vector<1024x256xbf16>, vector<12x256xf32> -> vector<12x256xf32>
    %c0_10 = arith.constant 0 : index
    %c0_11 = arith.constant 0 : index
    %19 = vector.load %arg5[%c0_10, %c0_11] : memref<1x256xf32, #tpu.memory_space<vmem>>, vector<1x256xf32>
    %20 = vector.broadcast %19 : vector<1x256xf32> to vector<12x256xf32>
    %21 = arith.addf %18, %20 : vector<12x256xf32>
    %cst_12 = arith.constant 0.000000e+00 : f32
    %22 = vector.broadcast %cst_12 : f32 to vector<12x256xf32>
    %23 = arith.maximumf %21, %22 : vector<12x256xf32>
    %24 = vector.shape_cast %23 : vector<12x256xf32> to vector<2x6x256xf32>
    %25 = vector.extract_strided_slice %24 {offsets = [0, 0, 0], sizes = [2, 3, 256], strides = [1, 1, 1]} : vector<2x6x256xf32> to vector<2x3x256xf32>
    %26 = vector.extract_strided_slice %24 {offsets = [0, 1, 0], sizes = [2, 3, 256], strides = [1, 1, 1]} : vector<2x6x256xf32> to vector<2x3x256xf32>
    %27 = vector.extract_strided_slice %24 {offsets = [0, 2, 0], sizes = [2, 3, 256], strides = [1, 1, 1]} : vector<2x6x256xf32> to vector<2x3x256xf32>
    %28 = vector.extract_strided_slice %24 {offsets = [0, 3, 0], sizes = [2, 3, 256], strides = [1, 1, 1]} : vector<2x6x256xf32> to vector<2x3x256xf32>
    %29 = tpu.concatenate %25, %26, %27, %28 in 2 : vector<2x3x256xf32>, vector<2x3x256xf32>, vector<2x3x256xf32>, vector<2x3x256xf32> -> vector<2x3x1024xf32>
    %30 = vector.shape_cast %29 : vector<2x3x1024xf32> to vector<6x1024xf32>
    %31 = arith.truncf %30 : vector<6x1024xf32> to vector<6x1024xbf16>
    %c0_13 = arith.constant 0 : index
    %c0_14 = arith.constant 0 : index
    %32 = vector.load %arg6[%c0_13, %c0_14] : memref<1024x256xbf16, #tpu.memory_space<vmem>>, vector<1024x256xbf16>
    %cst_15 = arith.constant dense<0.000000e+00> : vector<6x256xf32>
    %33 = tpu.matmul %31, %32, %cst_15 {dimension_numbers = #tpu.dot_dimension_numbers<[1], [0], [0], [1], [0, 0, 1, 1], [], []>} : vector<6x1024xbf16>, vector<1024x256xbf16>, vector<6x256xf32> -> vector<6x256xf32>
    %c0_16 = arith.constant 0 : index
    %c0_17 = arith.constant 0 : index
    %34 = vector.load %arg7[%c0_16, %c0_17] : memref<1x256xf32, #tpu.memory_space<vmem>>, vector<1x256xf32>
    %35 = vector.broadcast %34 : vector<1x256xf32> to vector<6x256xf32>
    %36 = arith.addf %33, %35 : vector<6x256xf32>
    %cst_18 = arith.constant 0.000000e+00 : f32
    %37 = vector.broadcast %cst_18 : f32 to vector<6x256xf32>
    %38 = arith.maximumf %36, %37 : vector<6x256xf32>
    %39 = vector.extract_strided_slice %38 {offsets = [0, 0], sizes = [1, 256], strides = [1, 1]} : vector<6x256xf32> to vector<1x256xf32>
    %40 = vector.extract_strided_slice %38 {offsets = [1, 0], sizes = [1, 256], strides = [1, 1]} : vector<6x256xf32> to vector<1x256xf32>
    %41 = vector.extract_strided_slice %38 {offsets = [2, 0], sizes = [1, 256], strides = [1, 1]} : vector<6x256xf32> to vector<1x256xf32>
    %42 = vector.extract_strided_slice %38 {offsets = [3, 0], sizes = [1, 256], strides = [1, 1]} : vector<6x256xf32> to vector<1x256xf32>
    %43 = vector.extract_strided_slice %38 {offsets = [4, 0], sizes = [1, 256], strides = [1, 1]} : vector<6x256xf32> to vector<1x256xf32>
    %44 = vector.extract_strided_slice %38 {offsets = [5, 0], sizes = [1, 256], strides = [1, 1]} : vector<6x256xf32> to vector<1x256xf32>
    %45 = tpu.concatenate %39, %40, %41, %42, %43, %44 in 1 : vector<1x256xf32>, vector<1x256xf32>, vector<1x256xf32>, vector<1x256xf32>, vector<1x256xf32>, vector<1x256xf32> -> vector<1x1536xf32>
    %46 = arith.truncf %45 : vector<1x1536xf32> to vector<1x1536xbf16>
    %c0_19 = arith.constant 0 : index
    %c0_20 = arith.constant 0 : index
    %47 = vector.load %arg8[%c0_19, %c0_20] : memref<1536x64xbf16, #tpu.memory_space<vmem>>, vector<1536x64xbf16>
    %cst_21 = arith.constant dense<0.000000e+00> : vector<1x64xf32>
    %48 = tpu.matmul %46, %47, %cst_21 {dimension_numbers = #tpu.dot_dimension_numbers<[1], [0], [0], [1], [0, 0, 1, 1], [], []>} : vector<1x1536xbf16>, vector<1536x64xbf16>, vector<1x64xf32> -> vector<1x64xf32>
    %c0_22 = arith.constant 0 : index
    %c0_23 = arith.constant 0 : index
    %49 = vector.load %arg9[%c0_22, %c0_23] : memref<1x64xf32, #tpu.memory_space<vmem>>, vector<1x64xf32>
    %50 = arith.addf %48, %49 : vector<1x64xf32>
    %cst_24 = arith.constant 0.000000e+00 : f32
    %51 = vector.broadcast %cst_24 : f32 to vector<1x64xf32>
    %52 = arith.maximumf %50, %51 : vector<1x64xf32>
    %c0_25 = arith.constant 0 : index
    %c0_26 = arith.constant 0 : index
    %53 = vector.load %arg10[%c0_25, %c0_26] : memref<1x64xf32, #tpu.memory_space<vmem>>, vector<1x64xf32>
    %54 = arith.mulf %52, %53 : vector<1x64xf32>
    %cst_27 = arith.constant dense<0.000000e+00> : vector<1xf32>
    %55 = vector.multi_reduction <add>, %54, %cst_27 [1] : vector<1x64xf32> to vector<1xf32>
    %56 = vector.shape_cast %55 : vector<1xf32> to vector<1x1xf32>
    %c0_28 = arith.constant 0 : index
    %c0_29 = arith.constant 0 : index
    %57 = vector.load %arg11[%c0_28, %c0_29] : memref<1x1xf32, #tpu.memory_space<vmem>>, vector<1x1xf32>
    %58 = arith.addf %56, %57 : vector<1x1xf32>
    %59 = vector.shape_cast %58 : vector<1x1xf32> to vector<1x1x1xf32>
    %c0_30 = arith.constant 0 : index
    %c0_31 = arith.constant 0 : index
    %c0_32 = arith.constant 0 : index
    %60 = vector.load %arg12[%c0_30, %c0_31, %c0_32] : memref<1x1x1xf32, #tpu.memory_space<vmem>>, vector<1x1x1xf32>
    tpu.vector_store %arg12[%c0_30, %c0_31, %c0_32], %59 {strides = array<i32>} : memref<1x1x1xf32, #tpu.memory_space<vmem>>, vector<1x1x1xf32>,
    return
  }
  func.func @transform_0(%arg0: i32) -> (i32, i32, i32) {
    %c0_i32 = arith.constant 0 : i32
    %c0_i32_0 = arith.constant 0 : i32
    %c0_i32_1 = arith.constant 0 : i32
    return %arg0, %c0_i32, %c0_i32_0 : i32, i32, i32
  }
  func.func @transform_1(%arg0: i32) -> (i32, i32) {
    %c0_i32 = arith.constant 0 : i32
    %c0_i32_0 = arith.constant 0 : i32
    %c0_i32_1 = arith.constant 0 : i32
    return %c0_i32, %c0_i32_0 : i32, i32
  }
  func.func @transform_2(%arg0: i32) -> (i32, i32) {
    %c0_i32 = arith.constant 0 : i32
    %c0_i32_0 = arith.constant 0 : i32
    %c0_i32_1 = arith.constant 0 : i32
    return %c0_i32, %c0_i32_0 : i32, i32
  }
  func.func @transform_3(%arg0: i32) -> (i32, i32) {
    %c0_i32 = arith.constant 0 : i32
    %c0_i32_0 = arith.constant 0 : i32
    %c0_i32_1 = arith.constant 0 : i32
    return %c0_i32, %c0_i32_0 : i32, i32
  }
  func.func @transform_4(%arg0: i32) -> (i32, i32) {
    %c0_i32 = arith.constant 0 : i32
    %c0_i32_0 = arith.constant 0 : i32
    %c0_i32_1 = arith.constant 0 : i32
    return %c0_i32, %c0_i32_0 : i32, i32
  }
  func.func @transform_5(%arg0: i32) -> (i32, i32) {
    %c0_i32 = arith.constant 0 : i32
    %c0_i32_0 = arith.constant 0 : i32
    %c0_i32_1 = arith.constant 0 : i32
    return %c0_i32, %c0_i32_0 : i32, i32
  }
  func.func @transform_6(%arg0: i32) -> (i32, i32) {
    %c0_i32 = arith.constant 0 : i32
    %c0_i32_0 = arith.constant 0 : i32
    %c0_i32_1 = arith.constant 0 : i32
    return %c0_i32, %c0_i32_0 : i32, i32
  }
  func.func @transform_7(%arg0: i32) -> (i32, i32) {
    %c0_i32 = arith.constant 0 : i32
    %c0_i32_0 = arith.constant 0 : i32
    %c0_i32_1 = arith.constant 0 : i32
    return %c0_i32, %c0_i32_0 : i32, i32
  }
  func.func @transform_8(%arg0: i32) -> (i32, i32) {
    %c0_i32 = arith.constant 0 : i32
    %c0_i32_0 = arith.constant 0 : i32
    %c0_i32_1 = arith.constant 0 : i32
    return %c0_i32, %c0_i32_0 : i32, i32
  }
  func.func @transform_9(%arg0: i32) -> (i32, i32) {
    %c0_i32 = arith.constant 0 : i32
    %c0_i32_0 = arith.constant 0 : i32
    %c0_i32_1 = arith.constant 0 : i32
    return %c0_i32, %c0_i32_0 : i32, i32
  }
  func.func @transform_10(%arg0: i32) -> (i32, i32) {
    %c0_i32 = arith.constant 0 : i32
    %c0_i32_0 = arith.constant 0 : i32
    %c0_i32_1 = arith.constant 0 : i32
    return %c0_i32, %c0_i32_0 : i32, i32
  }
  func.func @transform_11(%arg0: i32) -> (i32, i32, i32) {
    %c0_i32 = arith.constant 0 : i32
    %c0_i32_0 = arith.constant 0 : i32
    %c0_i32_1 = arith.constant 0 : i32
    return %arg0, %c0_i32, %c0_i32_0 : i32, i32, i32
  }
}

</mosaic_0001>

<bundles_post_ra>
// kernel: cnn_forward.1
= control target key start
LH: loop header
LB: loop body
LE: loop exit
PB: predicated region body
PF: predicated region fallthrough
CT: control target
= control target key end

     0   :  { %s7500_s0 = inlined_call_operand.vmem [shape: bf16[2,18,48], index: 0, kind: input, shape index: {}]   ;;  %s7501_s1 = inlined_call_operand.vmem [shape: bf16[48,256], index: 1, kind: input, shape index: {}]   ;;  %s7502_s2 = inlined_call_operand.vmem [shape: f32[1,256], index: 2, kind: input, shape index: {}]   ;;  %s7503_s3 = inlined_call_operand.vmem [shape: bf16[1024,256], index: 3, kind: input, shape index: {}]   ;;  %s7504_s4 = inlined_call_operand.vmem [shape: f32[1,256], index: 4, kind: input, shape index: {}]   ;;  %s7505_s5 = inlined_call_operand.hbm [shape: bf16[1024,256], index: 5, kind: input, shape index: {}]   ;;  %s7506_s6 = inlined_call_operand.vmem [shape: f32[1,256], index: 6, kind: input, shape index: {}]   ;;  %s7507_s7 = inlined_call_operand.vmem [shape: bf16[1536,64], index: 7, kind: input, shape index: {}]   ;;  %s7508_s8 = inlined_call_operand.vmem [shape: f32[1,64], index: 8, kind: input, shape index: {}]   ;;  %s7509_s9 = inlined_call_operand.vmem [shape: f32[1,64], index: 9, kind: input, shape index: {}]   ;;  %s7510_s10 = inlined_call_operand.<no memory space> [shape: f32[1,1], index: 10, kind: input, shape index: {}]   ;;  %s7511_s11 = inlined_call_operand.vmem [shape: f32[2,1,1], index: 11, kind: output, shape index: {}]  }
   0x1   :  { %v16_v0 = vstv %s7510_s10 }
   0x2   :  { %17 = vst [vmem:[#allocation2] sm:$0x1] %v16_v0 }
   0x3   :  { %18 = vsyncpa [#allocation4], 0  ;;  %s5880_s19 = smov 0  }
   0x4 LB: > { %s314_s22 = sshll.u32 %s7505_s5, 4  ;;  %s3941_s23 = sadd.s32 4294967295, %s5812_s19   ;;  %s5812_s19 = sphi %s5880_s19, %s24_s19   ;;  %s315_s22 = int_to_ptr.hbm [resolvable:$true] %s314_s22 }
   0x5   : > { %p3943_p0 = scmp.ge.s32.totalorder %s5812_s19, 1  ;;  %p291_p1 = scmp.lt.s32.totalorder %s5812_s19, 3 }
   0x6   : > { %p5759_p2 = scmp.eq.s32.totalorder %s3941_s23, 0  ;;  %s5814_s10 = smov [#allocation3]  }
   0x7   : > { %p292_p3 = pnand %p3943_p0, %p291_p1  ;;  %s316_s24 = sshll.u32 %s5814_s10, 4  ;;  %s317_s24 = int_to_ptr.vmem [resolvable:$true] %s316_s24 }
   0x8   : > { %s5815_s25 = smov 128   ;;  %s5816_s26 = smov 8  }
   0x9   : > { %p5755_p4 = pneg %p292_p3  ;;  %355 = sbr.rel (%p292_p3) target bundleno = 1069 (0x42d), region = 64 }
   0xb   : > { %p5756_p5 = pnand %p5759_p2, %p5755_p4 }
   0xd   : > { %5758 = dma.hbm_to_vmem [thread:$0]  (!%p5756_p5), %s315_s22, 16384, %s317_s24, [#allocation4], %s5815_s25, %s5815_s25, %s5816_s26  }
   0xe   : > { %5807 = dma.done.wait (%p5759_p2), [#allocation4], 16384  }
   0xf   : > { %5809 = vsyncadd (%p5759_p2), [#allocation4], 4294950912  ;;  %p394_p6 = scmp.lt.s32.totalorder %s3941_s23, 1  ;;  %v3971_v1 = vld [vmem:[%s7501_s1 + $0x20] sm:$0xf]  ;;  %vm456_vm0 = vcmask 392192  }
  0x10   : > { %v5397_v2 = vld [vmem:[%s7501_s1 + $0x24] sm:$0xf0]  ;;  %v5396_v3 = vld [vmem:[%s7501_s1 + $0x24] sm:$0xf]  ;;  %v3973_v5 = vld [vmem:[%s7501_s1 + $0x28] sm:$0xf0] }
  0x11   : > { %s7518_s23 = smov (!%p394_p6, %s3941_s23), 1  ;;  %v3972_v4 = vor.u32 %v5397_v2, %v3971_v1  ;;  %v3963_v6 = vld [vmem:[%s7501_s1 + $0x10] sm:$0xf]  ;;  %v5395_v7 = vld [vmem:[%s7501_s1 + $0x14] sm:$0xf0]  ;;  %v3976_v8 = vor.u32 %v5396_v3, %v3973_v5  ;;  %vm519_vm1 = vcmask 1042434  }
  0x12   : > { %v5394_v9 = vld [vmem:[%s7501_s1 + $0x14] sm:$0xf]  ;;  %v3965_v10 = vld [vmem:[%s7501_s1 + $0x18] sm:$0xf0]  ;;  %v3964_v11 = vor.u32 %v5395_v7, %v3963_v6  ;;  %s5750_s25 = smul.u32 12, %s7518_s23  ;;  %vm522_vm2 = vcmask 1043459   ;;  %s401_s14 = scalar_lea.vmem %s7511_s11, %s7518_s23 }
  0x13   : > { %468 = vmatpush.bf16.msra.mxu0 %v3972_v4  ;;  %486 = vmatpush.bf16.msra.mxu1 %v3976_v8  ;;  %v3968_v12 = vor.u32 %v5394_v9, %v3965_v10  ;;  %v3955_v13 = vld [vmem:[%s7501_s1] sm:$0xf]  ;;  %v5393_v14 = vld [vmem:[%s7501_s1 + $0x4] sm:$0xf0]  ;;  %v5392_v15 = vld [vmem:[%s7501_s1 + $0x4] sm:$0xf] }
  0x14   : > { %v3957_v16 = vld [vmem:[%s7501_s1 + $0x8] sm:$0xf0]  ;;  %v3956_v17 = vor.u32 %v5393_v14, %v3955_v13  ;;  %s398_s17 = scalar_lea.vmem %s7500_s0, %s5750_s25  ;;  %v412_v23 = vld [vmem:[%s7502_s2] sm:$0x3]  ;;  %vm525_vm3 = vcmask 1044484   ;;  %vm528_vm4 = vcmask 1045509  }
  0x15   : > { %v3960_v18 = vor.u32 %v5392_v15, %v3957_v16  ;;  %v5391_v19 = vld [vmem:[%s398_s17] sm:$0xff]  ;;  %v405_v20 = vld [vmem:[%s398_s17 + $0x8] sm:$0x1]  ;;  %v5936_v24 = vperm.slane %v412_v23, 0  ;;  %v5938_v25 = vperm.slane %v412_v23, 1  ;;  %vm516_vm5 = vcmask 1041409  }
  0x16   : > { %v423_v21 = vunpack.c.l.b16 %v405_v20  ;;  %vm514_vm6 = vcmask 1040384   ;;  %vm531_vm7 = vcmask 1046534   ;;  %v4039_v2 = vld [vmem:[%s7503_s3 + $0x70] sm:$0xf]  ;;  %v5413_v3 = vld [vmem:[%s7503_s3 + $0x74] sm:$0xf0] }
  0x17   : > { %469 = vmatpush.bf16.msra.mxu0 %v3964_v11  ;;  %487 = vmatpush.bf16.msra.mxu1 %v3968_v12  ;;  %v4040_v4 = vor.u32 %v5413_v3, %v4039_v2  ;;  %v4103_v5 = vld [vmem:[%s7503_s3 + $0xf0] sm:$0xf]  ;;  %v5429_v6 = vld [vmem:[%s7503_s3 + $0xf4] sm:$0xf0]  ;;  %vm534_vm8 = vcmask 1046528   ;;  %vm651_vm9 = vcmask 1041408  }
  0x18   : > { %v425_v22 = vpack.c.b16 %v423_v21, %v423_v21  ;;  %v4167_v7 = vld [vmem:[%s7503_s3 + $0x170] sm:$0xf]  ;;  %v4104_v8 = vor.u32 %v5429_v6, %v4103_v5  ;;  %v5445_v9 = vld [vmem:[%s7503_s3 + $0x174] sm:$0xf0]  ;;  %v4015_v5 = vld [vmem:[%s7503_s3 + $0x40] sm:$0xf] }
  0x19   : > { %v4231_v10 = vld [vmem:[%s7503_s3 + $0x1f0] sm:$0xf]  ;;  %v5461_v11 = vld [vmem:[%s7503_s3 + $0x1f4] sm:$0xf0]  ;;  %1534 = vmatpush.bf16.msra.mxu2 %v4040_v4  ;;  %v4168_v13 = vor.u32 %v5445_v9, %v4167_v7  ;;  %v5407_v7 = vld [vmem:[%s7503_s3 + $0x44] sm:$0xf0] }
  0x1a   : > { %v4232_v14 = vor.u32 %v5461_v11, %v4231_v10  ;;  %1548 = vmatpush.bf16.msra.mxu3 %v4104_v8  ;;  %v5441_v3 = vld [vmem:[%s7503_s3 + $0x154] sm:$0xf0]  ;;  %v4079_v8 = vld [vmem:[%s7503_s3 + $0xc0] sm:$0xf]  ;;  %v4016_v9 = vor.u32 %v5407_v7, %v4015_v5  ;;  %v5423_v10 = vld [vmem:[%s7503_s3 + $0xc4] sm:$0xf0] }
  0x1b   : > { %470 = vmatpush.bf16.msra.mxu0 %v3956_v17  ;;  %488 = vmatpush.bf16.msra.mxu1 %v3960_v18  ;;  %v5457_v4 = vld [vmem:[%s7503_s3 + $0x1d4] sm:$0xf0]  ;;  %v4143_v11 = vld [vmem:[%s7503_s3 + $0x140] sm:$0xf]  ;;  %vm653_vm10 = vcmask 1045508   ;;  %vm7513_vm11 = vcmask 1043458  }
  0x1c   : > { %v5433_v7 = vld [vmem:[%s7503_s3 + $0x114] sm:$0xf0]  ;;  %vm655_vm12 = vcmask 1043456   ;;  %vm662_vm13 = vcmask 1045504   ;;  %vm7512_vm14 = vcmask 1045506   ;;  %vm1853_vm15 = vcmask 1042433  }
  0x1e   : > { %3977 = vmatmul.msk.bf16.vlgmr.msra.gmra.mxu0 %vm456_vm0, %v5391_v19  ;;  %3979 = vmatmul.msk.bf16.vlgmr.msra.gmra.mxu1 %vm456_vm0, %v5391_v19 }
  0x1f   : > { %1562 = vmatpush.bf16.msrb.mxu0 %v4168_v13  ;;  %1576 = vmatpush.bf16.msrb.mxu1 %v4232_v14  ;;  %v5439_v13 = vld [vmem:[%s7503_s3 + $0x144] sm:$0xf0]  ;;  %v4207_v14 = vld [vmem:[%s7503_s3 + $0x1c0] sm:$0xf] }
  0x2e   : > { %3978 = vmatmul.msk.bf16.gmra.mxu0 %vm456_vm0, %v425_v22  ;;  %3980 = vmatmul.msk.bf16.gmra.mxu1 %vm456_vm0, %v425_v22  ;;  %vm1857_vm0 = vcmask 1046533  }
  0x9b   : > { %v472_v26 = vpop.f32.mrf.mxu0  ;;  %v490_v28 = vpop.f32.mrf.mxu1 }
  0x9c   : > { %v473_v27 = vadd.f32 %v472_v26, %v5936_v24  ;;  %v491_v29 = vadd.f32 %v490_v28, %v5938_v25  ;;  %v5411_v28 = vld [vmem:[%s7503_s3 + $0x64] sm:$0xf0] }
  0x9e   : > { %v5942_v30 = vmax.f32 %v473_v27, 0.0  ;;  %v500_v31 = vmax.f32 %v491_v29, 0.0  ;;  %v4031_v27 = vld [vmem:[%s7503_s3 + $0x60] sm:$0xf] }
  0x9f   : > { %v4095_v29 = vld [vmem:[%s7503_s3 + $0xe0] sm:$0xf] }
  0xa0   : > { %v5944_v32 = vrot.slane %v500_v31, 7 }
  0xa2   : > { %v520_v33 = vsel %vm519_vm1, %v5942_v30, %v5944_v32  ;;  %v523_v34 = vsel %vm522_vm2, %v5942_v30, %v5944_v32  ;;  %v526_v35 = vsel %vm525_vm3, %v5942_v30, %v5944_v32  ;;  %v529_v36 = vsel %vm528_vm4, %v5942_v30, %v5944_v32 }
  0xa3   : > { %v474_v37 = vpop.f32.mrf.mxu0  ;;  %v5958_v38 = vrot.slane %v520_v33, 2  ;;  %v5960_v39 = vrot.slane %v523_v34, 3  ;;  %v5962_v40 = vrot.slane %v526_v35, 4  ;;  %v492_v41 = vpop.f32.mrf.mxu1  ;;  %v5964_v42 = vrot.slane %v529_v36, 5  ;;  %v5427_v34 = vld [vmem:[%s7503_s3 + $0xe4] sm:$0xf0] }
  0xa4   : > { %v493_v43 = vadd.f32 %v492_v41, %v5938_v25  ;;  %v475_v44 = vadd.f32 %v474_v37, %v5936_v24  ;;  %v517_v45 = vsel %vm516_vm5, %v5942_v30, %v5944_v32  ;;  %v515_v47 = vsel %vm514_vm6, %v5942_v30, %v5944_v32  ;;  %v5443_v37 = vld [vmem:[%s7503_s3 + $0x164] sm:$0xf0]  ;;  %v4223_v41 = vld [vmem:[%s7503_s3 + $0x1e0] sm:$0xf] }
  0xa5   : > { %559 = vst [vmem:[#allocation1 + $0x2] ss:$9 sm:$0xff] %v5958_v38  ;;  %v518_v48 = vrot.slane %v517_v45, 1  ;;  %v532_v18 = vsel %vm531_vm7, %v5942_v30, %v5944_v32  ;;  %v4032_v33 = vor.u32 %v5411_v28, %v4031_v27  ;;  %v4096_v36 = vor.u32 %v5427_v34, %v4095_v29  ;;  %v5421_v27 = vld [vmem:[%s7503_s3 + $0xb4] sm:$0xf0] }
  0xa6   : > { %561 = vst [vmem:[#allocation1 + $0x3] ss:$9 sm:$0xff] %v5960_v39  ;;  %v502_v46 = vmax.f32 %v493_v43, 0.0  ;;  %v5980_v50 = vmax.f32 %v475_v44, 0.0  ;;  %v6059_v19 = vrot.slane %v532_v18, 6 }
  0xa7   : > { %563 = vst [vmem:[#allocation1 + $0x4] ss:$9 sm:$0xff] %v5962_v40  ;;  %v5459_v43 = vld [vmem:[%s7503_s3 + $0x1e4] sm:$0xf0]  ;;  %1535 = vmatpush.bf16.msra.mxu2 %v4032_v33  ;;  %1549 = vmatpush.bf16.msra.mxu3 %v4096_v36  ;;  %v4135_v28 = vld [vmem:[%s7503_s3 + $0x130] sm:$0xf] }
  0xa8   : > { %565 = vst [vmem:[#allocation1 + $0x5] ss:$9 sm:$0xff] %v5964_v42  ;;  %v5978_v49 = vrot.slane %v502_v46, 7  ;;  %v5455_v18 = vld [vmem:[%s7503_s3 + $0x1c4] sm:$0xf0] }
  0xa9   : > { %555 = vst [vmem:[#allocation1] ss:$9 sm:$0xff] %v515_v47  ;;  %v4224_v47 = vor.u32 %v5459_v43, %v4223_v41  ;;  %v5453_v33 = vld [vmem:[%s7503_s3 + $0x1b4] sm:$0xf0]  ;;  %v3999_v36 = vld [vmem:[%s7503_s3 + $0x20] sm:$0xf] }
  0xaa   : > { %557 = vst [vmem:[#allocation1 + $0x1] ss:$9 sm:$0xff] %v518_v48  ;;  %v538_v51 = vsel %vm516_vm5, %v5980_v50, %v5978_v49  ;;  %v5988_v52 = vsel %vm519_vm1, %v5980_v50, %v5978_v49  ;;  %v5993_v53 = vsel %vm514_vm6, %v5980_v50, %v5978_v49  ;;  %v542_v54 = vsel %vm522_vm2, %v5980_v50, %v5978_v49  ;;  %v4063_v41 = vld [vmem:[%s7503_s3 + $0xa0] sm:$0xf] }
  0xab   : > { %v539_v55 = vrot.slane %v538_v51, 1  ;;  %v544_v56 = vsel %vm525_vm3, %v5980_v50, %v5978_v49  ;;  %v541_v57 = vrot.slane %v5988_v52, 2  ;;  %v546_v58 = vsel %vm528_vm4, %v5980_v50, %v5978_v49  ;;  %v495_v12 = vpop.f32.mrf.mxu1  ;;  %v477_v15 = vpop.f32.mrf.mxu0  ;;  %1577 = vmatpush.bf16.msrb.mxu1 %v4224_v47  ;;  %v4215_v52 = vld [vmem:[%s7503_s3 + $0x1d0] sm:$0xf] }
  0xac   : > { %v6005_v59 = vrot.slane %v542_v54, 3  ;;  %v548_v60 = vsel %vm531_vm7, %v5980_v50, %v5978_v49  ;;  %v6010_v61 = vrot.slane %v544_v56, 4  ;;  %v6016_v0 = vrot.slane %v546_v58, 5  ;;  %v4087_v56 = vld [vmem:[%s7503_s3 + $0xd0] sm:$0xf] }
  0xad   : > { %v6018_v1 = vrot.slane %v548_v60, 6  ;;  %v496_v21 = vadd.f32 %v495_v12, %v5938_v25  ;;  %v478_v26 = vadd.f32 %v477_v15, %v5936_v24  ;;  %v4159_v24 = vld [vmem:[%s7503_s3 + $0x160] sm:$0xf]  ;;  %v550_v35 = vsel %vm534_vm8, %v5978_v49, %v5980_v50  ;;  %v5409_v49 = vld [vmem:[%s7503_s3 + $0x54] sm:$0xf0] }
  0xae   : > { %v4160_v46 = vor.u32 %v5443_v37, %v4159_v24  ;;  %v6105_v50 = vrot.slane %v550_v35, 7  ;;  %v5425_v58 = vld [vmem:[%s7503_s3 + $0xd4] sm:$0xf0]  ;;  %v4151_v60 = vld [vmem:[%s7503_s3 + $0x150] sm:$0xf]  ;;  %v4216_v6 = vor.u32 %v5457_v4, %v4215_v52  ;;  %v4080_v12 = vor.u32 %v5423_v10, %v4079_v8 }
  0xaf   : > { %v504_v23 = vmax.f32 %v496_v21, 0.0  ;;  %v503_v31 = vmax.f32 %v478_v26, 0.0  ;;  %v4088_v2 = vor.u32 %v5425_v58, %v4087_v56  ;;  %v4144_v15 = vor.u32 %v5439_v13, %v4143_v11  ;;  %v5405_v21 = vld [vmem:[%s7503_s3 + $0x34] sm:$0xf0]  ;;  %v4071_v26 = vld [vmem:[%s7503_s3 + $0xb0] sm:$0xf] }
  0xb0   : > { %1563 = vmatpush.bf16.msrb.mxu0 %v4160_v46  ;;  %1578 = vmatpush.bf16.msrb.mxu1 %v4216_v6  ;;  %v4072_v29 = vor.u32 %v5421_v27, %v4071_v26  ;;  %v6187_v35 = vsel %vm534_vm8, %v5944_v32, %v5942_v30  ;;  %v5403_v37 = vld [vmem:[%s7503_s3 + $0x24] sm:$0xf0]  ;;  %v4127_v32 = vld [vmem:[%s7503_s3 + $0x120] sm:$0xf]  ;;  %v5401_v52 = vld [vmem:[%s7503_s3 + $0x14] sm:$0xf0] }
  0xb1   : > { %v6012_v62 = vld [vmem:[#allocation1] sm:$0xff]  ;;  %v6014_v63 = vld [vmem:[#allocation1 + $0x9] sm:$0xff]  ;;  %v513_v25 = vrot.slane %v504_v23, 7  ;;  %1550 = vmatpush.bf16.msra.mxu3 %v4088_v2  ;;  %v4000_v43 = vor.u32 %v5403_v37, %v3999_v36  ;;  %v536_v58 = vrot.slane %v6187_v35, 7  ;;  %v5417_v4 = vld [vmem:[%s7503_s3 + $0x94] sm:$0xf0] }
  0xb2   : > { %568 = vst [vmem:[#allocation1] ss:$9 sm:$0xff] %v539_v55  ;;  %v5419_v30 = vld [vmem:[%s7503_s3 + $0xa4] sm:$0xf0]  ;;  %v4191_v56 = vld [vmem:[%s7503_s3 + $0x1a0] sm:$0xf] }
  0xb3   : > { %569 = vst [vmem:[#allocation1 + $0x1] ss:$9 sm:$0xff] %v541_v57  ;;  %v497_v20 = vpop.f32.mrf.mxu1  ;;  %v479_v22 = vpop.f32.mrf.mxu0  ;;  %v6094_v44 = vsel %vm514_vm6, %v503_v31, %v513_v25  ;;  %v6097_v45 = vsel %vm516_vm5, %v503_v31, %v513_v25  ;;  %v5437_v25 = vld [vmem:[%s7503_s3 + $0x134] sm:$0xf0]  ;;  %v4199_v31 = vld [vmem:[%s7503_s3 + $0x1b0] sm:$0xf] }
  0xb4   : > { %570 = vst [vmem:[#allocation1 + $0x2] ss:$9 sm:$0xff] %v6005_v59  ;;  %v4007_v20 = vld [vmem:[%s7503_s3 + $0x30] sm:$0xf]  ;;  %v4208_v22 = vor.u32 %v5455_v18, %v4207_v14  ;;  %v4136_v34 = vor.u32 %v5437_v25, %v4135_v28  ;;  %v4200_v24 = vor.u32 %v5453_v33, %v4199_v31  ;;  %v5435_v46 = vld [vmem:[%s7503_s3 + $0x124] sm:$0xf0] }
  0xb5   : > { %571 = vst [vmem:[#allocation1 + $0x3] ss:$9 sm:$0xff] %v6010_v61  ;;  %1551 = vmatpush.bf16.msra.mxu3 %v4080_v12  ;;  %v4008_v23 = vor.u32 %v5405_v21, %v4007_v20  ;;  %v4119_v6 = vld [vmem:[%s7503_s3 + $0x110] sm:$0xf]  ;;  %v5449_v10 = vld [vmem:[%s7503_s3 + $0x194] sm:$0xf0] }
  0xb6   : > { %572 = vst [vmem:[#allocation1 + $0x4] ss:$9 sm:$0xff] %v6016_v0  ;;  %1579 = vmatpush.bf16.msrb.mxu1 %v4208_v22  ;;  %v4120_v8 = vor.u32 %v5433_v7, %v4119_v6  ;;  %v3983_v12 = vld [vmem:[%s7503_s3] sm:$0xf]  ;;  %v5399_v13 = vld [vmem:[%s7503_s3 + $0x4] sm:$0xf0] }
  0xb7   : > { %573 = vst [vmem:[#allocation1 + $0x5] ss:$9 sm:$0xff] %v6018_v1  ;;  %v3984_v14 = vor.u32 %v5399_v13, %v3983_v12  ;;  %v5415_v18 = vld [vmem:[%s7503_s3 + $0x84] sm:$0xf0]  ;;  %v4111_v20 = vld [vmem:[%s7503_s3 + $0x100] sm:$0xf] }
  0xb8   : > { %v5431_v22 = vld [vmem:[%s7503_s3 + $0x104] sm:$0xf0]  ;;  %v5477_v25 = vld [vmem:[%s7503_s3 + $0x274] sm:$0xf0]  ;;  %v4359_v31 = vld [vmem:[%s7503_s3 + $0x2f0] sm:$0xf] }
  0xb9   : > { %1552 = vmatpush.bf16.msra.mxu3 %v4072_v29  ;;  %v5447_v26 = vld [vmem:[%s7503_s3 + $0x184] sm:$0xf0]  ;;  %v4112_v27 = vor.u32 %v5431_v22, %v4111_v20  ;;  %v4295_v29 = vld [vmem:[%s7503_s3 + $0x270] sm:$0xf]  ;;  %v5509_v36 = vld [vmem:[%s7503_s3 + $0x374] sm:$0xf0] }
  0xba   : > { %1580 = vmatpush.bf16.msrb.mxu1 %v4200_v24  ;;  %v4296_v33 = vor.u32 %v5477_v25, %v4295_v29  ;;  %v4423_v24 = vld [vmem:[%s7503_s3 + $0x370] sm:$0xf]  ;;  %v5523_v6 = vld [vmem:[%s7503_s3 + $0x3e4] sm:$0xf0]  ;;  %v5489_v12 = vld [vmem:[%s7503_s3 + $0x2d4] sm:$0xf0] }
  0xbb   : > { %v4279_v7 = vld [vmem:[%s7503_s3 + $0x250] sm:$0xf]  ;;  %v5521_v20 = vld [vmem:[%s7503_s3 + $0x3d4] sm:$0xf0]  ;;  %v4399_v25 = vld [vmem:[%s7503_s3 + $0x340] sm:$0xf] }
  0xbc   : > { %v4407_v13 = vld [vmem:[%s7503_s3 + $0x350] sm:$0xf]  ;;  %v5513_v35 = vld [vmem:[%s7503_s3 + $0x394] sm:$0xf0] }
  0xbe   : > { %v6050_v16 = vld [vmem:[#allocation1] sm:$0xff]  ;;  %v6052_v17 = vld [vmem:[#allocation1 + $0x9] sm:$0xff] }
  0xbf   : > { %576 = vst [vmem:[#allocation1] ss:$9 sm:$0xff] %v518_v48  ;;  %v4023_v48 = vld [vmem:[%s7503_s3 + $0x50] sm:$0xf] }
  0xc0   : > { %578 = vst [vmem:[#allocation1 + $0x1] ss:$9 sm:$0xff] %v5958_v38  ;;  %v4024_v55 = vor.u32 %v5409_v49, %v4023_v48  ;;  %v4064_v49 = vor.u32 %v5419_v30, %v4063_v41  ;;  %v4424_v41 = vor.u32 %v5509_v36, %v4423_v24  ;;  %v5525_v30 = vld [vmem:[%s7503_s3 + $0x3f4] sm:$0xf0]  ;;  %v5519_v24 = vld [vmem:[%s7503_s3 + $0x3c4] sm:$0xf0] }
  0xc1   : > { %580 = vst [vmem:[#allocation1 + $0x2] ss:$9 sm:$0xff] %v5960_v39  ;;  %v4263_v36 = vld [vmem:[%s7503_s3 + $0x230] sm:$0xf] }
  0xc2   : > { %582 = vst [vmem:[#allocation1 + $0x3] ss:$9 sm:$0xff] %v5962_v40  ;;  %1536 = vmatpush.bf16.msra.mxu2 %v4024_v55  ;;  %v4128_v55 = vor.u32 %v5435_v46, %v4127_v32  ;;  %1553 = vmatpush.bf16.msra.mxu3 %v4064_v49  ;;  %v4287_v32 = vld [vmem:[%s7503_s3 + $0x260] sm:$0xf]  ;;  %v5475_v49 = vld [vmem:[%s7503_s3 + $0x264] sm:$0xf0] }
  0xc3   : > { %584 = vst [vmem:[#allocation1 + $0x4] ss:$9 sm:$0xff] %v5964_v42 }
  0xc4   : > { %586 = vst [vmem:[#allocation1 + $0x5] ss:$9 sm:$0xff] %v6059_v19 }
  0xc6   : > { %1537 = vmatpush.bf16.msra.mxu2 %v4016_v9  ;;  %v4183_v9 = vld [vmem:[%s7503_s3 + $0x190] sm:$0xf] }
  0xc7   : > { %v4184_v11 = vor.u32 %v5449_v10, %v4183_v9  ;;  %v5473_v9 = vld [vmem:[%s7503_s3 + $0x254] sm:$0xf0]  ;;  %v4343_v10 = vld [vmem:[%s7503_s3 + $0x2d0] sm:$0xf] }
  0xca   : > { %1538 = vmatpush.bf16.msra.mxu2 %v4008_v23  ;;  %v4175_v23 = vld [vmem:[%s7503_s3 + $0x180] sm:$0xf] }
  0xcb   : > { %v6107_v51 = vld [vmem:[#allocation1] sm:$0xff]  ;;  %v6109_v54 = vld [vmem:[#allocation1 + $0x9] sm:$0xff]  ;;  %v4176_v28 = vor.u32 %v5447_v26, %v4175_v23 }
  0xcc   : > { %589 = vst [vmem:[#allocation1] ss:$9 sm:$0xff] %v541_v57  ;;  %v4152_v57 = vor.u32 %v5441_v3, %v4151_v60  ;;  %v5451_v60 = vld [vmem:[%s7503_s3 + $0x1a4] sm:$0xf0]  ;;  %v3991_v3 = vld [vmem:[%s7503_s3 + $0x10] sm:$0xf] }
  0xcd   : > { %590 = vst [vmem:[#allocation1 + $0x1] ss:$9 sm:$0xff] %v6005_v59  ;;  %v4192_v2 = vor.u32 %v5451_v60, %v4191_v56  ;;  %v5491_v56 = vld [vmem:[%s7503_s3 + $0x2e4] sm:$0xf0]  ;;  %v4335_v26 = vld [vmem:[%s7503_s3 + $0x2c0] sm:$0xf] }
  0xce   : > { %591 = vst [vmem:[#allocation1 + $0x2] ss:$9 sm:$0xff] %v6010_v61  ;;  %1564 = vmatpush.bf16.msrb.mxu0 %v4152_v57  ;;  %1539 = vmatpush.bf16.msra.mxu2 %v4000_v43  ;;  %v4055_v57 = vld [vmem:[%s7503_s3 + $0x90] sm:$0xf]  ;;  %v5471_v23 = vld [vmem:[%s7503_s3 + $0x244] sm:$0xf0] }
  0xcf   : > { %592 = vst [vmem:[#allocation1 + $0x3] ss:$9 sm:$0xff] %v6016_v0  ;;  %v4056_v5 = vor.u32 %v5417_v4, %v4055_v57  ;;  %1581 = vmatpush.bf16.msrb.mxu1 %v4192_v2  ;;  %v4487_v43 = vld [vmem:[%s7503_s3 + $0x3f0] sm:$0xf]  ;;  %v5507_v57 = vld [vmem:[%s7503_s3 + $0x364] sm:$0xf0] }
  0xd0   : > { %593 = vst [vmem:[#allocation1 + $0x4] ss:$9 sm:$0xff] %v6018_v1  ;;  %v4488_v46 = vor.u32 %v5525_v30, %v4487_v43  ;;  %v4479_v4 = vld [vmem:[%s7503_s3 + $0x3e0] sm:$0xf]  ;;  %v4327_v43 = vld [vmem:[%s7503_s3 + $0x2b0] sm:$0xf] }
  0xd1   : > { %594 = vst [vmem:[#allocation1 + $0x5] ss:$9 sm:$0xff] %v6105_v50  ;;  %1554 = vmatpush.bf16.msra.mxu3 %v4056_v5  ;;  %v5485_v30 = vld [vmem:[%s7503_s3 + $0x2b4] sm:$0xf0] }
  0xd2   : > { %1565 = vmatpush.bf16.msrb.mxu0 %v4144_v15  ;;  %v4047_v15 = vld [vmem:[%s7503_s3 + $0x80] sm:$0xf] }
  0xd3   : > { %v4048_v21 = vor.u32 %v5415_v18, %v4047_v15  ;;  %1582 = vmatpush.bf16.msrb.mxu1 %v4184_v11  ;;  %v4280_v11 = vor.u32 %v5473_v9, %v4279_v7  ;;  %v5505_v15 = vld [vmem:[%s7503_s3 + $0x354] sm:$0xf0]  ;;  %v4383_v9 = vld [vmem:[%s7503_s3 + $0x320] sm:$0xf] }
  0xd4   : > { %v4408_v18 = vor.u32 %v5505_v15, %v4407_v13 }
  0xd5   : > { %1555 = vmatpush.bf16.msra.mxu3 %v4048_v21  ;;  %v4271_v21 = vld [vmem:[%s7503_s3 + $0x240] sm:$0xf] }
  0xd6   : > { %1566 = vmatpush.bf16.msrb.mxu0 %v4136_v34  ;;  %v5493_v34 = vld [vmem:[%s7503_s3 + $0x2f4] sm:$0xf0] }
  0xd7   : > { %v4360_v37 = vor.u32 %v5493_v34, %v4359_v31  ;;  %1583 = vmatpush.bf16.msrb.mxu1 %v4176_v28  ;;  %v4272_v28 = vor.u32 %v5471_v23, %v4271_v21  ;;  %v5503_v31 = vld [vmem:[%s7503_s3 + $0x344] sm:$0xf0]  ;;  %v4239_v23 = vld [vmem:[%s7503_s3 + $0x200] sm:$0xf] }
  0xd8   : > { %v6207_v47 = vld [vmem:[#allocation1] sm:$0xff]  ;;  %v6209_v48 = vld [vmem:[#allocation1 + $0x9] sm:$0xff]  ;;  %v4400_v34 = vor.u32 %v5503_v31, %v4399_v25 }
  0xd9   : > { %597 = vst [vmem:[#allocation1] ss:$9 sm:$0xff] %v5958_v38  ;;  %v3992_v38 = vor.u32 %v5401_v52, %v3991_v3  ;;  %1604 = vmatpush.bf16.msrb.mxu3 %v4360_v37  ;;  %v4288_v3 = vor.u32 %v5475_v49, %v4287_v32  ;;  %v5469_v37 = vld [vmem:[%s7503_s3 + $0x234] sm:$0xf0]  ;;  %v4391_v32 = vld [vmem:[%s7503_s3 + $0x330] sm:$0xf] }
  0xda   : > { %599 = vst [vmem:[#allocation1 + $0x1] ss:$9 sm:$0xff] %v5960_v39  ;;  %1567 = vmatpush.bf16.msrb.mxu0 %v4128_v55  ;;  %v4351_v55 = vld [vmem:[%s7503_s3 + $0x2e0] sm:$0xf]  ;;  %v5501_v49 = vld [vmem:[%s7503_s3 + $0x334] sm:$0xf0] }
  0xdb   : > { %601 = vst [vmem:[#allocation1 + $0x2] ss:$9 sm:$0xff] %v5962_v40  ;;  %1540 = vmatpush.bf16.msra.mxu2 %v3992_v38  ;;  %v4352_v52 = vor.u32 %v5491_v56, %v4351_v55  ;;  %v4415_v38 = vld [vmem:[%s7503_s3 + $0x360] sm:$0xf]  ;;  %1632 = vmatpush.bf16.msra.mxu1 %v4488_v46  ;;  %v4264_v46 = vor.u32 %v5469_v37, %v4263_v36  ;;  %v4455_v55 = vld [vmem:[%s7503_s3 + $0x3b0] sm:$0xf] }
  0xdc   : > { %603 = vst [vmem:[#allocation1 + $0x3] ss:$9 sm:$0xff] %v5964_v42  ;;  %v4416_v5 = vor.u32 %v5507_v57, %v4415_v38  ;;  %v5517_v56 = vld [vmem:[%s7503_s3 + $0x3b4] sm:$0xf0]  ;;  %v5467_v38 = vld [vmem:[%s7503_s3 + $0x224] sm:$0xf0] }
  0xdd   : > { %605 = vst [vmem:[#allocation1 + $0x4] ss:$9 sm:$0xff] %v6059_v19  ;;  %1605 = vmatpush.bf16.msrb.mxu3 %v4352_v52  ;;  %v4255_v52 = vld [vmem:[%s7503_s3 + $0x220] sm:$0xf]  ;;  %v4456_v7 = vor.u32 %v5517_v56, %v4455_v55  ;;  %v5495_v31 = vld [vmem:[%s7503_s3 + $0x304] sm:$0xf0] }
  0xde   : > { %607 = vst [vmem:[#allocation1 + $0x5] ss:$9 sm:$0xff] %v536_v58  ;;  %1568 = vmatpush.bf16.msrb.mxu0 %v4120_v8  ;;  %v4480_v8 = vor.u32 %v5523_v6, %v4479_v4  ;;  %v4319_v57 = vld [vmem:[%s7503_s3 + $0x2a0] sm:$0xf]  ;;  %v4392_v6 = vor.u32 %v5501_v49, %v4391_v32  ;;  %v641_v55 = vrot.slane %v6109_v54, 2 }
  0xdf   : > { %1541 = vmatpush.bf16.msra.mxu2 %v3984_v14  ;;  %v4344_v14 = vor.u32 %v5489_v12, %v4343_v10  ;;  %v5499_v10 = vld [vmem:[%s7503_s3 + $0x324] sm:$0xf0]  ;;  %v4447_v12 = vld [vmem:[%s7503_s3 + $0x3a0] sm:$0xf] }
  0xe0   : > { %1633 = vmatpush.bf16.msra.mxu1 %v4480_v8  ;;  %v5483_v8 = vld [vmem:[%s7503_s3 + $0x2a4] sm:$0xf0]  ;;  %v4384_v15 = vor.u32 %v5499_v10, %v4383_v9  ;;  %v4367_v25 = vld [vmem:[%s7503_s3 + $0x300] sm:$0xf]  ;;  %v646_v9 = vrot.slane %v6207_v47, 4  ;;  %v647_v10 = vrot.slane %v6209_v48, 2 }
  0xe1   : > { %1606 = vmatpush.bf16.msrb.mxu3 %v4344_v14  ;;  %v4320_v13 = vor.u32 %v5483_v8, %v4319_v57  ;;  %v4247_v14 = vld [vmem:[%s7503_s3 + $0x210] sm:$0xf]  ;;  %v639_v57 = vrot.slane %v6014_v63, 6 }
  0xe2   : > { %1569 = vmatpush.bf16.msrb.mxu0 %v4112_v27  ;;  %v5487_v27 = vld [vmem:[%s7503_s3 + $0x2c4] sm:$0xf0] }
  0xe3   : > { %1590 = vmatpush.bf16.msrb.mxu2 %v4296_v33  ;;  %v4336_v29 = vor.u32 %v5487_v27, %v4335_v26  ;;  %v4463_v33 = vld [vmem:[%s7503_s3 + $0x3c0] sm:$0xf]  ;;  %v652_v47 = vsel %vm651_vm9, %v6012_v62, %v639_v57 }
  0xe5   : > { %v6309_v60 = vld [vmem:[#allocation1] sm:$0xff]  ;;  %v6311_v2 = vld [vmem:[#allocation1 + $0x9] sm:$0xff]  ;;  %1607 = vmatpush.bf16.msrb.mxu3 %v4336_v29 }
  0xe6   : > { %612 = vst [vmem:[#allocation1 + $0x2] ss:$9 sm:$0xff] %v6016_v0  ;;  %1618 = vmatpush.bf16.msra.mxu0 %v4424_v41  ;;  %v4464_v41 = vor.u32 %v5519_v24, %v4463_v33  ;;  %v5479_v29 = vld [vmem:[%s7503_s3 + $0x284] sm:$0xf0]  ;;  %v4431_v33 = vld [vmem:[%s7503_s3 + $0x380] sm:$0xf] }
  0xe7   : > { %613 = vst [vmem:[#allocation1 + $0x3] ss:$9 sm:$0xff] %v6018_v1  ;;  %1591 = vmatpush.bf16.msrb.mxu2 %v4288_v3  ;;  %v4328_v3 = vor.u32 %v5485_v30, %v4327_v43  ;;  %v642_v37 = vrot.slane %v6311_v2, 6  ;;  %v640_v2 = vrot.slane %v6107_v51, 4  ;;  %v554_v51 = vrot.slane %v6097_v45, 1 }
  0xe8   : > { %614 = vst [vmem:[#allocation1 + $0x4] ss:$9 sm:$0xff] %v6105_v50 }
  0xe9   : > { %610 = vst [vmem:[#allocation1] ss:$9 sm:$0xff] %v6005_v59  ;;  %v4471_v59 = vld [vmem:[%s7503_s3 + $0x3d0] sm:$0xf]  ;;  %1608 = vmatpush.bf16.msrb.mxu3 %v4328_v3  ;;  %v657_v56 = vsel %vm651_vm9, %v6309_v60, %v642_v37  ;;  %v667_v3 = vsel %vm7513_vm11, %v6309_v60, %v642_v37  ;;  %v672_v45 = vsel %vm651_vm9, %v640_v2, %v641_v55 }
  0xea   : > { %611 = vst [vmem:[#allocation1 + $0x1] ss:$9 sm:$0xff] %v6010_v61  ;;  %1619 = vmatpush.bf16.msra.mxu0 %v4416_v5  ;;  %v4472_v22 = vor.u32 %v5521_v20, %v4471_v59  ;;  %v4375_v20 = vld [vmem:[%s7503_s3 + $0x310] sm:$0xf] }
  0xeb   : > { %615 = vst [vmem:[#allocation1 + $0x5] ss:$9 sm:$0xff] %v6094_v44  ;;  %1592 = vmatpush.bf16.msrb.mxu2 %v4280_v11  ;;  %v4256_v11 = vor.u32 %v5467_v38, %v4255_v52 }
  0xec   : > { %1634 = vmatpush.bf16.msra.mxu1 %v4472_v22  ;;  %v4439_v22 = vld [vmem:[%s7503_s3 + $0x390] sm:$0xf] }
  0xed   : > { %1609 = vmatpush.bf16.msrb.mxu3 %v4320_v13  ;;  %v4440_v27 = vor.u32 %v5513_v35, %v4439_v22 }
  0xee   : > { %1620 = vmatpush.bf16.msra.mxu0 %v4408_v18  ;;  %v5481_v18 = vld [vmem:[%s7503_s3 + $0x294] sm:$0xf0] }
  0xef   : > { %1593 = vmatpush.bf16.msrb.mxu2 %v4272_v28  ;;  %v4303_v28 = vld [vmem:[%s7503_s3 + $0x280] sm:$0xf] }
  0xf0   : > { %1635 = vmatpush.bf16.msra.mxu1 %v4464_v41  ;;  %v4304_v36 = vor.u32 %v5479_v29, %v4303_v28  ;;  %v4368_v41 = vor.u32 %v5495_v31, %v4367_v25 }
  0xf2   : > { %v6412_v4 = vld [vmem:[#allocation1] sm:$0xff]  ;;  %v6414_v5 = vld [vmem:[#allocation1 + $0x9] sm:$0xff]  ;;  %1621 = vmatpush.bf16.msra.mxu0 %v4400_v34 }
  0xf3   : > { %618 = vst [vmem:[#allocation1] ss:$9 sm:$0xff] %v5960_v39  ;;  %1594 = vmatpush.bf16.msrb.mxu2 %v4264_v46  ;;  %v5515_v39 = vld [vmem:[%s7503_s3 + $0x3a4] sm:$0xf0] }
  0xf4   : > { %620 = vst [vmem:[#allocation1 + $0x1] ss:$9 sm:$0xff] %v5962_v40  ;;  %v5465_v40 = vld [vmem:[%s7503_s3 + $0x214] sm:$0xf0]  ;;  %1636 = vmatpush.bf16.msra.mxu1 %v4456_v7  ;;  %v4448_v59 = vor.u32 %v5515_v39, %v4447_v12  ;;  %v5511_v34 = vld [vmem:[%s7503_s3 + $0x384] sm:$0xf0]  ;;  %v663_v7 = vsel %vm662_vm13, %v641_v55, %v640_v2 }
  0xf5   : > { %622 = vst [vmem:[#allocation1 + $0x2] ss:$9 sm:$0xff] %v5964_v42  ;;  %v4311_v42 = vld [vmem:[%s7503_s3 + $0x290] sm:$0xf]  ;;  %v4248_v21 = vor.u32 %v5465_v40, %v4247_v14  ;;  %v4432_v43 = vor.u32 %v5511_v34, %v4431_v33  ;;  %v645_v12 = vrot.slane %v6052_v17, 6 }
  0xf6   : > { %624 = vst [vmem:[#allocation1 + $0x3] ss:$9 sm:$0xff] %v6059_v19  ;;  %1622 = vmatpush.bf16.msra.mxu0 %v4392_v6  ;;  %v5497_v19 = vld [vmem:[%s7503_s3 + $0x314] sm:$0xf0] }
  0xf7   : > { %626 = vst [vmem:[#allocation1 + $0x4] ss:$9 sm:$0xff] %v536_v58  ;;  %1595 = vmatpush.bf16.msrb.mxu2 %v4256_v11  ;;  %v4312_v58 = vor.u32 %v5481_v18, %v4311_v42  ;;  %v4376_v26 = vor.u32 %v5497_v19, %v4375_v20  ;;  %v671_v11 = vsel %vm653_vm10, %v6012_v62, %v639_v57  ;;  %v648_v20 = vrot.slane %v6414_v5, 6 }
  0xf8   : > { %628 = vst [vmem:[#allocation1 + $0x5] ss:$9 sm:$0xff] %v5993_v53  ;;  %v5463_v53 = vld [vmem:[%s7503_s3 + $0x204] sm:$0xf0]  ;;  %1637 = vmatpush.bf16.msra.mxu1 %v4448_v59  ;;  %v673_v39 = vsel %vm655_vm12, %v672_v45, %v671_v11  ;;  %v679_v42 = vsel %vm651_vm9, %v6050_v16, %v645_v12  ;;  %v686_v18 = vsel %vm662_vm13, %v647_v10, %v646_v9  ;;  %v5426_v11 = vld [vmem:[%s7503_s3 + $0xe4] sm:$0xf] }
  0xf9   : > { %v4240_v24 = vor.u32 %v5463_v53, %v4239_v23  ;;  %1610 = vmatpush.bf16.msrb.mxu3 %v4312_v58  ;;  %v674_v59 = vrot.slane %v673_v39, 4  ;;  %v685_v19 = vsel %vm7513_vm11, %v6050_v16, %v645_v12  ;;  %v682_v53 = vsel %vm651_vm9, %v6412_v4, %v648_v20  ;;  %v5442_v39 = vld [vmem:[%s7503_s3 + $0x164] sm:$0xf] }
  0xfa   : > { %1623 = vmatpush.bf16.msra.mxu0 %v4384_v15  ;;  %v680_v15 = vsel %vm653_vm10, %v646_v9, %v647_v10  ;;  %v687_v58 = vsel %vm7512_vm14, %v685_v19, %v686_v18  ;;  %v5424_v18 = vld [vmem:[%s7503_s3 + $0xd4] sm:$0xf]  ;;  %v4153_v19 = vld [vmem:[%s7503_s3 + $0x158] sm:$0xf0] }
  0xfb   : > { %1596 = vmatpush.bf16.msrb.mxu2 %v4248_v21  ;;  %v681_v17 = vsel %vm655_vm12, %v679_v42, %v680_v15  ;;  %v693_v21 = vsel %vm653_vm10, %v6050_v16, %v645_v12  ;;  %v688_v5 = vrot.slane %v687_v58, 2  ;;  %v4097_v12 = vld [vmem:[%s7503_s3 + $0xe8] sm:$0xf0]  ;;  %v5408_v15 = vld [vmem:[%s7503_s3 + $0x54] sm:$0xf] }
  0xfc   : > { %1638 = vmatpush.bf16.msra.mxu1 %v4440_v27 }
  0xfd   : > { %1611 = vmatpush.bf16.msrb.mxu3 %v4304_v36  ;;  %v697_v36 = vsel %vm653_vm10, %v6412_v4, %v648_v20 }
  0xfe   : > { %1624 = vmatpush.bf16.msra.mxu0 %v4376_v26 }
  0xff   : > { %v629_v30 = vld [vmem:[#allocation1] sm:$0xff]  ;;  %v630_v32 = vld [vmem:[#allocation1 + $0x9] sm:$0xff]  ;;  %1597 = vmatpush.bf16.msrb.mxu2 %v4240_v24  ;;  %v689_v24 = vsel %vm7513_vm11, %v6412_v4, %v648_v20  ;;  %v5428_v4 = vld [vmem:[%s7503_s3 + $0xf4] sm:$0xf] }
 0x100   : > { %631 = vst [vmem:[#allocation1] ss:$9 sm:$0xff] %v6010_v61  ;;  %v643_v46 = vrot.slane %v629_v30, 4  ;;  %v644_v49 = vrot.slane %v630_v32, 2  ;;  %1639 = vmatpush.bf16.msra.mxu1 %v4432_v43  ;;  %v5412_v32 = vld [vmem:[%s7503_s3 + $0x74] sm:$0xf] }
 0x101   : > { %632 = vst [vmem:[#allocation1 + $0x1] ss:$9 sm:$0xff] %v6016_v0  ;;  %v5440_v20 = vld [vmem:[%s7503_s3 + $0x154] sm:$0xf] }
 0x102   : > { %633 = vst [vmem:[#allocation1 + $0x2] ss:$9 sm:$0xff] %v6018_v1  ;;  %1625 = vmatpush.bf16.msra.mxu0 %v4368_v41  ;;  %v658_v61 = vsel %vm653_vm10, %v643_v46, %v644_v49  ;;  %v668_v0 = vsel %vm662_vm13, %v644_v49, %v643_v46  ;;  %v676_v52 = vsel %vm651_vm9, %v643_v46, %v644_v49  ;;  %v4041_v46 = vld [vmem:[%s7503_s3 + $0x78] sm:$0xf0] }
 0x103   : > { %634 = vst [vmem:[#allocation1 + $0x3] ss:$9 sm:$0xff] %v6105_v50  ;;  %v659_v54 = vsel %vm655_vm12, %v657_v56, %v658_v61  ;;  %v669_v38 = vsel %vm7512_vm14, %v667_v3, %v668_v0  ;;  %v675_v1 = vsel %vm653_vm10, %v6309_v60, %v642_v37  ;;  %v661_v60 = vsel %vm7513_vm11, %v6012_v62, %v639_v57  ;;  %v4105_v49 = vld [vmem:[%s7503_s3 + $0xf8] sm:$0xf0]  ;;  %v5444_v61 = vld [vmem:[%s7503_s3 + $0x174] sm:$0xf] }
 0x104   : > { %635 = vst [vmem:[#allocation1 + $0x4] ss:$9 sm:$0xff] %v6094_v44  ;;  %v677_v6 = vsel %vm655_vm12, %v676_v52, %v675_v1  ;;  %v670_v8 = vrot.slane %v669_v38, 2  ;;  %v654_v44 = vsel %vm653_vm10, %v640_v2, %v641_v55  ;;  %v665_v63 = vsel %vm7512_vm14, %v661_v60, %v663_v7  ;;  %v4169_v0 = vld [vmem:[%s7503_s3 + $0x178] sm:$0xf0] }
 0x105   : > { %636 = vst [vmem:[#allocation1 + $0x5] ss:$9 sm:$0xff] %v554_v51  ;;  %v678_v50 = vrot.slane %v677_v6, 4  ;;  %v656_v14 = vsel %vm655_vm12, %v652_v47, %v654_v44  ;;  %v666_v40 = vrot.slane %v665_v63, 2  ;;  %v694_v62 = vsel %vm651_vm9, %v646_v9, %v647_v10  ;;  %v5460_v52 = vld [vmem:[%s7503_s3 + $0x1f4] sm:$0xf] }
 0x106   : > { %709 = vst [vmem:[#allocation1 + $0x20] ss:$4 sm:$0xff] %v659_v54  ;;  %v695_v23 = vsel %vm655_vm12, %v694_v62, %v693_v21  ;;  %v4233_v51 = vld [vmem:[%s7503_s3 + $0x1f8] sm:$0xf0]  ;;  %v5410_v1 = vld [vmem:[%s7503_s3 + $0x64] sm:$0xf]  ;;  %v4108_v9 = vor.u32 %v5428_v4, %v4105_v49  ;;  %v4172_v44 = vor.u32 %v5444_v61, %v4169_v0 }
 0x107   : > { %711 = vst [vmem:[#allocation1 + $0x21] ss:$4 sm:$0xff] %v670_v8  ;;  %v696_v28 = vrot.slane %v695_v23, 4  ;;  %v4033_v57 = vld [vmem:[%s7503_s3 + $0x68] sm:$0xf0]  ;;  %v4236_v63 = vor.u32 %v5460_v52, %v4233_v51 }
 0x108   : > { %713 = vst [vmem:[#allocation1 + $0x22] ss:$4 sm:$0xff] %v678_v50  ;;  %v4044_v50 = vor.u32 %v5412_v32, %v4041_v46  ;;  %v4161_v47 = vld [vmem:[%s7503_s3 + $0x168] sm:$0xf0]  ;;  %v4089_v62 = vld [vmem:[%s7503_s3 + $0xd8] sm:$0xf0] }
 0x109   : > { %v4164_v42 = vor.u32 %v5442_v39, %v4161_v47  ;;  %v5456_v21 = vld [vmem:[%s7503_s3 + $0x1d4] sm:$0xf]  ;;  %v4092_v23 = vor.u32 %v5424_v18, %v4089_v62  ;;  %v4201_v46 = vld [vmem:[%s7503_s3 + $0x1b8] sm:$0xf0] }
 0x10a   : > { %v5452_v32 = vld [vmem:[%s7503_s3 + $0x1b4] sm:$0xf]  ;;  %v4185_v62 = vld [vmem:[%s7503_s3 + $0x198] sm:$0xf0] }
 0x10b   : > { %v5448_v18 = vld [vmem:[%s7503_s3 + $0x194] sm:$0xf] }
 0x10c   : > { %v637_v48 = vld [vmem:[#allocation1] sm:$0xff]  ;;  %v638_v13 = vld [vmem:[#allocation1 + $0x9] sm:$0xff] }
 0x10d   : > { %701 = vst [vmem:[#allocation1] ss:$4 sm:$0xff] %v656_v14  ;;  %v649_v22 = vrot.slane %v637_v48, 4  ;;  %v650_v35 = vrot.slane %v638_v13, 2  ;;  %v5458_v48 = vld [vmem:[%s7503_s3 + $0x1e4] sm:$0xf]  ;;  %v4036_v14 = vor.u32 %v5410_v1, %v4033_v57 }
 0x10e   : > { %703 = vst [vmem:[#allocation1 + $0x1] ss:$4 sm:$0xff] %v666_v40  ;;  %v4225_v13 = vld [vmem:[%s7503_s3 + $0x1e8] sm:$0xf0]  ;;  %v4100_v40 = vor.u32 %v5426_v11, %v4097_v12  ;;  %v5434_v11 = vld [vmem:[%s7503_s3 + $0x124] sm:$0xf] }
 0x10f   : > { %705 = vst [vmem:[#allocation1 + $0x2] ss:$4 sm:$0xff] %v674_v59  ;;  %v683_v26 = vsel %vm653_vm10, %v649_v22, %v650_v35  ;;  %v690_v29 = vsel %vm662_vm13, %v650_v35, %v649_v22  ;;  %v698_v25 = vsel %vm651_vm9, %v649_v22, %v650_v35  ;;  %v4025_v59 = vld [vmem:[%s7503_s3 + $0x58] sm:$0xf0]  ;;  %v5406_v35 = vld [vmem:[%s7503_s3 + $0x44] sm:$0xf] }
 0x110   : > { %707 = vst [vmem:[#allocation1 + $0x3] ss:$4 sm:$0xff] %v681_v17  ;;  %v684_v27 = vsel %vm655_vm12, %v682_v53, %v683_v26  ;;  %v691_v37 = vsel %vm7512_vm14, %v689_v24, %v690_v29  ;;  %v699_v41 = vsel %vm655_vm12, %v698_v25, %v697_v36  ;;  %v4228_v17 = vor.u32 %v5458_v48, %v4225_v13  ;;  %v4217_v22 = vld [vmem:[%s7503_s3 + $0x1d8] sm:$0xf0]  ;;  %v4017_v53 = vld [vmem:[%s7503_s3 + $0x48] sm:$0xf0] }
 0x111   : > { %715 = vst [vmem:[#allocation1 + $0x23] ss:$4 sm:$0xff] %v684_v27  ;;  %v692_v43 = vrot.slane %v691_v37, 2  ;;  %v700_v30 = vrot.slane %v699_v41, 4  ;;  %v4028_v58 = vor.u32 %v5408_v15, %v4025_v59  ;;  %v5422_v26 = vld [vmem:[%s7503_s3 + $0xc4] sm:$0xf]  ;;  %v4020_v41 = vor.u32 %v5406_v35, %v4017_v53 }
 0x112   : > { %v4081_v27 = vld [vmem:[%s7503_s3 + $0xc8] sm:$0xf0]  ;;  %v5438_v29 = vld [vmem:[%s7503_s3 + $0x144] sm:$0xf]  ;;  %v5420_v24 = vld [vmem:[%s7503_s3 + $0xb4] sm:$0xf]  ;;  %v4188_v53 = vor.u32 %v5448_v18, %v4185_v62 }
 0x113   : > { %v4145_v25 = vld [vmem:[%s7503_s3 + $0x148] sm:$0xf0]  ;;  %v4073_v36 = vld [vmem:[%s7503_s3 + $0xb8] sm:$0xf0]  ;;  %v5436_v37 = vld [vmem:[%s7503_s3 + $0x134] sm:$0xf] }
 0x114   : > { %v4148_v4 = vor.u32 %v5438_v29, %v4145_v25  ;;  %v4193_v12 = vld [vmem:[%s7503_s3 + $0x1a8] sm:$0xf0]  ;;  %v5400_v48 = vld [vmem:[%s7503_s3 + $0x14] sm:$0xf]  ;;  %v3993_v13 = vld [vmem:[%s7503_s3 + $0x18] sm:$0xf0] }
 0x115   : > { %v5416_v15 = vld [vmem:[%s7503_s3 + $0x94] sm:$0xf]  ;;  %v4057_v59 = vld [vmem:[%s7503_s3 + $0x98] sm:$0xf0]  ;;  %v5414_v35 = vld [vmem:[%s7503_s3 + $0x84] sm:$0xf] }
 0x116   : > { %v5476_v29 = vld [vmem:[%s7503_s3 + $0x274] sm:$0xf]  ;;  %v4297_v25 = vld [vmem:[%s7503_s3 + $0x278] sm:$0xf0]  ;;  %v5518_v18 = vld [vmem:[%s7503_s3 + $0x3c4] sm:$0xf] }
 0x117   : > { %v716_v16 = vld.sshfl [vmem:[#allocation1] sm:$0xff pattern:$0x73625140]  ;;  %v717_v31 = vld.sshfl [vmem:[#allocation1 + $0x8] sm:$0xff pattern:$0x73625140] }
 0x118   : > { %v718_v33 = vld.sshfl [vmem:[#allocation1 + $0x10] sm:$0xff pattern:$0x73625140]  ;;  %v719_v34 = vld.sshfl [vmem:[#allocation1 + $0x18] sm:$0xff pattern:$0x73625140] }
 0x119   : > { %724 = vst [vmem:[#allocation1] ss:$4 sm:$0xff] %v688_v5  ;;  %v6560_v2 = vld.sshfl [vmem:[#allocation1 + $0x20] sm:$0xff pattern:$0x73625140]  ;;  %v4156_v5 = vor.u32 %v5440_v20, %v4153_v19  ;;  %v3996_v19 = vor.u32 %v5400_v48, %v3993_v13  ;;  %vm1859_vm14 = vcmask 1044481  }
 0x11a   : > { %725 = vst [vmem:[#allocation1 + $0x1] ss:$4 sm:$0xff] %v696_v28  ;;  %v6562_v55 = vld.sshfl [vmem:[#allocation1 + $0x28] sm:$0xff pattern:$0x73625140]  ;;  %v4220_v28 = vor.u32 %v5456_v21, %v4217_v22  ;;  %v4060_v21 = vor.u32 %v5416_v15, %v4057_v59 }
 0x11b   : > { %v6564_v56 = vld.sshfl [vmem:[#allocation1 + $0x30] sm:$0xff pattern:$0x73625140]  ;;  %v6566_v3 = vld.sshfl [vmem:[#allocation1 + $0x38] sm:$0xff pattern:$0x73625140] }
 0x11c   : > { %726 = vst [vmem:[#allocation1 + $0x20] ss:$4 sm:$0xff] %v692_v43  ;;  %v4084_v43 = vor.u32 %v5422_v26, %v4081_v27  ;;  %v5398_v20 = vld [vmem:[%s7503_s3 + $0x4] sm:$0xf]  ;;  %v3985_v22 = vld [vmem:[%s7503_s3 + $0x8] sm:$0xf0] }
 0x11d   : > { %727 = vst [vmem:[#allocation1 + $0x21] ss:$4 sm:$0xff] %v700_v30  ;;  %v4137_v30 = vld [vmem:[%s7503_s3 + $0x138] sm:$0xf0]  ;;  %v5430_v26 = vld [vmem:[%s7503_s3 + $0x104] sm:$0xf] }
 0x11e   : > { %v4113_v27 = vld [vmem:[%s7503_s3 + $0x108] sm:$0xf0]  ;;  %v5520_v48 = vld [vmem:[%s7503_s3 + $0x3d4] sm:$0xf]  ;;  %v4473_v13 = vld [vmem:[%s7503_s3 + $0x3d8] sm:$0xf0] }
 0x11f   : > { %v4476_v59 = vor.u32 %v5520_v48, %v4473_v13  ;;  %v4465_v62 = vld [vmem:[%s7503_s3 + $0x3c8] sm:$0xf0]  ;;  %v5510_v48 = vld [vmem:[%s7503_s3 + $0x384] sm:$0xf] }
 0x120   : > { %v4433_v13 = vld [vmem:[%s7503_s3 + $0x388] sm:$0xf0] }
 0x121   : > { %v728_v54 = vld.sshfl [vmem:[#allocation1] sm:$0xff pattern:$0x73625140]  ;;  %v729_v38 = vld.sshfl [vmem:[#allocation1 + $0x8] sm:$0xff pattern:$0x73625140] }
 0x122   : > { %v6586_v6 = vpack.c.bf16 %v728_v54, %v716_v16  ;;  %v6588_v7 = vpack.c.bf16 %v729_v38, %v717_v31  ;;  %v730_v8 = vld.sshfl [vmem:[#allocation1 + $0x10] sm:$0xff pattern:$0x73625140]  ;;  %v731_v45 = vld.sshfl [vmem:[#allocation1 + $0x18] sm:$0xff pattern:$0x73625140]  ;;  %v4076_v38 = vor.u32 %v5420_v24, %v4073_v36 }
 0x123   : > { %v6590_v10 = vpack.c.bf16 %v730_v8, %v718_v33  ;;  %v6592_v60 = vpack.c.bf16 %v731_v45, %v719_v34  ;;  %v5454_v16 = vld [vmem:[%s7503_s3 + $0x1c4] sm:$0xf]  ;;  %v4209_v31 = vld [vmem:[%s7503_s3 + $0x1c8] sm:$0xf0]  ;;  %v5404_v33 = vld [vmem:[%s7503_s3 + $0x34] sm:$0xf]  ;;  %v4140_v8 = vor.u32 %v5436_v37, %v4137_v30 }
 0x124   : > { %1542 = vmatmul.bf16.vlgmr.msra.gmra.mxu2 %v6586_v6  ;;  %1556 = vmatmul.bf16.vlgmr.msra.gmra.mxu3 %v6588_v7  ;;  %v4009_v34 = vld [vmem:[%s7503_s3 + $0x38] sm:$0xf0]  ;;  %v4212_v49 = vor.u32 %v5454_v16, %v4209_v31  ;;  %v732_v61 = vld.sshfl [vmem:[#allocation1 + $0x20] sm:$0xff pattern:$0x73625140] }
 0x125   : > { %1570 = vmatmul.bf16.vlgmr.msrb.gmra.mxu0 %v6590_v10  ;;  %1584 = vmatmul.bf16.vlgmr.msrb.gmra.mxu1 %v6592_v60  ;;  %v733_v0 = vld.sshfl [vmem:[#allocation1 + $0x28] sm:$0xff pattern:$0x73625140]  ;;  %v734_v52 = vld.sshfl [vmem:[#allocation1 + $0x30] sm:$0xff pattern:$0x73625140]  ;;  %v4012_v54 = vor.u32 %v5404_v33, %v4009_v34  ;;  %v6689_v1 = vpack.c.bf16 %v732_v61, %v6560_v2  ;;  %v3988_v34 = vor.u32 %v5398_v20, %v3985_v22 }
 0x126   : > { %1646 = vmatpush.bf16.msra.mxu2 %v4044_v50  ;;  %1660 = vmatpush.bf16.msra.mxu3 %v4108_v9  ;;  %v735_v51 = vld.sshfl [vmem:[#allocation1 + $0x38] sm:$0xff pattern:$0x73625140]  ;;  %v6692_v57 = vpack.c.bf16 %v733_v0, %v6562_v55  ;;  %v5402_v45 = vld [vmem:[%s7503_s3 + $0x24] sm:$0xf]  ;;  %v6701_v9 = vpack.c.bf16 %v734_v52, %v6564_v56 }
 0x127   : > { %1674 = vmatpush.bf16.msrb.mxu0 %v4172_v44  ;;  %1688 = vmatpush.bf16.msrb.mxu1 %v4236_v63  ;;  %v4001_v50 = vld [vmem:[%s7503_s3 + $0x28] sm:$0xf0]  ;;  %v6704_v2 = vpack.c.bf16 %v735_v51, %v6566_v3  ;;  %v4204_v44 = vor.u32 %v5452_v32, %v4201_v46  ;;  %v5418_v55 = vld [vmem:[%s7503_s3 + $0xa4] sm:$0xf]  ;;  %v5492_v16 = vld [vmem:[%s7503_s3 + $0x2f4] sm:$0xf]  ;;  %v4300_v32 = vor.u32 %v5476_v29, %v4297_v25 }
 0x128   : > { %v4065_v63 = vld [vmem:[%s7503_s3 + $0xa8] sm:$0xf0]  ;;  %v5450_v3 = vld [vmem:[%s7503_s3 + $0x1a4] sm:$0xf]  ;;  %v4004_v39 = vor.u32 %v5402_v45, %v4001_v50  ;;  %v4361_v31 = vld [vmem:[%s7503_s3 + $0x2f8] sm:$0xf0] }
 0x129   : > { %v4129_v56 = vld [vmem:[%s7503_s3 + $0x128] sm:$0xf0]  ;;  %v4068_v47 = vor.u32 %v5418_v55, %v4065_v63  ;;  %v5508_v33 = vld [vmem:[%s7503_s3 + $0x374] sm:$0xf]  ;;  %v4425_v36 = vld [vmem:[%s7503_s3 + $0x378] sm:$0xf0]  ;;  %v4364_v46 = vor.u32 %v5492_v16, %v4361_v31 }
 0x12a   : > { %1647 = vmatpush.bf16.msra.mxu2 %v4036_v14  ;;  %1661 = vmatpush.bf16.msra.mxu3 %v4100_v40  ;;  %v4132_v14 = vor.u32 %v5434_v11, %v4129_v56  ;;  %v4196_v40 = vor.u32 %v5450_v3, %v4193_v12  ;;  %v5524_v37 = vld [vmem:[%s7503_s3 + $0x3f4] sm:$0xf]  ;;  %v4428_v61 = vor.u32 %v5508_v33, %v4425_v36  ;;  %v5490_v52 = vld [vmem:[%s7503_s3 + $0x2e4] sm:$0xf]  ;;  %v4353_v51 = vld [vmem:[%s7503_s3 + $0x2e8] sm:$0xf0] }
 0x12b   : > { %1675 = vmatpush.bf16.msrb.mxu0 %v4164_v42  ;;  %1689 = vmatpush.bf16.msrb.mxu1 %v4228_v17  ;;  %v5432_v42 = vld [vmem:[%s7503_s3 + $0x114] sm:$0xf]  ;;  %v4121_v17 = vld [vmem:[%s7503_s3 + $0x118] sm:$0xf0]  ;;  %v4481_v45 = vld [vmem:[%s7503_s3 + $0x3e8] sm:$0xf0] }
 0x12c   : > { %v5472_v55 = vld [vmem:[%s7503_s3 + $0x254] sm:$0xf]  ;;  %v4281_v63 = vld [vmem:[%s7503_s3 + $0x258] sm:$0xf0]  ;;  %v5466_v16 = vld [vmem:[%s7503_s3 + $0x224] sm:$0xf] }
 0x12d   : > { %v5488_v3 = vld [vmem:[%s7503_s3 + $0x2d4] sm:$0xf]  ;;  %v4345_v12 = vld [vmem:[%s7503_s3 + $0x2d8] sm:$0xf0]  ;;  %v4257_v31 = vld [vmem:[%s7503_s3 + $0x228] sm:$0xf0] }
 0x12e   : > { %1648 = vmatpush.bf16.msra.mxu2 %v4028_v58  ;;  %1662 = vmatpush.bf16.msra.mxu3 %v4092_v23  ;;  %v4049_v58 = vld [vmem:[%s7503_s3 + $0x88] sm:$0xf0]  ;;  %v4124_v23 = vor.u32 %v5432_v42, %v4121_v17  ;;  %v5502_v42 = vld [vmem:[%s7503_s3 + $0x344] sm:$0xf]  ;;  %v4265_v22 = vld [vmem:[%s7503_s3 + $0x238] sm:$0xf0] }
 0x12f   : > { %1676 = vmatpush.bf16.msrb.mxu0 %v4156_v5  ;;  %1690 = vmatpush.bf16.msrb.mxu1 %v4220_v28  ;;  %v5446_v5 = vld [vmem:[%s7503_s3 + $0x184] sm:$0xf]  ;;  %v4177_v28 = vld [vmem:[%s7503_s3 + $0x188] sm:$0xf0]  ;;  %v4052_v24 = vor.u32 %v5414_v35, %v4049_v58  ;;  %v4468_v58 = vor.u32 %v5518_v18, %v4465_v62 }
 0x130   : > { %v4180_v30 = vor.u32 %v5446_v5, %v4177_v28  ;;  %v4401_v17 = vld [vmem:[%s7503_s3 + $0x348] sm:$0xf0]  ;;  %v5516_v5 = vld [vmem:[%s7503_s3 + $0x3b4] sm:$0xf]  ;;  %v4457_v28 = vld [vmem:[%s7503_s3 + $0x3b8] sm:$0xf0] }
 0x131   : > { %v4404_v35 = vor.u32 %v5502_v42, %v4401_v17  ;;  %v4321_v36 = vld [vmem:[%s7503_s3 + $0x2a8] sm:$0xf0] }
 0x132   : > { %1649 = vmatpush.bf16.msra.mxu2 %v4020_v41  ;;  %1663 = vmatpush.bf16.msra.mxu3 %v4084_v43  ;;  %v4489_v41 = vld [vmem:[%s7503_s3 + $0x3f8] sm:$0xf0]  ;;  %v4116_v43 = vor.u32 %v5430_v26, %v4113_v27  ;;  %v5500_v26 = vld [vmem:[%s7503_s3 + $0x334] sm:$0xf] }
 0x133   : > { %1677 = vmatpush.bf16.msrb.mxu0 %v4148_v4  ;;  %1691 = vmatpush.bf16.msrb.mxu1 %v4212_v49  ;;  %v5474_v4 = vld [vmem:[%s7503_s3 + $0x264] sm:$0xf]  ;;  %v4289_v49 = vld [vmem:[%s7503_s3 + $0x268] sm:$0xf0]  ;;  %v4492_v0 = vor.u32 %v5524_v37, %v4489_v41  ;;  %v4393_v27 = vld [vmem:[%s7503_s3 + $0x338] sm:$0xf0] }
 0x134   : > { %1598 = vmatmul.bf16.vlgmr.msrb.gmra.mxu2 %v6689_v1  ;;  %1612 = vmatmul.bf16.vlgmr.msrb.gmra.mxu3 %v6692_v57  ;;  %v4292_v50 = vor.u32 %v5474_v4, %v4289_v49  ;;  %v4396_v33 = vor.u32 %v5500_v26, %v4393_v27  ;;  %v5498_v37 = vld [vmem:[%s7503_s3 + $0x324] sm:$0xf]  ;;  %v4385_v41 = vld [vmem:[%s7503_s3 + $0x328] sm:$0xf0]  ;;  %v5464_v4 = vld [vmem:[%s7503_s3 + $0x214] sm:$0xf] }
 0x135   : > { %1626 = vmatmul.bf16.vlgmr.msra.gmra.mxu0 %v6701_v9  ;;  %1640 = vmatmul.bf16.vlgmr.msra.gmra.mxu1 %v6704_v2  ;;  %v4249_v49 = vld [vmem:[%s7503_s3 + $0x218] sm:$0xf0] }
 0x136   : > { %1650 = vmatpush.bf16.msra.mxu2 %v4012_v54  ;;  %1664 = vmatpush.bf16.msra.mxu3 %v4076_v38  ;;  %v5506_v54 = vld [vmem:[%s7503_s3 + $0x364] sm:$0xf]  ;;  %v4417_v38 = vld [vmem:[%s7503_s3 + $0x368] sm:$0xf0] }
 0x137   : > { %1678 = vmatpush.bf16.msrb.mxu0 %v4140_v8  ;;  %1692 = vmatpush.bf16.msrb.mxu1 %v4204_v44  ;;  %v5522_v8 = vld [vmem:[%s7503_s3 + $0x3e4] sm:$0xf]  ;;  %v4356_v44 = vor.u32 %v5490_v52, %v4353_v51  ;;  %v4420_v11 = vor.u32 %v5506_v54, %v4417_v38  ;;  %v5480_v52 = vld [vmem:[%s7503_s3 + $0x294] sm:$0xf]  ;;  %v4313_v51 = vld [vmem:[%s7503_s3 + $0x298] sm:$0xf0] }
 0x138   : > { %v4484_v56 = vor.u32 %v5522_v8, %v4481_v45  ;;  %v5496_v54 = vld [vmem:[%s7503_s3 + $0x314] sm:$0xf]  ;;  %v4377_v38 = vld [vmem:[%s7503_s3 + $0x318] sm:$0xf0] }
 0x139   : > { %v5512_v8 = vld [vmem:[%s7503_s3 + $0x394] sm:$0xf]  ;;  %v4441_v45 = vld [vmem:[%s7503_s3 + $0x398] sm:$0xf0] }
 0x13a   : > { %1651 = vmatpush.bf16.msra.mxu2 %v4004_v39  ;;  %1665 = vmatpush.bf16.msra.mxu3 %v4068_v47  ;;  %v5504_v39 = vld [vmem:[%s7503_s3 + $0x354] sm:$0xf]  ;;  %v4409_v47 = vld [vmem:[%s7503_s3 + $0x358] sm:$0xf0] }
 0x13b   : > { %1679 = vmatpush.bf16.msrb.mxu0 %v4132_v14  ;;  %1693 = vmatpush.bf16.msrb.mxu1 %v4196_v40  ;;  %v5470_v14 = vld [vmem:[%s7503_s3 + $0x244] sm:$0xf]  ;;  %v4273_v40 = vld [vmem:[%s7503_s3 + $0x248] sm:$0xf0]  ;;  %v4412_v15 = vor.u32 %v5504_v39, %v4409_v47 }
 0x13c   : > { %v4276_v20 = vor.u32 %v5470_v14, %v4273_v40  ;;  %v5494_v39 = vld [vmem:[%s7503_s3 + $0x304] sm:$0xf]  ;;  %v4369_v47 = vld [vmem:[%s7503_s3 + $0x308] sm:$0xf0]  ;;  %v4436_v40 = vor.u32 %v5510_v48, %v4433_v13  ;;  %v4599_v48 = vld [vmem:[#allocation3 + $0xd0] sm:$0xf] }
 0x13d   : > { %v4372_v14 = vor.u32 %v5494_v39, %v4369_v47  ;;  %v4535_v39 = vld [vmem:[#allocation3 + $0x50] sm:$0xf]  ;;  %v5537_v47 = vld [vmem:[#allocation3 + $0x54] sm:$0xf0] }
 0x13e   : > { %1652 = vmatpush.bf16.msra.mxu2 %v3996_v19  ;;  %1666 = vmatpush.bf16.msra.mxu3 %v4060_v21  ;;  %v5468_v21 = vld [vmem:[%s7503_s3 + $0x234] sm:$0xf] }
 0x13f   : > { %1680 = vmatpush.bf16.msrb.mxu0 %v4124_v23  ;;  %1694 = vmatpush.bf16.msrb.mxu1 %v4188_v53  ;;  %v5484_v23 = vld [vmem:[%s7503_s3 + $0x2b4] sm:$0xf]  ;;  %v4329_v53 = vld [vmem:[%s7503_s3 + $0x2b8] sm:$0xf0]  ;;  %v4268_v29 = vor.u32 %v5468_v21, %v4265_v22  ;;  %v888_v21 = vld [vmem:[%s7504_s4] sm:$0x3] }
 0x140   : > { %v4332_v25 = vor.u32 %v5484_v23, %v4329_v53  ;;  %v891_v27 = vperm.slane %v888_v21, 1 }
 0x142   : > { %1653 = vmatpush.bf16.msra.mxu2 %v3988_v34  ;;  %1667 = vmatpush.bf16.msra.mxu3 %v4052_v24  ;;  %v4460_v34 = vor.u32 %v5516_v5, %v4457_v28  ;;  %v5482_v24 = vld [vmem:[%s7503_s3 + $0x2a4] sm:$0xf] }
 0x143   : > { %1681 = vmatpush.bf16.msrb.mxu0 %v4116_v43  ;;  %1695 = vmatpush.bf16.msrb.mxu1 %v4180_v30  ;;  %v5514_v43 = vld [vmem:[%s7503_s3 + $0x3a4] sm:$0xf]  ;;  %v4449_v30 = vld [vmem:[%s7503_s3 + $0x3a8] sm:$0xf0] }
 0x145   : > { %1654 = vmatmul.bf16.vlgmr.msra.gmra.mxu2 %v6586_v6  ;;  %1668 = vmatmul.bf16.vlgmr.msra.gmra.mxu3 %v6588_v7  ;;  %v4284_v6 = vor.u32 %v5472_v55, %v4281_v63  ;;  %v4348_v7 = vor.u32 %v5488_v3, %v4345_v12  ;;  %v5462_v55 = vld [vmem:[%s7503_s3 + $0x204] sm:$0xf]  ;;  %v4241_v63 = vld [vmem:[%s7503_s3 + $0x208] sm:$0xf0] }
 0x146   : > { %1702 = vmatpush.bf16.msrb.mxu2 %v4300_v32  ;;  %1716 = vmatpush.bf16.msrb.mxu3 %v4364_v46  ;;  %v4260_v32 = vor.u32 %v5466_v16, %v4257_v31  ;;  %v4324_v46 = vor.u32 %v5482_v24, %v4321_v36  ;;  %v5478_v3 = vld [vmem:[%s7503_s3 + $0x284] sm:$0xf]  ;;  %v4305_v12 = vld [vmem:[%s7503_s3 + $0x288] sm:$0xf0]  ;;  %v4615_v16 = vld [vmem:[#allocation3 + $0xf0] sm:$0xf] }
 0x147   : > { %1730 = vmatpush.bf16.msra.mxu0 %v4428_v61  ;;  %1744 = vmatpush.bf16.msra.mxu1 %v4492_v0  ;;  %v4388_v61 = vor.u32 %v5498_v37, %v4385_v41  ;;  %v4452_v0 = vor.u32 %v5514_v43, %v4449_v30  ;;  %v5573_v24 = vld [vmem:[#allocation3 + $0x174] sm:$0xf0]  ;;  %v4743_v30 = vld [vmem:[#allocation3 + $0x1f0] sm:$0xf] }
 0x148   : > { %1682 = vmatmul.bf16.vlgmr.msrb.gmra.mxu0 %v6590_v10  ;;  %1696 = vmatmul.bf16.vlgmr.msrb.gmra.mxu1 %v6592_v60  ;;  %v5486_v10 = vld [vmem:[%s7503_s3 + $0x2c4] sm:$0xf]  ;;  %v4337_v60 = vld [vmem:[%s7503_s3 + $0x2c8] sm:$0xf0] }
 0x149   : > { %v4340_v19 = vor.u32 %v5486_v10, %v4337_v60 }
 0x14a   : > { %1703 = vmatpush.bf16.msrb.mxu2 %v4292_v50  ;;  %1717 = vmatpush.bf16.msrb.mxu3 %v4356_v44  ;;  %v4252_v50 = vor.u32 %v5464_v4, %v4249_v49  ;;  %v4316_v44 = vor.u32 %v5480_v52, %v4313_v51  ;;  %v4543_v49 = vld [vmem:[#allocation3 + $0x60] sm:$0xf] }
 0x14b   : > { %1731 = vmatpush.bf16.msra.mxu0 %v4420_v11  ;;  %1745 = vmatpush.bf16.msra.mxu1 %v4484_v56  ;;  %v4380_v11 = vor.u32 %v5496_v54, %v4377_v38  ;;  %v4444_v56 = vor.u32 %v5512_v8, %v4441_v45  ;;  %v5555_v54 = vld [vmem:[#allocation3 + $0xe4] sm:$0xf0]  ;;  %v4671_v38 = vld [vmem:[#allocation3 + $0x160] sm:$0xf] }
 0x14c   : > { %v5571_v8 = vld [vmem:[#allocation3 + $0x164] sm:$0xf0] }
 0x14e   : > { %1704 = vmatpush.bf16.msrb.mxu2 %v4284_v6  ;;  %1718 = vmatpush.bf16.msrb.mxu3 %v4348_v7  ;;  %v4244_v6 = vor.u32 %v5462_v55, %v4241_v63  ;;  %v4308_v7 = vor.u32 %v5478_v3, %v4305_v12  ;;  %v4735_v55 = vld [vmem:[#allocation3 + $0x1e0] sm:$0xf]  ;;  %v5587_v63 = vld [vmem:[#allocation3 + $0x1e4] sm:$0xf0] }
 0x14f   : > { %1732 = vmatpush.bf16.msra.mxu0 %v4412_v15  ;;  %1746 = vmatpush.bf16.msra.mxu1 %v4476_v59  ;;  %v4736_v12 = vor.u32 %v5587_v63, %v4735_v55  ;;  %v4711_v55 = vld [vmem:[#allocation3 + $0x1b0] sm:$0xf]  ;;  %v5581_v63 = vld [vmem:[#allocation3 + $0x1b4] sm:$0xf0] }
 0x152   : > { %1705 = vmatpush.bf16.msrb.mxu2 %v4276_v20  ;;  %1719 = vmatpush.bf16.msrb.mxu3 %v4340_v19 }
 0x153   : > { %1733 = vmatpush.bf16.msra.mxu0 %v4404_v35  ;;  %1747 = vmatpush.bf16.msra.mxu1 %v4468_v58  ;;  %v890_v35 = vperm.slane %v888_v21, 0 }
 0x156   : > { %1706 = vmatpush.bf16.msrb.mxu2 %v4268_v29  ;;  %1720 = vmatpush.bf16.msrb.mxu3 %v4332_v25  ;;  %v4551_v29 = vld [vmem:[#allocation3 + $0x70] sm:$0xf]  ;;  %v5541_v25 = vld [vmem:[#allocation3 + $0x74] sm:$0xf0] }
 0x157   : > { %1734 = vmatpush.bf16.msra.mxu0 %v4396_v33  ;;  %1748 = vmatpush.bf16.msra.mxu1 %v4460_v34  ;;  %v4552_v31 = vor.u32 %v5541_v25, %v4551_v29  ;;  %v5557_v33 = vld [vmem:[#allocation3 + $0xf4] sm:$0xf0]  ;;  %v4679_v34 = vld [vmem:[#allocation3 + $0x170] sm:$0xf] }
 0x158   : > { %v4616_v41 = vor.u32 %v5557_v33, %v4615_v16  ;;  %v4680_v43 = vor.u32 %v5573_v24, %v4679_v34  ;;  %v5551_v16 = vld [vmem:[#allocation3 + $0xc4] sm:$0xf0] }
 0x15a   : > { %1707 = vmatpush.bf16.msrb.mxu2 %v4260_v32  ;;  %1721 = vmatpush.bf16.msrb.mxu3 %v4324_v46  ;;  %v5589_v32 = vld [vmem:[#allocation3 + $0x1f4] sm:$0xf0] }
 0x15b   : > { %1735 = vmatpush.bf16.msra.mxu0 %v4388_v61  ;;  %1749 = vmatpush.bf16.msra.mxu1 %v4452_v0  ;;  %v4744_v4 = vor.u32 %v5589_v32, %v4743_v30  ;;  %v5539_v61 = vld [vmem:[#allocation3 + $0x64] sm:$0xf0]  ;;  %v4607_v0 = vld [vmem:[#allocation3 + $0xe0] sm:$0xf] }
 0x15c   : > { %v4544_v51 = vor.u32 %v5539_v61, %v4543_v49  ;;  %v4583_v49 = vld [vmem:[#allocation3 + $0xb0] sm:$0xf] }
 0x15e   : > { %1708 = vmatpush.bf16.msrb.mxu2 %v4252_v50  ;;  %1722 = vmatpush.bf16.msrb.mxu3 %v4316_v44  ;;  %v4608_v50 = vor.u32 %v5555_v54, %v4607_v0  ;;  %v4672_v44 = vor.u32 %v5571_v8, %v4671_v38  ;;  %v5565_v54 = vld [vmem:[#allocation3 + $0x134] sm:$0xf0] }
 0x15f   : > { %1736 = vmatpush.bf16.msra.mxu0 %v4380_v11  ;;  %1750 = vmatpush.bf16.msra.mxu1 %v4444_v56 }
 0x162   : > { %1709 = vmatpush.bf16.msrb.mxu2 %v4244_v6  ;;  %1723 = vmatpush.bf16.msrb.mxu3 %v4308_v7  ;;  %v4536_v7 = vor.u32 %v5537_v47, %v4535_v39  ;;  %v4575_v39 = vld [vmem:[#allocation3 + $0xa0] sm:$0xf] }
 0x163   : > { %1737 = vmatpush.bf16.msra.mxu0 %v4372_v14  ;;  %1751 = vmatpush.bf16.msra.mxu1 %v4436_v40  ;;  %v5553_v14 = vld [vmem:[#allocation3 + $0xd4] sm:$0xf0]  ;;  %v4663_v40 = vld [vmem:[#allocation3 + $0x150] sm:$0xf] }
 0x165   : > { %1710 = vmatmul.bf16.vlgmr.msrb.gmra.mxu2 %v6689_v1  ;;  %1724 = vmatmul.bf16.vlgmr.msrb.gmra.mxu3 %v6692_v57 }
 0x166   : > { %1738 = vmatmul.bf16.vlgmr.msra.gmra.mxu0 %v6701_v9  ;;  %1752 = vmatmul.bf16.vlgmr.msra.gmra.mxu1 %v6704_v2 }
 0x167   : > { %2702 = vmatpush.bf16.msra.mxu2 %v4552_v31  ;;  %2715 = vmatpush.bf16.msra.mxu3 %v4616_v41  ;;  %v5567_v31 = vld [vmem:[#allocation3 + $0x144] sm:$0xf0]  ;;  %v4719_v41 = vld [vmem:[#allocation3 + $0x1c0] sm:$0xf] }
 0x168   : > { %2728 = vmatpush.bf16.msrb.mxu0 %v4680_v43  ;;  %2741 = vmatpush.bf16.msrb.mxu1 %v4744_v4  ;;  %v5583_v43 = vld [vmem:[#allocation3 + $0x1c4] sm:$0xf0] }
 0x16b   : > { %2703 = vmatpush.bf16.msra.mxu2 %v4544_v51  ;;  %2716 = vmatpush.bf16.msra.mxu3 %v4608_v50  ;;  %v4647_v51 = vld [vmem:[#allocation3 + $0x130] sm:$0xf] }
 0x16c   : > { %2729 = vmatpush.bf16.msrb.mxu0 %v4672_v44  ;;  %2742 = vmatpush.bf16.msrb.mxu1 %v4736_v12  ;;  %v4648_v44 = vor.u32 %v5565_v54, %v4647_v51  ;;  %v5531_v12 = vld [vmem:[#allocation3 + $0x24] sm:$0xf0] }
 0x16d   : > { %v5559_v51 = vld [vmem:[#allocation3 + $0x104] sm:$0xf0] }
 0x16f   : > { %2704 = vmatpush.bf16.msra.mxu2 %v4536_v7  ;;  %v5563_v7 = vld [vmem:[#allocation3 + $0x124] sm:$0xf0] }
 0x1a2   : > { %v1571_v10 = vpop.f32.mrf.mxu0  ;;  %v1585_v60 = vpop.f32.mrf.mxu1 }
 0x1a7   : > { %v1543_v15 = vpop.f32.mrf.mxu2  ;;  %v1557_v59 = vpop.f32.mrf.mxu3 }
 0x1a8   : > { %v1544_v23 = vadd.f32 %v1543_v15, %v890_v35  ;;  %v5569_v15 = vld [vmem:[#allocation3 + $0x154] sm:$0xf0] }
 0x1a9   : > { %v4664_v21 = vor.u32 %v5569_v15, %v4663_v40 }
 0x1aa   : > { %v6976_v18 = vpop.f32.mrf.mxu0  ;;  %v6978_v62 = vpop.f32.mrf.mxu1  ;;  %v1558_v5 = vadd.f32 %v1557_v59, %v1544_v23  ;;  %v5585_v23 = vld [vmem:[#allocation3 + $0x1d4] sm:$0xf0] }
 0x1ab   : > { %2730 = vmatpush.bf16.msrb.mxu0 %v4664_v21 }
 0x1ac   : > { %v1572_v46 = vadd.f32 %v1571_v10, %v1558_v5  ;;  %v4527_v5 = vld [vmem:[#allocation3 + $0x40] sm:$0xf] }
 0x1ae   : > { %v1586_v11 = vadd.f32 %v1585_v60, %v1572_v46  ;;  %v4600_v60 = vor.u32 %v5553_v14, %v4599_v48  ;;  %v4720_v46 = vor.u32 %v5583_v43, %v4719_v41 }
 0x1af   : > { %v1545_v42 = vpop.f32.mrf.mxu2  ;;  %v1559_v17 = vpop.f32.mrf.mxu3 }
 0x1b0   : > { %v1546_v52 = vadd.f32 %v1545_v42, %v890_v35  ;;  %v4727_v35 = vld [vmem:[#allocation3 + $0x1d0] sm:$0xf]  ;;  %2717 = vmatpush.bf16.msra.mxu3 %v4600_v60 }
 0x1b2   : > { %v6982_v1 = vpop.f32.mrf.mxu0  ;;  %v6984_v57 = vpop.f32.mrf.mxu1  ;;  %v1560_v13 = vadd.f32 %v1559_v17, %v1546_v52  ;;  %v5535_v17 = vld [vmem:[#allocation3 + $0x44] sm:$0xf0]  ;;  %v5549_v52 = vld [vmem:[#allocation3 + $0xb4] sm:$0xf0] }
 0x1b3   : > { %v4584_v50 = vor.u32 %v5549_v52, %v4583_v49  ;;  %v4623_v52 = vld [vmem:[#allocation3 + $0x100] sm:$0xf] }
 0x1b4   : > { %v1574_v29 = vadd.f32 %v6976_v18, %v1560_v13  ;;  %v4519_v18 = vld [vmem:[#allocation3 + $0x30] sm:$0xf]  ;;  %v5547_v13 = vld [vmem:[#allocation3 + $0xa4] sm:$0xf0] }
 0x1b5   : > { %v4576_v15 = vor.u32 %v5547_v13, %v4575_v39  ;;  %v5637_v39 = vld [vmem:[#allocation3 + $0x374] sm:$0xf0] }
 0x1b6   : > { %v1588_v0 = vadd.f32 %v6978_v62, %v1574_v29  ;;  %v4511_v62 = vld [vmem:[#allocation3 + $0x20] sm:$0xf]  ;;  %v4631_v29 = vld [vmem:[#allocation3 + $0x110] sm:$0xf] }
 0x1b7   : > { %v1599_v20 = vpop.f32.mrf.mxu2  ;;  %v6980_v19 = vpop.f32.mrf.mxu3  ;;  %v4512_v48 = vor.u32 %v5531_v12, %v4511_v62  ;;  %v4935_v12 = vld [vmem:[#allocation3 + $0x370] sm:$0xf] }
 0x1b8   : > { %v1600_v6 = vadd.f32 %v1599_v20, %v1586_v11  ;;  %v4591_v20 = vld [vmem:[#allocation3 + $0xc0] sm:$0xf] }
 0x1b9   : > { %v4592_v24 = vor.u32 %v5551_v16, %v4591_v20  ;;  %v4567_v20 = vld [vmem:[#allocation3 + $0x90] sm:$0xf] }
 0x1ba   : > { %v6993_v22 = vpop.f32.mrf.mxu0  ;;  %v6995_v58 = vpop.f32.mrf.mxu1  ;;  %v1614_v25 = vadd.f32 %v6980_v19, %v1600_v6  ;;  %v5533_v19 = vld [vmem:[#allocation3 + $0x34] sm:$0xf0]  ;;  %v4639_v6 = vld [vmem:[#allocation3 + $0x120] sm:$0xf] }
 0x1bb   : > { %2718 = vmatpush.bf16.msra.mxu3 %v4592_v24  ;;  %v5577_v24 = vld [vmem:[#allocation3 + $0x194] sm:$0xf0] }
 0x1bc   : > { %v1628_v61 = vadd.f32 %v6982_v1, %v1614_v25 }
 0x1be   : > { %v1642_v47 = vadd.f32 %v6984_v57, %v1628_v61  ;;  %v4503_v57 = vld [vmem:[#allocation3 + $0x10] sm:$0xf] }
 0x1bf   : > { %v6986_v9 = vpop.f32.mrf.mxu2  ;;  %v6988_v2 = vpop.f32.mrf.mxu3  ;;  %2719 = vmatpush.bf16.msra.mxu3 %v4584_v50  ;;  %v4687_v50 = vld [vmem:[#allocation3 + $0x180] sm:$0xf] }
 0x1c0   : > { %v1602_v11 = vadd.f32 %v6986_v9, %v1588_v0  ;;  %v4640_v9 = vor.u32 %v5563_v7, %v4639_v6  ;;  %v7007_v25 = vmax.f32 %v1642_v47, 0.0  ;;  %v4999_v47 = vld [vmem:[#allocation3 + $0x3f0] sm:$0xf]  ;;  %v4936_v6 = vor.u32 %v5637_v39, %v4935_v12  ;;  %v5653_v7 = vld [vmem:[#allocation3 + $0x3f4] sm:$0xf0] }
 0x1c1   : > { %v5613_v12 = vld [vmem:[#allocation3 + $0x2b4] sm:$0xf0]  ;;  %v4903_v39 = vld [vmem:[#allocation3 + $0x330] sm:$0xf] }
 0x1c3   : > { %2720 = vmatpush.bf16.msra.mxu3 %v4576_v15  ;;  %v5603_v15 = vld [vmem:[#allocation3 + $0x264] sm:$0xf0] }
 0x1c5   : > { %v1683_v28 = vpop.f32.mrf.mxu0  ;;  %v6997_v36 = vpop.f32.mrf.mxu1 }
 0x1c8   : > { %v1655_v53 = vpop.f32.mrf.mxu2  ;;  %v1669_v26 = vpop.f32.mrf.mxu3 }
 0x1c9   : > { %v1656_v37 = vadd.f32 %v1655_v53, %v891_v27  ;;  %v4728_v53 = vor.u32 %v5585_v23, %v4727_v35 }
 0x1cb   : > { %v1670_v45 = vadd.f32 %v1669_v26, %v1656_v37  ;;  %2743 = vmatpush.bf16.msrb.mxu1 %v4728_v53  ;;  %v5529_v53 = vld [vmem:[#allocation3 + $0x14] sm:$0xf0] }
 0x1cd   : > { %v1684_v59 = vadd.f32 %v1683_v28, %v1670_v45  ;;  %v1685_v10 = vpop.f32.mrf.mxu0  ;;  %v1699_v26 = vpop.f32.mrf.mxu1  ;;  %v4528_v28 = vor.u32 %v5535_v17, %v4527_v5  ;;  %v4504_v17 = vor.u32 %v5529_v53, %v4503_v57  ;;  %v5651_v53 = vld [vmem:[#allocation3 + $0x3e4] sm:$0xf0] }
 0x1cf   : > { %v1698_v34 = vadd.f32 %v6997_v36, %v1684_v59  ;;  %2705 = vmatpush.bf16.msra.mxu2 %v4528_v28  ;;  %2744 = vmatpush.bf16.msrb.mxu1 %v4720_v46  ;;  %v4520_v36 = vor.u32 %v5533_v19, %v4519_v18  ;;  %v4703_v59 = vld [vmem:[#allocation3 + $0x1a0] sm:$0xf] }
 0x1d0   : > { %v1657_v56 = vpop.f32.mrf.mxu2  ;;  %v1671_v3 = vpop.f32.mrf.mxu3  ;;  %v4559_v46 = vld [vmem:[#allocation3 + $0x80] sm:$0xf] }
 0x1d1   : > { %v1658_v42 = vadd.f32 %v1657_v56, %v891_v27  ;;  %v4655_v27 = vld [vmem:[#allocation3 + $0x140] sm:$0xf]  ;;  %v4712_v56 = vor.u32 %v5581_v63, %v4711_v55  ;;  %v4807_v63 = vld [vmem:[#allocation3 + $0x270] sm:$0xf] }
 0x1d2   : > { %v4656_v37 = vor.u32 %v5567_v31, %v4655_v27  ;;  %v5561_v27 = vld [vmem:[#allocation3 + $0x114] sm:$0xf0] }
 0x1d3   : > { %v1672_v33 = vadd.f32 %v1671_v3, %v1658_v42  ;;  %2706 = vmatpush.bf16.msra.mxu2 %v4520_v36  ;;  %2745 = vmatpush.bf16.msrb.mxu1 %v4712_v56  ;;  %v1616_v42 = vadd.f32 %v6988_v2, %v1602_v11  ;;  %v5543_v36 = vld [vmem:[#allocation3 + $0x84] sm:$0xf0]  ;;  %v5605_v11 = vld [vmem:[#allocation3 + $0x274] sm:$0xf0] }
 0x1d4   : > { %2731 = vmatpush.bf16.msrb.mxu0 %v4656_v37 }
 0x1d5   : > { %v1686_v38 = vadd.f32 %v1685_v10, %v1672_v33  ;;  %v5579_v10 = vld [vmem:[#allocation3 + $0x1a4] sm:$0xf0]  ;;  %v1630_v31 = vadd.f32 %v6993_v22, %v1616_v42  ;;  %v4632_v33 = vor.u32 %v5561_v27, %v4631_v29  ;;  %v4495_v22 = vld [vmem:[#allocation3] sm:$0xf]  ;;  %v5601_v29 = vld [vmem:[#allocation3 + $0x254] sm:$0xf0] }
 0x1d6   : > { %v4704_v21 = vor.u32 %v5579_v10, %v4703_v59  ;;  %v5619_v59 = vld [vmem:[#allocation3 + $0x2e4] sm:$0xf0]  ;;  %v5617_v27 = vld [vmem:[#allocation3 + $0x2d4] sm:$0xf0] }
 0x1d7   : > { %v1700_v40 = vadd.f32 %v1699_v26, %v1686_v38  ;;  %2707 = vmatpush.bf16.msra.mxu2 %v4512_v48  ;;  %v5545_v26 = vld [vmem:[#allocation3 + $0x94] sm:$0xf0]  ;;  %v7030_v54 = vadd.f32 %v6995_v58, %v1630_v31  ;;  %v4808_v58 = vor.u32 %v5605_v11, %v4807_v63  ;;  %v4919_v31 = vld [vmem:[#allocation3 + $0x350] sm:$0xf] }
 0x1d8   : > { %2732 = vmatpush.bf16.msrb.mxu0 %v4648_v44  ;;  %2746 = vmatpush.bf16.msrb.mxu1 %v4704_v21  ;;  %v4568_v16 = vor.u32 %v5545_v26, %v4567_v20  ;;  %v5575_v44 = vld [vmem:[#allocation3 + $0x184] sm:$0xf0]  ;;  %v4927_v21 = vld [vmem:[#allocation3 + $0x360] sm:$0xf]  ;;  %v4791_v26 = vld [vmem:[#allocation3 + $0x250] sm:$0xf] }
 0x1d9   : > { %v4688_v55 = vor.u32 %v5575_v44, %v4687_v50  ;;  %v1760_v48 = vmax.f32 %v7030_v54, 0.0  ;;  %v4911_v54 = vld [vmem:[#allocation3 + $0x340] sm:$0xf]  ;;  %v4775_v63 = vld [vmem:[#allocation3 + $0x230] sm:$0xf] }
 0x1da   : > { %2721 = vmatpush.bf16.msra.mxu3 %v4568_v16  ;;  %v4855_v16 = vld [vmem:[#allocation3 + $0x2d0] sm:$0xf] }
 0x1db   : > { %2708 = vmatpush.bf16.msra.mxu2 %v4504_v17 }
 0x1dc   : > { %2733 = vmatpush.bf16.msrb.mxu0 %v4640_v9  ;;  %v4863_v9 = vld [vmem:[#allocation3 + $0x2e0] sm:$0xf] }
 0x1e0   : > { %2734 = vmatpush.bf16.msrb.mxu0 %v4632_v33 }
 0x1e3   : > { %v1739_v8 = vpop.f32.mrf.mxu0  ;;  %v1753_v3 = vpop.f32.mrf.mxu1 }
 0x1e8   : > { %v1711_v30 = vpop.f32.mrf.mxu2  ;;  %v1725_v32 = vpop.f32.mrf.mxu3 }
 0x1e9   : > { %v1712_v4 = vadd.f32 %v1711_v30, %v1698_v34  ;;  %v4695_v34 = vld [vmem:[#allocation3 + $0x190] sm:$0xf] }
 0x1ea   : > { %v4696_v61 = vor.u32 %v5577_v24, %v4695_v34  ;;  %v4856_v24 = vor.u32 %v5617_v27, %v4855_v16  ;;  %v4895_v16 = vld [vmem:[#allocation3 + $0x320] sm:$0xf]  ;;  %v5627_v27 = vld [vmem:[#allocation3 + $0x324] sm:$0xf0] }
 0x1eb   : > { %v1726_v45 = vadd.f32 %v1725_v32, %v1712_v4  ;;  %v1741_v30 = vpop.f32.mrf.mxu0  ;;  %v5527_v32 = vld [vmem:[#allocation3 + $0x4] sm:$0xf0]  ;;  %v1755_v49 = vpop.f32.mrf.mxu1 }
 0x1ec   : > { %v4496_v0 = vor.u32 %v5527_v32, %v4495_v22  ;;  %2747 = vmatpush.bf16.msrb.mxu1 %v4696_v61 }
 0x1ed   : > { %v1740_v1 = vadd.f32 %v1739_v8, %v1726_v45  ;;  %v4560_v8 = vor.u32 %v5543_v36, %v4559_v46  ;;  %v4624_v45 = vor.u32 %v5559_v51, %v4623_v52  ;;  %v4783_v46 = vld [vmem:[#allocation3 + $0x240] sm:$0xf]  ;;  %v5615_v52 = vld [vmem:[#allocation3 + $0x2c4] sm:$0xf0] }
 0x1ee   : > { %2709 = vmatpush.bf16.msra.mxu2 %v4496_v0 }
 0x1ef   : > { %v1754_v14 = vadd.f32 %v1753_v3, %v1740_v1  ;;  %2722 = vmatpush.bf16.msra.mxu3 %v4560_v8  ;;  %2735 = vmatpush.bf16.msrb.mxu0 %v4624_v45  ;;  %v4871_v3 = vld [vmem:[#allocation3 + $0x2f0] sm:$0xf]  ;;  %v5621_v1 = vld [vmem:[#allocation3 + $0x2f4] sm:$0xf0] }
 0x1f0   : > { %v1713_v60 = vpop.f32.mrf.mxu2  ;;  %v1727_v5 = vpop.f32.mrf.mxu3  ;;  %v4872_v62 = vor.u32 %v5621_v1, %v4871_v3  ;;  %2748 = vmatpush.bf16.msrb.mxu1 %v4688_v55  ;;  %v5597_v3 = vld [vmem:[#allocation3 + $0x234] sm:$0xf0]  ;;  %v4839_v1 = vld [vmem:[#allocation3 + $0x2b0] sm:$0xf] }
 0x1f1   : > { %v1759_v35 = vmax.f32 %v1754_v14, 0.0  ;;  %v1714_v23 = vadd.f32 %v1713_v60, %v1700_v40  ;;  %v4799_v14 = vld [vmem:[#allocation3 + $0x260] sm:$0xf]  ;;  %v5000_v40 = vor.u32 %v5653_v7, %v4999_v47  ;;  %v4864_v60 = vor.u32 %v5619_v59, %v4863_v9  ;;  %v5629_v47 = vld [vmem:[#allocation3 + $0x334] sm:$0xf0] }
 0x1f2   : > { %2754 = vmatpush.bf16.msrb.mxu2 %v4808_v58  ;;  %v4800_v42 = vor.u32 %v5603_v15, %v4799_v14  ;;  %v4767_v7 = vld [vmem:[#allocation3 + $0x220] sm:$0xf]  ;;  %v4904_v15 = vor.u32 %v5629_v47, %v4903_v39 }
 0x1f3   : > { %v7009_v28 = vrot.slane %v1759_v35, 6  ;;  %v1728_v2 = vadd.f32 %v1727_v5, %v1714_v23  ;;  %2767 = vmatpush.bf16.msrb.mxu3 %v4872_v62  ;;  %2780 = vmatpush.bf16.msra.mxu0 %v4936_v6  ;;  %v5635_v35 = vld [vmem:[#allocation3 + $0x364] sm:$0xf0]  ;;  %v4991_v23 = vld [vmem:[#allocation3 + $0x3e0] sm:$0xf]  ;;  %v4776_v62 = vor.u32 %v5597_v3, %v4775_v63 }
 0x1f4   : > { %2793 = vmatpush.bf16.msra.mxu1 %v5000_v40  ;;  %v4928_v57 = vor.u32 %v5635_v35, %v4927_v21  ;;  %v4992_v20 = vor.u32 %v5651_v53, %v4991_v23  ;;  %v5645_v6 = vld [vmem:[#allocation3 + $0x3b4] sm:$0xf0]  ;;  %v4831_v35 = vld [vmem:[#allocation3 + $0x2a0] sm:$0xf]  ;;  %v5611_v23 = vld [vmem:[#allocation3 + $0x2a4] sm:$0xf0] }
 0x1f5   : > { %v7015_v37 = vsel %vm651_vm9, %v7007_v25, %v7009_v28  ;;  %v1769_v41 = vsel %vm7513_vm11, %v7007_v25, %v7009_v28  ;;  %v7023_v43 = vsel %vm662_vm13, %v7009_v28, %v7007_v25  ;;  %v1742_v19 = vadd.f32 %v1741_v30, %v1728_v2  ;;  %v5649_v30 = vld [vmem:[#allocation3 + $0x3d4] sm:$0xf0]  ;;  %v5591_v63 = vld [vmem:[#allocation3 + $0x204] sm:$0xf0]  ;;  %v4815_v47 = vld [vmem:[#allocation3 + $0x280] sm:$0xf] }
 0x1f6   : > { %v7025_v4 = vrot.slane %v1769_v41, 2  ;;  %v1774_v18 = vrot.slane %v7023_v43, 6  ;;  %1778 = vst [vmem:[#allocation1] ss:$4 sm:$0xff] %v7015_v37  ;;  %2755 = vmatpush.bf16.msrb.mxu2 %v4800_v42  ;;  %v4792_v2 = vor.u32 %v5601_v29, %v4791_v26  ;;  %v7047_v33 = vsel %vm653_vm10, %v7007_v25, %v7009_v28  ;;  %v4983_v41 = vld [vmem:[#allocation3 + $0x3d0] sm:$0xf] }
 0x1f7   : > { %v1756_v38 = vadd.f32 %v1755_v49, %v1742_v19  ;;  %2768 = vmatpush.bf16.msrb.mxu3 %v4864_v60  ;;  %2781 = vmatpush.bf16.msra.mxu0 %v4928_v57  ;;  %v4984_v32 = vor.u32 %v5649_v30, %v4983_v41  ;;  %v5599_v19 = vld [vmem:[#allocation3 + $0x244] sm:$0xf0]  ;;  %v4847_v49 = vld [vmem:[#allocation3 + $0x2c0] sm:$0xf]  ;;  %v1772_v25 = vrot.slane %v7047_v33, 4 }
 0x1f8   : > { %1784 = vst [vmem:[#allocation1 + $0x20] ss:$4 sm:$0xff] %v1774_v18  ;;  %2794 = vmatpush.bf16.msra.mxu1 %v4992_v20  ;;  %v4784_v36 = vor.u32 %v5599_v19, %v4783_v46  ;;  %v4848_v51 = vor.u32 %v5615_v52, %v4847_v49  ;;  %v4975_v43 = vld [vmem:[#allocation3 + $0x3c0] sm:$0xf]  ;;  %v5595_v60 = vld [vmem:[#allocation3 + $0x224] sm:$0xf0] }
 0x1f9   : > { %1780 = vst [vmem:[#allocation1 + $0x1] ss:$4 sm:$0xff] %v7025_v4  ;;  %v1761_v56 = vmax.f32 %v1756_v38, 0.0  ;;  %v5631_v38 = vld [vmem:[#allocation3 + $0x344] sm:$0xf0]  ;;  %v4768_v21 = vor.u32 %v5595_v60, %v4767_v7 }
 0x1fa   : > { %2756 = vmatpush.bf16.msrb.mxu2 %v4792_v2  ;;  %v4912_v50 = vor.u32 %v5631_v38, %v4911_v54  ;;  %v5643_v33 = vld [vmem:[#allocation3 + $0x3a4] sm:$0xf0]  ;;  %v5593_v41 = vld [vmem:[#allocation3 + $0x214] sm:$0xf0]  ;;  %v4823_v30 = vld [vmem:[#allocation3 + $0x290] sm:$0xf] }
 0x1fb   : > { %v1767_v13 = vrot.slane %v1761_v56, 6  ;;  %2769 = vmatpush.bf16.msrb.mxu3 %v4856_v24  ;;  %v4759_v24 = vld [vmem:[#allocation3 + $0x210] sm:$0xf]  ;;  %v5625_v19 = vld [vmem:[#allocation3 + $0x314] sm:$0xf0] }
 0x1fc   : > { %2795 = vmatpush.bf16.msra.mxu1 %v4984_v32  ;;  %v4887_v46 = vld [vmem:[#allocation3 + $0x310] sm:$0xf]  ;;  %v5623_v7 = vld [vmem:[#allocation3 + $0x304] sm:$0xf0] }
 0x1fd   : > { %v7037_v10 = vsel %vm651_vm9, %v1760_v48, %v1767_v13  ;;  %v7050_v34 = vsel %vm7513_vm11, %v1760_v48, %v1767_v13  ;;  %v4840_v48 = vor.u32 %v5613_v12, %v4839_v1  ;;  %v4967_v13 = vld [vmem:[#allocation3 + $0x3b0] sm:$0xf]  ;;  %v4888_v52 = vor.u32 %v5625_v19, %v4887_v46 }
 0x1fe   : > { %1786 = vst [vmem:[#allocation1 + $0x21] ss:$4 sm:$0xff] %v7037_v10  ;;  %v1777_v28 = vrot.slane %v7050_v34, 2  ;;  %2757 = vmatpush.bf16.msrb.mxu2 %v4784_v36  ;;  %v4968_v42 = vor.u32 %v5645_v6, %v4967_v13  ;;  %v4951_v49 = vld [vmem:[#allocation3 + $0x390] sm:$0xf] }
 0x1ff   : > { %2770 = vmatpush.bf16.msrb.mxu3 %v4848_v51  ;;  %v4879_v6 = vld [vmem:[#allocation3 + $0x300] sm:$0xf] }
 0x200   : > { %v7040_v5 = vld.sshfl [vmem:[#allocation1] sm:$0xff pattern:$0x73625140]  ;;  %v1782_v17 = vld.sshfl [vmem:[#allocation1 + $0x8] sm:$0xff pattern:$0x73625140] }
 0x201   : > { %1789 = vst [vmem:[#allocation1] ss:$4 sm:$0xff] %v7015_v37  ;;  %v5633_v37 = vld [vmem:[#allocation3 + $0x354] sm:$0xf0]  ;;  %v7060_v44 = vrot.slane %v1782_v17, 7  ;;  %v4832_v17 = vor.u32 %v5611_v23, %v4831_v35 }
 0x202   : > { %1791 = vst [vmem:[#allocation1 + $0x1] ss:$4 sm:$0xff] %v7025_v4  ;;  %v4920_v22 = vor.u32 %v5633_v37, %v4919_v31  ;;  %2758 = vmatpush.bf16.msrb.mxu2 %v4776_v62  ;;  %v4959_v31 = vld [vmem:[#allocation3 + $0x3a0] sm:$0xf]  ;;  %v4896_v37 = vor.u32 %v5627_v27, %v4895_v16 }
 0x203   : > { %2771 = vmatpush.bf16.msrb.mxu3 %v4840_v48  ;;  %v4960_v32 = vor.u32 %v5643_v33, %v4959_v31  ;;  %v1862_v34 = vsel %vm519_vm1, %v7040_v5, %v7060_v44  ;;  %v5607_v48 = vld [vmem:[#allocation3 + $0x284] sm:$0xf0] }
 0x204   : > { %2782 = vmatpush.bf16.msra.mxu0 %v4920_v22  ;;  %v5609_v22 = vld [vmem:[#allocation3 + $0x294] sm:$0xf0] }
 0x205   : > { %v7052_v61 = vld.sshfl [vmem:[#allocation1 + $0x20] sm:$0xff pattern:$0x73625140]  ;;  %v1788_v0 = vld.sshfl [vmem:[#allocation1 + $0x28] sm:$0xff pattern:$0x73625140] }
 0x206   : > { %1795 = vst [vmem:[#allocation1 + $0x20] ss:$4 sm:$0xff] %v1774_v18  ;;  %v7062_v55 = vrot.slane %v1788_v0, 7  ;;  %v5647_v18 = vld [vmem:[#allocation3 + $0x3c4] sm:$0xf0]  ;;  %2759 = vmatpush.bf16.msrb.mxu2 %v4768_v21 }
 0x207   : > { %1797 = vst [vmem:[#allocation1 + $0x21] ss:$4 sm:$0xff] %v7037_v10  ;;  %v4976_v58 = vor.u32 %v5647_v18, %v4975_v43  ;;  %2772 = vmatpush.bf16.msrb.mxu3 %v4832_v17  ;;  %v4751_v18 = vld [vmem:[#allocation3 + $0x200] sm:$0xf] }
 0x208   : > { %2783 = vmatpush.bf16.msra.mxu0 %v4912_v50  ;;  %v1844_v50 = vsel %vm514_vm6, %v7040_v5, %v7060_v44  ;;  %v4752_v3 = vor.u32 %v5591_v63, %v4751_v18 }
 0x209   : > { %v1792_v8 = vld.sshfl [vmem:[#allocation1] sm:$0xff pattern:$0x73625140]  ;;  %v1793_v45 = vld.sshfl [vmem:[#allocation1 + $0x8] sm:$0xff pattern:$0x73625140]  ;;  %2796 = vmatpush.bf16.msra.mxu1 %v4976_v58  ;;  %v1851_v58 = vsel %vm516_vm5, %v7040_v5, %v7060_v44  ;;  %v4816_v44 = vor.u32 %v5607_v48, %v4815_v47 }
 0x20a   : > { %1804 = vst [vmem:[#allocation1] ss:$4 sm:$0xff] %v7025_v4  ;;  %v1800_v11 = vrot.slane %v1792_v8, 1  ;;  %v1801_v56 = vrot.slane %v1793_v45, 1  ;;  %v5641_v45 = vld [vmem:[#allocation3 + $0x394] sm:$0xf0] }
 0x20b   : > { %1806 = vst [vmem:[#allocation1 + $0x1] ss:$4 sm:$0xff] %v1772_v25  ;;  %v4952_v43 = vor.u32 %v5641_v45, %v4951_v49 }
 0x20c   : > { %v1831_v9 = vrot.slane %v1800_v11, 6  ;;  %v1832_v59 = vrot.slane %v1801_v56, 5  ;;  %2784 = vmatpush.bf16.msra.mxu0 %v4904_v15 }
 0x20d   : > { %2797 = vmatpush.bf16.msra.mxu1 %v4968_v42  ;;  %v5639_v42 = vld [vmem:[#allocation3 + $0x384] sm:$0xf0] }
 0x20e   : > { %v1798_v14 = vld.sshfl [vmem:[#allocation1 + $0x20] sm:$0xff pattern:$0x73625140]  ;;  %v1799_v40 = vld.sshfl [vmem:[#allocation1 + $0x28] sm:$0xff pattern:$0x73625140]  ;;  %v1845_v38 = vsel %vm519_vm1, %v1831_v9, %v1832_v59  ;;  %v1852_v8 = vsel %vm522_vm2, %v1831_v9, %v1832_v59 }
 0x20f   : > { %1810 = vst [vmem:[#allocation1 + $0x20] ss:$4 sm:$0xff] %v7037_v10  ;;  %v1802_v20 = vrot.slane %v1798_v14, 1  ;;  %v1803_v26 = vrot.slane %v1799_v40, 1  ;;  %v1846_v12 = vsel %vm651_vm9, %v1844_v50, %v1845_v38  ;;  %v1854_v39 = vsel %vm1853_vm15, %v1851_v58, %v1852_v8  ;;  %v4943_v14 = vld [vmem:[#allocation3 + $0x380] sm:$0xf] }
 0x210   : > { %1812 = vst [vmem:[#allocation1 + $0x21] ss:$4 sm:$0xff] %v1777_v28  ;;  %2785 = vmatpush.bf16.msra.mxu0 %v4896_v37  ;;  %v4944_v23 = vor.u32 %v5639_v42, %v4943_v14  ;;  %v5540_v58 = vld [vmem:[#allocation3 + $0x74] sm:$0xf] }
 0x211   : > { %v7073_v51 = vrot.slane %v1802_v20, 6  ;;  %v7075_v54 = vrot.slane %v1803_v26, 5  ;;  %2798 = vmatpush.bf16.msra.mxu1 %v4960_v32  ;;  %v1877_v32 = vsel %vm516_vm5, %v7052_v61, %v7062_v55 }
 0x212   : > { %v1807_v57 = vld.sshfl [vmem:[#allocation1] sm:$0xff pattern:$0x73625140]  ;;  %v1808_v53 = vld.sshfl [vmem:[#allocation1 + $0x8] sm:$0xff pattern:$0x73625140] }
 0x213   : > { %1815 = vst [vmem:[#allocation1] ss:$4 sm:$0xff] %v7025_v4  ;;  %v7068_v29 = vrot.slane %v1807_v57, 4  ;;  %v7070_v2 = vrot.slane %v1808_v53, 3  ;;  %v4760_v4 = vor.u32 %v5593_v41, %v4759_v24  ;;  %v1871_v35 = vsel %vm519_vm1, %v7073_v51, %v7075_v54 }
 0x214   : > { %1817 = vst [vmem:[#allocation1 + $0x1] ss:$4 sm:$0xff] %v1772_v25  ;;  %v4824_v25 = vor.u32 %v5609_v22, %v4823_v30  ;;  %2786 = vmatpush.bf16.msra.mxu0 %v4888_v52  ;;  %v1878_v31 = vsel %vm522_vm2, %v7073_v51, %v7075_v54 }
 0x215   : > { %2760 = vmatpush.bf16.msrb.mxu2 %v4760_v4  ;;  %v1847_v13 = vsel %vm525_vm3, %v7068_v29, %v7070_v2  ;;  %2799 = vmatpush.bf16.msra.mxu1 %v4952_v43  ;;  %v1865_v21 = vsel %vm531_vm7, %v7068_v29, %v7070_v2  ;;  %v1885_v4 = vsel %vm519_vm1, %v7052_v61, %v7062_v55  ;;  %vm7515_vm1 = vcmask 1043458  }
 0x216   : > { %2773 = vmatpush.bf16.msrb.mxu3 %v4824_v25  ;;  %v1879_v52 = vsel %vm1853_vm15, %v1877_v32, %v1878_v31  ;;  %v5552_v31 = vld [vmem:[#allocation3 + $0xd4] sm:$0xf] }
 0x217   : > { %v1813_v0 = vld.sshfl [vmem:[#allocation1 + $0x20] sm:$0xff pattern:$0x73625140]  ;;  %v1814_v36 = vld.sshfl [vmem:[#allocation1 + $0x28] sm:$0xff pattern:$0x73625140] }
 0x218   : > { %1821 = vst [vmem:[#allocation1 + $0x20] ss:$4 sm:$0xff] %v7037_v10  ;;  %v1863_v10 = vsel %vm525_vm3, %v1831_v9, %v1832_v59  ;;  %v1855_v9 = vsel %vm528_vm4, %v7068_v29, %v7070_v2  ;;  %v4880_v59 = vor.u32 %v5623_v7, %v4879_v6  ;;  %v1840_v60 = vrot.slane %v1813_v0, 4 }
 0x219   : > { %1823 = vst [vmem:[#allocation1 + $0x21] ss:$4 sm:$0xff] %v1777_v28  ;;  %v1870_v28 = vsel %vm514_vm6, %v7052_v61, %v7062_v55  ;;  %v1864_v5 = vsel %vm7513_vm11, %v1862_v34, %v1863_v10  ;;  %2761 = vmatpush.bf16.msrb.mxu2 %v4752_v3  ;;  %v1841_v57 = vrot.slane %v1814_v36, 3  ;;  %2800 = vmatpush.bf16.msra.mxu1 %v4944_v23  ;;  %vm7514_vm11 = vcmask 1045506   ;;  %v4553_v34 = vld [vmem:[#allocation3 + $0x78] sm:$0xf0] }
 0x21a   : > { %2774 = vmatpush.bf16.msrb.mxu3 %v4816_v44  ;;  %2787 = vmatpush.bf16.msra.mxu0 %v4880_v59  ;;  %v1886_v0 = vsel %vm525_vm3, %v7073_v51, %v7075_v54  ;;  %v1872_v36 = vsel %vm651_vm9, %v1870_v28, %v1871_v35  ;;  %vm7516_vm2 = vmmov %vm7514_vm11  ;;  %v5556_v28 = vld [vmem:[#allocation3 + $0xf4] sm:$0xf]  ;;  %v4617_v3 = vld [vmem:[#allocation3 + $0xf8] sm:$0xf0] }
 0x21b   : > { %v1818_v11 = vld.sshfl [vmem:[#allocation1] sm:$0xff pattern:$0x73625140]  ;;  %v1819_v56 = vld.sshfl [vmem:[#allocation1 + $0x8] sm:$0xff pattern:$0x73625140]  ;;  %v1873_v25 = vsel %vm525_vm3, %v1840_v60, %v1841_v57  ;;  %v1880_v38 = vsel %vm528_vm4, %v1840_v60, %v1841_v57  ;;  %v1888_v55 = vsel %vm531_vm7, %v1840_v60, %v1841_v57  ;;  %v1887_v50 = vsel %vm7515_vm1, %v1885_v4, %v1886_v0 }
 0x21c   : > { %v1826_v1 = vrot.slane %v1818_v11, 1  ;;  %v1827_v62 = vrot.slane %v1819_v56, 1  ;;  %v4609_v35 = vld [vmem:[#allocation3 + $0xe8] sm:$0xf0]  ;;  %v5570_v23 = vld [vmem:[#allocation3 + $0x164] sm:$0xf] }
 0x21d   : > { %v4673_v57 = vld [vmem:[#allocation3 + $0x168] sm:$0xf0]  ;;  %v5534_v4 = vld [vmem:[#allocation3 + $0x44] sm:$0xf]  ;;  %vm3874_vm3 = vcmask 516096   ;;  %vm3880_vm4 = vcmask 0  }
 0x21e   : > { %v1835_v40 = vrot.slane %v1826_v1, 2  ;;  %v1836_v15 = vrot.slane %v1827_v62, 1  ;;  %v5572_v1 = vld [vmem:[#allocation3 + $0x174] sm:$0xf]  ;;  %v4681_v62 = vld [vmem:[#allocation3 + $0x178] sm:$0xf0] }
 0x21f   : > { %v4684_v42 = vor.u32 %v5572_v1, %v4681_v62  ;;  %v5550_v0 = vld [vmem:[#allocation3 + $0xc4] sm:$0xf] }
 0x220   : > { %v1848_v53 = vsel %vm531_vm7, %v1835_v40, %v1836_v15  ;;  %v1856_v17 = vsel %vm534_vm8, %v1836_v15, %v1835_v40  ;;  %v1866_v20 = vsel %vm514_vm6, %v1835_v40, %v1836_v15  ;;  %v1824_v26 = vld.sshfl [vmem:[#allocation1 + $0x20] sm:$0xff pattern:$0x73625140]  ;;  %v1825_v16 = vld.sshfl [vmem:[#allocation1 + $0x28] sm:$0xff pattern:$0x73625140]  ;;  %v4620_v40 = vor.u32 %v5556_v28, %v4617_v3 }
 0x221   : > { %v1849_v27 = vsel %vm653_vm10, %v1847_v13, %v1848_v53  ;;  %v1858_v29 = vsel %vm1857_vm0, %v1855_v9, %v1856_v17  ;;  %v1867_v2 = vsel %vm662_vm13, %v1866_v20, %v1865_v21  ;;  %v1828_v33 = vrot.slane %v1824_v26, 1  ;;  %v5538_v15 = vld [vmem:[#allocation3 + $0x64] sm:$0xf]  ;;  %v4545_v9 = vld [vmem:[#allocation3 + $0x68] sm:$0xf0] }
 0x222   : > { %v1829_v24 = vrot.slane %v1825_v16, 1  ;;  %v1850_v37 = vsel %vm655_vm12, %v1846_v12, %v1849_v27  ;;  %v1860_v41 = vsel %vm1859_vm14, %v1854_v39, %v1858_v29  ;;  %v1868_v22 = vsel %vm7514_vm11, %v1864_v5, %v1867_v2  ;;  %v5588_v12 = vld [vmem:[#allocation3 + $0x1f4] sm:$0xf]  ;;  %v4745_v39 = vld [vmem:[#allocation3 + $0x1f8] sm:$0xf0] }
 0x223   : > { %v1861_v30 = vrot.slane %v1860_v41, 1  ;;  %1893 = vst [vmem:[#allocation1] ss:$9 sm:$0xff] %v1850_v37  ;;  %v1842_v46 = vrot.slane %v1828_v33, 2  ;;  %v1869_v49 = vrot.slane %v1868_v22, 2  ;;  %v4556_v5 = vor.u32 %v5540_v58, %v4553_v34 }
 0x224   : > { %v1843_v19 = vrot.slane %v1829_v24, 1  ;;  %v4748_v60 = vor.u32 %v5588_v12, %v4745_v39  ;;  %v5554_v21 = vld [vmem:[#allocation3 + $0xe4] sm:$0xf]  ;;  %v4737_v17 = vld [vmem:[#allocation3 + $0x1e8] sm:$0xf0]  ;;  %v4548_v20 = vor.u32 %v5538_v15, %v4545_v9  ;;  %v4676_v29 = vor.u32 %v5570_v23, %v4673_v57 }
 0x225   : > { %1895 = vst [vmem:[#allocation1 + $0x1] ss:$9 sm:$0xff] %v1861_v30  ;;  %v5586_v53 = vld [vmem:[#allocation3 + $0x1e4] sm:$0xf]  ;;  %v4612_v26 = vor.u32 %v5554_v21, %v4609_v35  ;;  %v5536_v16 = vld [vmem:[#allocation3 + $0x54] sm:$0xf] }
 0x226   : > { %v1874_v8 = vsel %vm531_vm7, %v1842_v46, %v1843_v19  ;;  %v1881_v61 = vsel %vm534_vm8, %v1843_v19, %v1842_v46  ;;  %v1889_v45 = vsel %vm514_vm6, %v1842_v46, %v1843_v19  ;;  %1897 = vst [vmem:[#allocation1 + $0x2] ss:$9 sm:$0xff] %v1869_v49  ;;  %v4537_v27 = vld [vmem:[#allocation3 + $0x58] sm:$0xf0]  ;;  %v4740_v2 = vor.u32 %v5586_v53, %v4737_v17  ;;  %v5568_v24 = vld [vmem:[#allocation3 + $0x154] sm:$0xf] }
 0x227   : > { %v1875_v51 = vsel %vm653_vm10, %v1873_v25, %v1874_v8  ;;  %v1882_v54 = vsel %vm1857_vm0, %v1880_v38, %v1881_v61  ;;  %v1890_v10 = vsel %vm662_vm13, %v1889_v45, %v1888_v55  ;;  %v4601_v33 = vld [vmem:[#allocation3 + $0xd8] sm:$0xf0]  ;;  %v5584_v41 = vld [vmem:[#allocation3 + $0x1d4] sm:$0xf]  ;;  %v4540_v22 = vor.u32 %v5536_v16, %v4537_v27  ;;  %v4529_v46 = vld [vmem:[#allocation3 + $0x48] sm:$0xf0] }
 0x228   : > { %v1876_v43 = vsel %vm655_vm12, %v1872_v36, %v1875_v51  ;;  %v1883_v18 = vsel %vm1859_vm14, %v1879_v52, %v1882_v54  ;;  %v1891_v63 = vsel %vm7516_vm2, %v1887_v50, %v1890_v10  ;;  %v4665_v37 = vld [vmem:[#allocation3 + $0x158] sm:$0xf0]  ;;  %v4604_v32 = vor.u32 %v5552_v31, %v4601_v33  ;;  %v4593_v36 = vld [vmem:[#allocation3 + $0xc8] sm:$0xf0]  ;;  %v5566_v25 = vld [vmem:[#allocation3 + $0x144] sm:$0xf] }
 0x229   : > { %v1884_v11 = vrot.slane %v1883_v18, 1  ;;  %v1892_v56 = vrot.slane %v1891_v63, 2  ;;  %1899 = vst [vmem:[#allocation1 + $0x3] ss:$9 sm:$0xff] %v1876_v43  ;;  %v4729_v30 = vld [vmem:[#allocation3 + $0x1d8] sm:$0xf0]  ;;  %v4668_v19 = vor.u32 %v5568_v24, %v4665_v37  ;;  %v4532_v51 = vor.u32 %v5534_v4, %v4529_v46 }
 0x22a   : > { %v4732_v49 = vor.u32 %v5584_v41, %v4729_v30  ;;  %v4657_v52 = vld [vmem:[#allocation3 + $0x148] sm:$0xf0]  ;;  %v5582_v38 = vld [vmem:[#allocation3 + $0x1c4] sm:$0xf]  ;;  %v5532_v61 = vld [vmem:[#allocation3 + $0x34] sm:$0xf]  ;;  %v4596_v54 = vor.u32 %v5550_v0, %v4593_v36 }
 0x22b   : > { %1901 = vst [vmem:[#allocation1 + $0x4] ss:$9 sm:$0xff] %v1884_v11  ;;  %v4721_v8 = vld [vmem:[#allocation3 + $0x1c8] sm:$0xf0]  ;;  %v4521_v55 = vld [vmem:[#allocation3 + $0x38] sm:$0xf0]  ;;  %v4660_v18 = vor.u32 %v5566_v25, %v4657_v52 }
 0x22c   : > { %1903 = vst [vmem:[#allocation1 + $0x5] ss:$9 sm:$0xff] %v1892_v56  ;;  %v5548_v45 = vld [vmem:[#allocation3 + $0xb4] sm:$0xf]  ;;  %v4585_v50 = vld [vmem:[#allocation3 + $0xb8] sm:$0xf0]  ;;  %v4724_v63 = vor.u32 %v5582_v38, %v4721_v8  ;;  %v4524_v1 = vor.u32 %v5532_v61, %v4521_v55 }
 0x22d   : > { %v5564_v10 = vld [vmem:[#allocation3 + $0x134] sm:$0xf]  ;;  %v4649_v43 = vld [vmem:[#allocation3 + $0x138] sm:$0xf0]  ;;  %v4588_v62 = vor.u32 %v5548_v45, %v4585_v50  ;;  %v5546_v15 = vld [vmem:[#allocation3 + $0xa4] sm:$0xf] }
 0x22e   : > { %v5580_v58 = vld [vmem:[#allocation3 + $0x1b4] sm:$0xf]  ;;  %v4713_v3 = vld [vmem:[#allocation3 + $0x1b8] sm:$0xf0]  ;;  %v4577_v9 = vld [vmem:[#allocation3 + $0xa8] sm:$0xf0] }
 0x22f   : > { %v5578_v21 = vld [vmem:[#allocation3 + $0x1a4] sm:$0xf]  ;;  %v4705_v35 = vld [vmem:[#allocation3 + $0x1a8] sm:$0xf0]  ;;  %v4580_v57 = vor.u32 %v5546_v15, %v4577_v9  ;;  %v5528_v53 = vld [vmem:[#allocation3 + $0x14] sm:$0xf] }
 0x230   : > { %v4505_v17 = vld [vmem:[#allocation3 + $0x18] sm:$0xf0]  ;;  %v5544_v16 = vld [vmem:[#allocation3 + $0x94] sm:$0xf]  ;;  %v5526_v24 = vld [vmem:[#allocation3 + $0x4] sm:$0xf] }
 0x231   : > { %v4569_v27 = vld [vmem:[#allocation3 + $0x98] sm:$0xf0]  ;;  %v5576_v31 = vld [vmem:[#allocation3 + $0x194] sm:$0xf]  ;;  %v4508_v37 = vor.u32 %v5528_v53, %v4505_v17  ;;  %v4497_v30 = vld [vmem:[#allocation3 + $0x8] sm:$0xf0] }
 0x232   : > { %v4697_v33 = vld [vmem:[#allocation3 + $0x198] sm:$0xf0]  ;;  %v4572_v41 = vor.u32 %v5544_v16, %v4569_v27  ;;  %v5574_v0 = vld [vmem:[#allocation3 + $0x184] sm:$0xf]  ;;  %v4689_v36 = vld [vmem:[#allocation3 + $0x188] sm:$0xf0]  ;;  %v4500_v55 = vor.u32 %v5526_v24, %v4497_v30 }
 0x233   : > { %v1904_v47 = vld [vmem:[#allocation1] sm:$0xff]  ;;  %v1905_v48 = vld [vmem:[#allocation1 + $0x9] sm:$0xff]  ;;  %v1906_v13 = vld [vmem:[#allocation1 + $0x12] sm:$0xff]  ;;  %v4700_v46 = vor.u32 %v5576_v31, %v4697_v33 }
 0x234   : > { %v7145_v44 = vpack.c.bf16 %v1904_v47, %v1904_v47  ;;  %v7147_v6 = vpack.c.bf16 %v1905_v48, %v1905_v48  ;;  %v7149_v7 = vpack.c.bf16 %v1906_v13, %v1906_v13  ;;  %v1907_v14 = vld [vmem:[#allocation1 + $0x1b] sm:$0xff]  ;;  %v1908_v11 = vld [vmem:[#allocation1 + $0x24] sm:$0xff]  ;;  %v1909_v56 = vld [vmem:[#allocation1 + $0x2d] sm:$0xff]  ;;  %v4652_v47 = vor.u32 %v5564_v10, %v4649_v43 }
 0x235   : > { %v7151_v59 = vpack.c.bf16 %v1907_v14, %v1907_v14  ;;  %v1910_v34 = vld [vmem:[#allocation1 + $0x36] sm:$0xff]  ;;  %v1911_v28 = vld [vmem:[#allocation1 + $0x3f] sm:$0xff]  ;;  %v7157_v12 = vpack.c.bf16 %v1908_v11, %v1908_v11  ;;  %v7159_v39 = vpack.c.bf16 %v1909_v56, %v1909_v56  ;;  %v5530_v48 = vld [vmem:[#allocation3 + $0x24] sm:$0xf]  ;;  %v4692_v43 = vor.u32 %v5574_v0, %v4689_v36 }
 0x236   : > { %2710 = vmatmul.bf16.vlgmr.msra.gmra.mxu2 %v7145_v44  ;;  %2723 = vmatmul.bf16.vlgmr.msra.gmra.mxu3 %v7147_v6  ;;  %v4513_v13 = vld [vmem:[#allocation3 + $0x28] sm:$0xf0]  ;;  %v7163_v14 = vpack.c.bf16 %v1911_v28, %v1911_v28  ;;  %v5604_v25 = vld [vmem:[#allocation3 + $0x274] sm:$0xf]  ;;  %v4809_v52 = vld [vmem:[#allocation3 + $0x278] sm:$0xf0] }
 0x237   : > { %2736 = vmatmul.bf16.vlgmr.msrb.gmra.mxu0 %v7149_v7  ;;  %2749 = vmatmul.bf16.vlgmr.msrb.gmra.mxu1 %v7151_v59  ;;  %v4516_v23 = vor.u32 %v5530_v48, %v4513_v13  ;;  %v5620_v38 = vld [vmem:[#allocation3 + $0x2f4] sm:$0xf]  ;;  %v4873_v8 = vld [vmem:[#allocation3 + $0x2f8] sm:$0xf0]  ;;  %v5602_v11 = vld [vmem:[#allocation3 + $0x264] sm:$0xf] }
 0x238   : > { %2806 = vmatpush.bf16.msra.mxu2 %v4556_v5  ;;  %2819 = vmatpush.bf16.msra.mxu3 %v4620_v40  ;;  %v7161_v5 = vpack.c.bf16 %v1910_v34, %v1910_v34  ;;  %v4716_v40 = vor.u32 %v5580_v58, %v4713_v3  ;;  %v5636_v61 = vld [vmem:[#allocation3 + $0x374] sm:$0xf]  ;;  %v5001_v50 = vld [vmem:[#allocation3 + $0x3f8] sm:$0xf0]  ;;  %v4801_v56 = vld [vmem:[#allocation3 + $0x268] sm:$0xf0] }
 0x239   : > { %2832 = vmatpush.bf16.msrb.mxu0 %v4684_v42  ;;  %2845 = vmatpush.bf16.msrb.mxu1 %v4748_v60  ;;  %v5562_v42 = vld [vmem:[#allocation3 + $0x124] sm:$0xf]  ;;  %v4641_v60 = vld [vmem:[#allocation3 + $0x128] sm:$0xf0]  ;;  %v4804_v13 = vor.u32 %v5602_v11, %v4801_v56  ;;  %v5600_v15 = vld [vmem:[#allocation3 + $0x254] sm:$0xf] }
 0x23a   : > { %v5618_v28 = vld [vmem:[#allocation3 + $0x2e4] sm:$0xf]  ;;  %v4865_v3 = vld [vmem:[#allocation3 + $0x2e8] sm:$0xf0]  ;;  %v4793_v9 = vld [vmem:[#allocation3 + $0x258] sm:$0xf0] }
 0x23b   : > { %v4993_v48 = vld [vmem:[#allocation3 + $0x3e8] sm:$0xf0]  ;;  %v5648_v53 = vld [vmem:[#allocation3 + $0x3d4] sm:$0xf]  ;;  %v4985_v17 = vld [vmem:[#allocation3 + $0x3d8] sm:$0xf0] }
 0x23c   : > { %2807 = vmatpush.bf16.msra.mxu2 %v4548_v20  ;;  %2820 = vmatpush.bf16.msra.mxu3 %v4612_v26  ;;  %v4644_v20 = vor.u32 %v5562_v42, %v4641_v60  ;;  %v4708_v26 = vor.u32 %v5578_v21, %v4705_v35  ;;  %v5616_v21 = vld [vmem:[#allocation3 + $0x2d4] sm:$0xf]  ;;  %v4857_v35 = vld [vmem:[#allocation3 + $0x2d8] sm:$0xf0]  ;;  %v5598_v16 = vld [vmem:[#allocation3 + $0x244] sm:$0xf] }
 0x23d   : > { %2833 = vmatpush.bf16.msrb.mxu0 %v4676_v29  ;;  %2846 = vmatpush.bf16.msrb.mxu1 %v4740_v2  ;;  %v5560_v29 = vld [vmem:[#allocation3 + $0x114] sm:$0xf]  ;;  %v4633_v2 = vld [vmem:[#allocation3 + $0x118] sm:$0xf0]  ;;  %v4785_v27 = vld [vmem:[#allocation3 + $0x248] sm:$0xf0] }
 0x23e   : > { %v4636_v4 = vor.u32 %v5560_v29, %v4633_v2  ;;  %v4988_v2 = vor.u32 %v5648_v53, %v4985_v17  ;;  %v4849_v31 = vld [vmem:[#allocation3 + $0x2c8] sm:$0xf0]  ;;  %v5646_v24 = vld [vmem:[#allocation3 + $0x3c4] sm:$0xf]  ;;  %v4777_v30 = vld [vmem:[#allocation3 + $0x238] sm:$0xf0] }
 0x23f   : > { %v4913_v33 = vld [vmem:[#allocation3 + $0x348] sm:$0xf0]  ;;  %v5644_v0 = vld [vmem:[#allocation3 + $0x3b4] sm:$0xf]  ;;  %v4969_v36 = vld [vmem:[#allocation3 + $0x3b8] sm:$0xf0] }
 0x240   : > { %2808 = vmatpush.bf16.msra.mxu2 %v4540_v22  ;;  %2821 = vmatpush.bf16.msra.mxu3 %v4604_v32  ;;  %v5542_v22 = vld [vmem:[#allocation3 + $0x84] sm:$0xf]  ;;  %v4561_v32 = vld [vmem:[#allocation3 + $0x88] sm:$0xf0]  ;;  %v5592_v11 = vld [vmem:[#allocation3 + $0x214] sm:$0xf] }
 0x241   : > { %2834 = vmatpush.bf16.msrb.mxu0 %v4668_v19  ;;  %2847 = vmatpush.bf16.msrb.mxu1 %v4732_v49  ;;  %v5558_v19 = vld [vmem:[#allocation3 + $0x104] sm:$0xf]  ;;  %v4625_v49 = vld [vmem:[#allocation3 + $0x108] sm:$0xf0]  ;;  %v4564_v45 = vor.u32 %v5542_v22, %v4561_v32  ;;  %v4761_v56 = vld [vmem:[#allocation3 + $0x218] sm:$0xf0] }
 0x242   : > { %v4628_v10 = vor.u32 %v5558_v19, %v4625_v49  ;;  %v5628_v19 = vld [vmem:[#allocation3 + $0x334] sm:$0xf]  ;;  %v4905_v49 = vld [vmem:[#allocation3 + $0x338] sm:$0xf0]  ;;  %v5638_v53 = vld [vmem:[#allocation3 + $0x384] sm:$0xf] }
 0x243   : > { %v4945_v17 = vld [vmem:[#allocation3 + $0x388] sm:$0xf0] }
 0x244   : > { %2809 = vmatpush.bf16.msra.mxu2 %v4532_v51  ;;  %2822 = vmatpush.bf16.msra.mxu3 %v4596_v54  ;;  %v4937_v51 = vld [vmem:[#allocation3 + $0x378] sm:$0xf0]  ;;  %v5652_v54 = vld [vmem:[#allocation3 + $0x3f4] sm:$0xf] }
 0x245   : > { %2835 = vmatpush.bf16.msrb.mxu0 %v4660_v18  ;;  %2848 = vmatpush.bf16.msrb.mxu1 %v4724_v63  ;;  %v4812_v18 = vor.u32 %v5604_v25, %v4809_v52  ;;  %v4876_v63 = vor.u32 %v5620_v38, %v4873_v8  ;;  %v4940_v58 = vor.u32 %v5636_v61, %v4937_v51  ;;  %v5594_v38 = vld [vmem:[#allocation3 + $0x224] sm:$0xf]  ;;  %v4769_v8 = vld [vmem:[#allocation3 + $0x228] sm:$0xf0] }
 0x246   : > { %2762 = vmatmul.bf16.vlgmr.msrb.gmra.mxu2 %v7157_v12  ;;  %2775 = vmatmul.bf16.vlgmr.msrb.gmra.mxu3 %v7159_v39  ;;  %v5004_v34 = vor.u32 %v5652_v54, %v5001_v50  ;;  %v4908_v61 = vor.u32 %v5628_v19, %v4905_v49  ;;  %v4833_v51 = vld [vmem:[#allocation3 + $0x2a8] sm:$0xf0]  ;;  %v5626_v54 = vld [vmem:[#allocation3 + $0x324] sm:$0xf] }
 0x247   : > { %2788 = vmatmul.bf16.vlgmr.msra.gmra.mxu0 %v7161_v5  ;;  %2801 = vmatmul.bf16.vlgmr.msra.gmra.mxu1 %v7163_v14  ;;  %v4897_v50 = vld [vmem:[#allocation3 + $0x328] sm:$0xf0]  ;;  %v5691_v19 = vld [vmem:[%s7507_s7 + $0x128] sm:$0xff] }
 0x248   : > { %2810 = vmatpush.bf16.msra.mxu2 %v4524_v1  ;;  %2823 = vmatpush.bf16.msra.mxu3 %v4588_v62  ;;  %v5634_v1 = vld [vmem:[#allocation3 + $0x364] sm:$0xf]  ;;  %v4929_v62 = vld [vmem:[#allocation3 + $0x368] sm:$0xf0] }
 0x249   : > { %2836 = vmatpush.bf16.msrb.mxu0 %v4652_v47  ;;  %2849 = vmatpush.bf16.msrb.mxu1 %v4716_v40  ;;  %v5650_v47 = vld [vmem:[#allocation3 + $0x3e4] sm:$0xf]  ;;  %v4868_v40 = vor.u32 %v5618_v28, %v4865_v3  ;;  %v4932_v42 = vor.u32 %v5634_v1, %v4929_v62  ;;  %v5608_v28 = vld [vmem:[#allocation3 + $0x294] sm:$0xf]  ;;  %v4825_v3 = vld [vmem:[#allocation3 + $0x298] sm:$0xf0] }
 0x24a   : > { %v4996_v60 = vor.u32 %v5650_v47, %v4993_v48  ;;  %v5624_v1 = vld [vmem:[#allocation3 + $0x314] sm:$0xf]  ;;  %v4889_v62 = vld [vmem:[#allocation3 + $0x318] sm:$0xf0] }
 0x24b   : > { %v5640_v47 = vld [vmem:[#allocation3 + $0x394] sm:$0xf]  ;;  %v4953_v48 = vld [vmem:[#allocation3 + $0x398] sm:$0xf0] }
 0x24c   : > { %2811 = vmatpush.bf16.msra.mxu2 %v4516_v23  ;;  %2824 = vmatpush.bf16.msra.mxu3 %v4580_v57  ;;  %v5632_v23 = vld [vmem:[#allocation3 + $0x354] sm:$0xf]  ;;  %v4921_v57 = vld [vmem:[#allocation3 + $0x358] sm:$0xf0] }
 0x24d   : > { %2837 = vmatpush.bf16.msrb.mxu0 %v4644_v20  ;;  %2850 = vmatpush.bf16.msrb.mxu1 %v4708_v26  ;;  %v4796_v20 = vor.u32 %v5600_v15, %v4793_v9  ;;  %v4860_v26 = vor.u32 %v5616_v21, %v4857_v35  ;;  %v4924_v29 = vor.u32 %v5632_v23, %v4921_v57  ;;  %v5590_v15 = vld [vmem:[#allocation3 + $0x204] sm:$0xf]  ;;  %v4753_v9 = vld [vmem:[#allocation3 + $0x208] sm:$0xf0] }
 0x24e   : > { %v5606_v21 = vld [vmem:[#allocation3 + $0x284] sm:$0xf]  ;;  %v4817_v35 = vld [vmem:[#allocation3 + $0x288] sm:$0xf0] }
 0x24f   : > { %v5622_v23 = vld [vmem:[#allocation3 + $0x304] sm:$0xf]  ;;  %v4881_v57 = vld [vmem:[#allocation3 + $0x308] sm:$0xf0] }
 0x250   : > { %2812 = vmatpush.bf16.msra.mxu2 %v4508_v37  ;;  %2825 = vmatpush.bf16.msra.mxu3 %v4572_v41  ;;  %v4977_v37 = vld [vmem:[#allocation3 + $0x3c8] sm:$0xf0]  ;;  %v5596_v41 = vld [vmem:[#allocation3 + $0x234] sm:$0xf]  ;;  %v5707_v49 = vld [vmem:[%s7507_s7 + $0x1a8] sm:$0xff] }
 0x251   : > { %2838 = vmatpush.bf16.msrb.mxu0 %v4636_v4  ;;  %2851 = vmatpush.bf16.msrb.mxu1 %v4700_v46  ;;  %v4980_v32 = vor.u32 %v5646_v24, %v4977_v37  ;;  %v5612_v4 = vld [vmem:[#allocation3 + $0x2b4] sm:$0xf]  ;;  %v4841_v46 = vld [vmem:[#allocation3 + $0x2b8] sm:$0xf0]  ;;  %v4780_v25 = vor.u32 %v5596_v41, %v4777_v30  ;;  %v5656_v24 = vld [vmem:[%s7507_s7 + $0x10] sm:$0xff] }
 0x252   : > { %v4844_v52 = vor.u32 %v5612_v4, %v4841_v46  ;;  %v5672_v37 = vld [vmem:[%s7507_s7 + $0x90] sm:$0xff]  ;;  %v5654_v41 = vld [vmem:[%s7507_s7] sm:$0xff]  ;;  %v5693_v30 = vld [vmem:[%s7507_s7 + $0x138] sm:$0xff] }
 0x253   : > { %v5692_v4 = vld [vmem:[%s7507_s7 + $0x130] sm:$0xff] }
 0x254   : > { %2813 = vmatpush.bf16.msra.mxu2 %v4500_v55  ;;  %2826 = vmatpush.bf16.msra.mxu3 %v4564_v45  ;;  %v4972_v55 = vor.u32 %v5644_v0, %v4969_v36  ;;  %v5610_v45 = vld [vmem:[#allocation3 + $0x2a4] sm:$0xf]  ;;  %v5690_v0 = vld [vmem:[%s7507_s7 + $0x120] sm:$0xff] }
 0x255   : > { %2839 = vmatpush.bf16.msrb.mxu0 %v4628_v10  ;;  %2852 = vmatpush.bf16.msrb.mxu1 %v4692_v43  ;;  %v5642_v10 = vld [vmem:[#allocation3 + $0x3a4] sm:$0xf]  ;;  %v4961_v43 = vld [vmem:[#allocation3 + $0x3a8] sm:$0xf0]  ;;  %v5706_v36 = vld [vmem:[%s7507_s7 + $0x1a0] sm:$0xff] }
 0x256   : > { %v5708_v46 = vld [vmem:[%s7507_s7 + $0x1b0] sm:$0xff] }
 0x257   : > { %2814 = vmatmul.bf16.vlgmr.msra.gmra.mxu2 %v7145_v44  ;;  %2827 = vmatmul.bf16.vlgmr.msra.gmra.mxu3 %v7147_v6  ;;  %v5614_v44 = vld [vmem:[#allocation3 + $0x2c4] sm:$0xf] }
 0x258   : > { %2858 = vmatpush.bf16.msrb.mxu2 %v4812_v18  ;;  %2871 = vmatpush.bf16.msrb.mxu3 %v4876_v63  ;;  %v5630_v6 = vld [vmem:[#allocation3 + $0x344] sm:$0xf]  ;;  %v4772_v18 = vor.u32 %v5594_v38, %v4769_v8  ;;  %v4836_v63 = vor.u32 %v5610_v45, %v4833_v51  ;;  %v5685_v38 = vld [vmem:[%s7507_s7 + $0xf8] sm:$0xff] }
 0x259   : > { %2884 = vmatpush.bf16.msra.mxu0 %v4940_v58  ;;  %2897 = vmatpush.bf16.msra.mxu1 %v5004_v34  ;;  %v4916_v22 = vor.u32 %v5630_v6, %v4913_v33  ;;  %v4900_v58 = vor.u32 %v5626_v54, %v4897_v50  ;;  %v4964_v34 = vor.u32 %v5642_v10, %v4961_v43  ;;  %v5659_v6 = vld [vmem:[%s7507_s7 + $0x28] sm:$0xff]  ;;  %v5705_v8 = vld [vmem:[%s7507_s7 + $0x198] sm:$0xff]  ;;  %v5684_v45 = vld [vmem:[%s7507_s7 + $0xf0] sm:$0xff] }
 0x25a   : > { %2840 = vmatmul.bf16.vlgmr.msrb.gmra.mxu0 %v7149_v7  ;;  %2853 = vmatmul.bf16.vlgmr.msrb.gmra.mxu1 %v7151_v59  ;;  %v4788_v7 = vor.u32 %v5598_v16, %v4785_v27  ;;  %v4852_v59 = vor.u32 %v5614_v44, %v4849_v31  ;;  %v4884_v16 = vor.u32 %v5622_v23, %v4881_v57  ;;  %v5660_v44 = vld [vmem:[%s7507_s7 + $0x30] sm:$0xff]  ;;  %v5675_v33 = vld [vmem:[%s7507_s7 + $0xa8] sm:$0xff] }
 0x25b   : > { %v4948_v27 = vor.u32 %v5638_v53, %v4945_v17  ;;  %v5676_v31 = vld [vmem:[%s7507_s7 + $0xb0] sm:$0xff]  ;;  %v5667_v54 = vld [vmem:[%s7507_s7 + $0x68] sm:$0xff] }
 0x25c   : > { %2859 = vmatpush.bf16.msrb.mxu2 %v4804_v13  ;;  %2872 = vmatpush.bf16.msrb.mxu3 %v4868_v40  ;;  %v4764_v13 = vor.u32 %v5592_v11, %v4761_v56  ;;  %v4828_v40 = vor.u32 %v5608_v28, %v4825_v3  ;;  %v5704_v51 = vld [vmem:[%s7507_s7 + $0x190] sm:$0xff]  ;;  %v5687_v50 = vld [vmem:[%s7507_s7 + $0x108] sm:$0xff]  ;;  %v5666_v56 = vld [vmem:[%s7507_s7 + $0x60] sm:$0xff] }
 0x25d   : > { %2885 = vmatpush.bf16.msra.mxu0 %v4932_v42  ;;  %2898 = vmatpush.bf16.msra.mxu1 %v4996_v60  ;;  %v4892_v42 = vor.u32 %v5624_v1, %v4889_v62  ;;  %v4956_v60 = vor.u32 %v5640_v47, %v4953_v48  ;;  %v5703_v11 = vld [vmem:[%s7507_s7 + $0x188] sm:$0xff]  ;;  %v5702_v3 = vld [vmem:[%s7507_s7 + $0x180] sm:$0xff]  ;;  %v5665_v47 = vld [vmem:[%s7507_s7 + $0x58] sm:$0xff] }
 0x25e   : > { %v5663_v23 = vld [vmem:[%s7507_s7 + $0x48] sm:$0xff] }
 0x25f   : > { %v5679_v57 = vld [vmem:[%s7507_s7 + $0xc8] sm:$0xff] }
 0x260   : > { %2860 = vmatpush.bf16.msrb.mxu2 %v4796_v20  ;;  %2873 = vmatpush.bf16.msrb.mxu3 %v4860_v26  ;;  %v4756_v20 = vor.u32 %v5590_v15, %v4753_v9  ;;  %v4820_v26 = vor.u32 %v5606_v21, %v4817_v35  ;;  %v5681_v15 = vld [vmem:[%s7507_s7 + $0xd8] sm:$0xff]  ;;  %v5664_v9 = vld [vmem:[%s7507_s7 + $0x50] sm:$0xff] }
 0x261   : > { %2886 = vmatpush.bf16.msra.mxu0 %v4924_v29  ;;  %2899 = vmatpush.bf16.msra.mxu1 %v4988_v2  ;;  %v5661_v29 = vld [vmem:[%s7507_s7 + $0x38] sm:$0xff] }
 0x262   : > { %v5677_v2 = vld [vmem:[%s7507_s7 + $0xb8] sm:$0xff] }
 0x264   : > { %2861 = vmatpush.bf16.msrb.mxu2 %v4788_v7  ;;  %2874 = vmatpush.bf16.msrb.mxu3 %v4852_v59  ;;  %v5655_v7 = vld [vmem:[%s7507_s7 + $0x8] sm:$0xff] }
 0x265   : > { %2887 = vmatpush.bf16.msra.mxu0 %v4916_v22  ;;  %2900 = vmatpush.bf16.msra.mxu1 %v4980_v32  ;;  %v5671_v59 = vld [vmem:[%s7507_s7 + $0x88] sm:$0xff]  ;;  %v5670_v22 = vld [vmem:[%s7507_s7 + $0x80] sm:$0xff]  ;;  %v5709_v32 = vld [vmem:[%s7507_s7 + $0x1b8] sm:$0xff] }
 0x268   : > { %2862 = vmatpush.bf16.msrb.mxu2 %v4780_v25  ;;  %2875 = vmatpush.bf16.msrb.mxu3 %v4844_v52  ;;  %v5669_v25 = vld [vmem:[%s7507_s7 + $0x78] sm:$0xff] }
 0x269   : > { %2888 = vmatpush.bf16.msra.mxu0 %v4908_v61  ;;  %2901 = vmatpush.bf16.msra.mxu1 %v4972_v55  ;;  %v5689_v52 = vld [vmem:[%s7507_s7 + $0x118] sm:$0xff]  ;;  %v5668_v61 = vld [vmem:[%s7507_s7 + $0x70] sm:$0xff] }
 0x26a   : > { %v5688_v55 = vld [vmem:[%s7507_s7 + $0x110] sm:$0xff] }
 0x26c   : > { %2863 = vmatpush.bf16.msrb.mxu2 %v4772_v18  ;;  %2876 = vmatpush.bf16.msrb.mxu3 %v4836_v63  ;;  %v7282_v18 = vld [vmem:[%s7506_s6] sm:$0x3]  ;;  %v5683_v63 = vld [vmem:[%s7507_s7 + $0xe8] sm:$0xff] }
 0x26d   : > { %2889 = vmatpush.bf16.msra.mxu0 %v4900_v58  ;;  %2902 = vmatpush.bf16.msra.mxu1 %v4964_v34  ;;  %v5686_v58 = vld [vmem:[%s7507_s7 + $0x100] sm:$0xff]  ;;  %v2058_v28 = vperm.slane %v7282_v18, 0 }
 0x26e   : > { %v5682_v34 = vld [vmem:[%s7507_s7 + $0xe0] sm:$0xff] }
 0x270   : > { %2864 = vmatpush.bf16.msrb.mxu2 %v4764_v13  ;;  %2877 = vmatpush.bf16.msrb.mxu3 %v4828_v40 }
 0x271   : > { %2890 = vmatpush.bf16.msra.mxu0 %v4892_v42  ;;  %2903 = vmatpush.bf16.msra.mxu1 %v4956_v60  ;;  %v5680_v60 = vld [vmem:[%s7507_s7 + $0xd0] sm:$0xff] }
 0x274   : > { %2865 = vmatpush.bf16.msrb.mxu2 %v4756_v20  ;;  %2878 = vmatpush.bf16.msrb.mxu3 %v4820_v26  ;;  %v5662_v26 = vld [vmem:[%s7507_s7 + $0x40] sm:$0xff] }
 0x275   : > { %2891 = vmatpush.bf16.msra.mxu0 %v4884_v16  ;;  %2904 = vmatpush.bf16.msra.mxu1 %v4948_v27  ;;  %v5701_v16 = vld [vmem:[%s7507_s7 + $0x178] sm:$0xff]  ;;  %v5678_v27 = vld [vmem:[%s7507_s7 + $0xc0] sm:$0xff] }
 0x277   : > { %2866 = vmatmul.bf16.vlgmr.msrb.gmra.mxu2 %v7157_v12  ;;  %2879 = vmatmul.bf16.vlgmr.msrb.gmra.mxu3 %v7159_v39  ;;  %v5658_v12 = vld [vmem:[%s7507_s7 + $0x20] sm:$0xff] }
 0x278   : > { %3715 = vmatpush.bf16.msra.mxu2 %v5661_v29  ;;  %2892 = vmatmul.bf16.vlgmr.msra.gmra.mxu0 %v7161_v5  ;;  %v5674_v39 = vld [vmem:[%s7507_s7 + $0xa0] sm:$0xff]  ;;  %v5657_v5 = vld [vmem:[%s7507_s7 + $0x18] sm:$0xff] }
 0x279   : > { %3741 = vmatpush.bf16.msrb.mxu0 %v5677_v2  ;;  %2905 = vmatmul.bf16.vlgmr.msra.gmra.mxu1 %v7163_v14  ;;  %v5673_v14 = vld [vmem:[%s7507_s7 + $0x98] sm:$0xff] }
 0x27a   : > { %3728 = vmatpush.bf16.msra.mxu3 %v5669_v25  ;;  %3754 = vmatpush.bf16.msrb.mxu1 %v5685_v38  ;;  %v5717_v2 = vld [vmem:[%s7507_s7 + $0x1f8] sm:$0xff]  ;;  %v5724_v38 = vld [vmem:[%s7507_s7 + $0x230] sm:$0xff] }
 0x27c   : > { %3716 = vmatpush.bf16.msra.mxu2 %v5660_v44 }
 0x27d   : > { %3742 = vmatpush.bf16.msrb.mxu0 %v5676_v31 }
 0x27e   : > { %3729 = vmatpush.bf16.msra.mxu3 %v5668_v61  ;;  %3755 = vmatpush.bf16.msrb.mxu1 %v5684_v45  ;;  %v5740_v61 = vld [vmem:[%s7507_s7 + $0x2b0] sm:$0xff] }
 0x280   : > { %3717 = vmatpush.bf16.msra.mxu2 %v5659_v6 }
 0x281   : > { %3743 = vmatpush.bf16.msrb.mxu0 %v5675_v33  ;;  %v5700_v33 = vld [vmem:[%s7507_s7 + $0x170] sm:$0xff] }
 0x282   : > { %3730 = vmatpush.bf16.msra.mxu3 %v5667_v54  ;;  %3756 = vmatpush.bf16.msrb.mxu1 %v5683_v63  ;;  %v5723_v54 = vld [vmem:[%s7507_s7 + $0x228] sm:$0xff] }
 0x284   : > { %3718 = vmatpush.bf16.msra.mxu2 %v5658_v12 }
 0x285   : > { %3744 = vmatpush.bf16.msrb.mxu0 %v5674_v39 }
 0x286   : > { %3731 = vmatpush.bf16.msra.mxu3 %v5666_v56  ;;  %3757 = vmatpush.bf16.msrb.mxu1 %v5682_v34  ;;  %v5722_v56 = vld [vmem:[%s7507_s7 + $0x220] sm:$0xff]  ;;  %v5695_v34 = vld [vmem:[%s7507_s7 + $0x148] sm:$0xff] }
 0x288   : > { %3719 = vmatpush.bf16.msra.mxu2 %v5657_v5 }
 0x289   : > { %3745 = vmatpush.bf16.msrb.mxu0 %v5673_v14  ;;  %v5716_v14 = vld [vmem:[%s7507_s7 + $0x1f0] sm:$0xff] }
 0x28a   : > { %3732 = vmatpush.bf16.msra.mxu3 %v5665_v47  ;;  %3758 = vmatpush.bf16.msrb.mxu1 %v5681_v15  ;;  %v5737_v15 = vld [vmem:[%s7507_s7 + $0x298] sm:$0xff] }
 0x28c   : > { %3720 = vmatpush.bf16.msra.mxu2 %v5656_v24 }
 0x28d   : > { %3746 = vmatpush.bf16.msrb.mxu0 %v5672_v37  ;;  %v5699_v37 = vld [vmem:[%s7507_s7 + $0x168] sm:$0xff] }
 0x28e   : > { %3733 = vmatpush.bf16.msra.mxu3 %v5664_v9  ;;  %3759 = vmatpush.bf16.msrb.mxu1 %v5680_v60  ;;  %v2059_v60 = vperm.slane %v7282_v18, 1  ;;  %v5735_v18 = vld [vmem:[%s7507_s7 + $0x288] sm:$0xff] }
 0x290   : > { %3721 = vmatpush.bf16.msra.mxu2 %v5655_v7 }
 0x291   : > { %3747 = vmatpush.bf16.msrb.mxu0 %v5671_v59 }
 0x292   : > { %3734 = vmatpush.bf16.msra.mxu3 %v5663_v23  ;;  %3760 = vmatpush.bf16.msrb.mxu1 %v5679_v57  ;;  %v5719_v57 = vld [vmem:[%s7507_s7 + $0x208] sm:$0xff] }
 0x294   : > { %3722 = vmatpush.bf16.msra.mxu2 %v5654_v41 }
 0x295   : > { %3748 = vmatpush.bf16.msrb.mxu0 %v5670_v22  ;;  %v5715_v22 = vld [vmem:[%s7507_s7 + $0x1e8] sm:$0xff] }
 0x296   : > { %3735 = vmatpush.bf16.msra.mxu3 %v5662_v26  ;;  %3761 = vmatpush.bf16.msrb.mxu1 %v5678_v27  ;;  %v5734_v26 = vld [vmem:[%s7507_s7 + $0x280] sm:$0xff] }
 0x298   : > { %3767 = vmatpush.bf16.msrb.mxu2 %v5693_v30 }
 0x299   : > { %3793 = vmatpush.bf16.msra.mxu0 %v5709_v32  ;;  %v5725_v32 = vld [vmem:[%s7507_s7 + $0x238] sm:$0xff] }
 0x29a   : > { %3780 = vmatpush.bf16.msrb.mxu3 %v5701_v16  ;;  %3806 = vmatpush.bf16.msra.mxu1 %v5717_v2 }
 0x29c   : > { %3768 = vmatpush.bf16.msrb.mxu2 %v5692_v4  ;;  %v5698_v4 = vld [vmem:[%s7507_s7 + $0x160] sm:$0xff] }
 0x29d   : > { %3794 = vmatpush.bf16.msra.mxu0 %v5708_v46 }
 0x29e   : > { %3781 = vmatpush.bf16.msrb.mxu3 %v5700_v33  ;;  %3807 = vmatpush.bf16.msra.mxu1 %v5716_v14 }
 0x2a0   : > { %3769 = vmatpush.bf16.msrb.mxu2 %v5691_v19 }
 0x2a1   : > { %3795 = vmatpush.bf16.msra.mxu0 %v5707_v49  ;;  %v5714_v49 = vld [vmem:[%s7507_s7 + $0x1e0] sm:$0xff] }
 0x2a2   : > { %3782 = vmatpush.bf16.msrb.mxu3 %v5699_v37  ;;  %3808 = vmatpush.bf16.msra.mxu1 %v5715_v22  ;;  %v5733_v22 = vld [vmem:[%s7507_s7 + $0x278] sm:$0xff] }
 0x2a4   : > { %3770 = vmatpush.bf16.msrb.mxu2 %v5690_v0  ;;  %v5741_v0 = vld [vmem:[%s7507_s7 + $0x2b8] sm:$0xff] }
 0x2a5   : > { %3796 = vmatpush.bf16.msra.mxu0 %v5706_v36 }
 0x2a6   : > { %3783 = vmatpush.bf16.msrb.mxu3 %v5698_v4  ;;  %3809 = vmatpush.bf16.msra.mxu1 %v5714_v49  ;;  %v5732_v49 = vld [vmem:[%s7507_s7 + $0x270] sm:$0xff] }
 0x2a8   : > { %3771 = vmatpush.bf16.msrb.mxu2 %v5689_v52 }
 0x2a9   : > { %3797 = vmatpush.bf16.msra.mxu0 %v5705_v8  ;;  %v5697_v8 = vld [vmem:[%s7507_s7 + $0x158] sm:$0xff] }
 0x2aa   : > { %3784 = vmatpush.bf16.msrb.mxu3 %v5697_v8  ;;  %v5746_v8 = vld [vmem:[%s7507_s7 + $0x2e0] sm:$0xff] }
 0x2ac   : > { %3772 = vmatpush.bf16.msrb.mxu2 %v5688_v55  ;;  %v5713_v55 = vld [vmem:[%s7507_s7 + $0x1d8] sm:$0xff] }
 0x2ad   : > { %3798 = vmatpush.bf16.msra.mxu0 %v5704_v51  ;;  %3810 = vmatpush.bf16.msra.mxu1 %v5713_v55  ;;  %v5729_v55 = vld [vmem:[%s7507_s7 + $0x258] sm:$0xff] }
 0x2b0   : > { %3773 = vmatpush.bf16.msrb.mxu2 %v5687_v50  ;;  %v5696_v50 = vld [vmem:[%s7507_s7 + $0x150] sm:$0xff] }
 0x2b1   : > { %3799 = vmatpush.bf16.msra.mxu0 %v5703_v11  ;;  %3785 = vmatpush.bf16.msrb.mxu3 %v5696_v50  ;;  %v5712_v11 = vld [vmem:[%s7507_s7 + $0x1d0] sm:$0xff] }
 0x2b2   : > { %3811 = vmatpush.bf16.msra.mxu1 %v5712_v11  ;;  %v5728_v50 = vld [vmem:[%s7507_s7 + $0x250] sm:$0xff]  ;;  %v5726_v11 = vld [vmem:[%s7507_s7 + $0x240] sm:$0xff] }
 0x2b4   : > { %v2737_v10 = vpop.f32.mrf.mxu0  ;;  %v2750_v43 = vpop.f32.mrf.mxu1  ;;  %3774 = vmatpush.bf16.msrb.mxu2 %v5686_v58 }
 0x2b5   : > { %3800 = vmatpush.bf16.msra.mxu0 %v5702_v3  ;;  %v5711_v3 = vld [vmem:[%s7507_s7 + $0x1c8] sm:$0xff]  ;;  %3786 = vmatpush.bf16.msrb.mxu3 %v5695_v34 }
 0x2b6   : > { %3812 = vmatpush.bf16.msra.mxu1 %v5711_v3 }
 0x2b9   : > { %v2711_v1 = vpop.f32.mrf.mxu2  ;;  %v2724_v62 = vpop.f32.mrf.mxu3 }
 0x2ba   : > { %v2712_v48 = vadd.f32 %v2711_v1, %v2058_v28  ;;  %v5738_v28 = vld [vmem:[%s7507_s7 + $0x2a0] sm:$0xff] }
 0x2bc   : > { %v2739_v13 = vpop.f32.mrf.mxu0  ;;  %v2752_v40 = vpop.f32.mrf.mxu1  ;;  %v2725_v42 = vadd.f32 %v2724_v62, %v2712_v48  ;;  %v5721_v48 = vld [vmem:[%s7507_s7 + $0x218] sm:$0xff] }
 0x2bd   : > { %v5694_v40 = vld [vmem:[%s7507_s7 + $0x140] sm:$0xff] }
 0x2be   : > { %v2738_v53 = vadd.f32 %v2737_v10, %v2725_v42  ;;  %v5739_v10 = vld [vmem:[%s7507_s7 + $0x2a8] sm:$0xff]  ;;  %3787 = vmatpush.bf16.msrb.mxu3 %v5694_v40  ;;  %v5710_v42 = vld [vmem:[%s7507_s7 + $0x1c0] sm:$0xff] }
 0x2bf   : > { %3813 = vmatpush.bf16.msra.mxu1 %v5710_v42 }
 0x2c0   : > { %v2751_v29 = vadd.f32 %v2750_v43, %v2738_v53 }
 0x2c1   : > { %v2713_v21 = vpop.f32.mrf.mxu2  ;;  %v2726_v35 = vpop.f32.mrf.mxu3 }
 0x2c2   : > { %v5720_v21 = vld [vmem:[%s7507_s7 + $0x210] sm:$0xff] }
 0x2c3   : > { %v5736_v35 = vld [vmem:[%s7507_s7 + $0x290] sm:$0xff] }
 0x2c4   : > { %v2789_v17 = vpop.f32.mrf.mxu0  ;;  %v2802_v20 = vpop.f32.mrf.mxu1 }
 0x2c9   : > { %v2763_v44 = vpop.f32.mrf.mxu2  ;;  %v2776_v31 = vpop.f32.mrf.mxu3 }
 0x2ca   : > { %v2764_v6 = vadd.f32 %v2763_v44, %v2751_v29 }
 0x2cc   : > { %v2777_v12 = vadd.f32 %v2776_v31, %v2764_v6  ;;  %v2791_v39 = vpop.f32.mrf.mxu0  ;;  %v2804_v5 = vpop.f32.mrf.mxu1 }
 0x2ce   : > { %v2790_v24 = vadd.f32 %v2789_v17, %v2777_v12  ;;  %v5718_v17 = vld [vmem:[%s7507_s7 + $0x200] sm:$0xff] }
 0x2d0   : > { %v2803_v7 = vadd.f32 %v2802_v20, %v2790_v24 }
 0x2d1   : > { %v2765_v59 = vpop.f32.mrf.mxu2  ;;  %v2778_v41 = vpop.f32.mrf.mxu3 }
 0x2d2   : > { %v7342_v30 = vmax.f32 %v2803_v7, 0.0 }
 0x2d4   : > { %v2934_v46 = vpack.c.bf16 %v7342_v30, %v7342_v30  ;;  %v2914_v19 = vrot.slane %v7342_v30, 1  ;;  %v2918_v58 = vrot.slane %v7342_v30, 2  ;;  %v2922_v1 = vrot.slane %v7342_v30, 3 }
 0x2d5   : > { %v2926_v20 = vrot.slane %v7342_v30, 4  ;;  %v2930_v16 = vrot.slane %v7342_v30, 5 }
 0x2d6   : > { %3723 = vmatmul.bf16.vlgmr.msra.gmra.mxu2 %v2934_v46  ;;  %v2936_v52 = vpack.c.bf16 %v2914_v19, %v2914_v19  ;;  %v2938_v13 = vpack.c.bf16 %v2918_v58, %v2918_v58  ;;  %v2940_v9 = vpack.c.bf16 %v2922_v1, %v2922_v1  ;;  %v5749_v46 = vld [vmem:[%s7507_s7 + $0x2f8] sm:$0xff]  ;;  %v5742_v58 = vld [vmem:[%s7507_s7 + $0x2c0] sm:$0xff] }
 0x2d7   : > { %v7362_v36 = vpop.f32.mrf.mxu0  ;;  %v7364_v25 = vpop.f32.mrf.mxu1  ;;  %3819 = vmatpush.bf16.msra.mxu2 %v5725_v32  ;;  %v2942_v44 = vpack.c.bf16 %v2926_v20, %v2926_v20  ;;  %v2944_v31 = vpack.c.bf16 %v2930_v16, %v2930_v16 }
 0x2d8   : > { %3749 = vmatmul.bf16.vlgmr.msrb.gmra.mxu0 %v2936_v52  ;;  %v5730_v52 = vld [vmem:[%s7507_s7 + $0x260] sm:$0xff] }
 0x2d9   : > { %3845 = vmatpush.bf16.msrb.mxu0 %v5741_v0  ;;  %v5748_v0 = vld [vmem:[%s7507_s7 + $0x2f0] sm:$0xff] }
 0x2da   : > { %v2815_v45 = vpop.f32.mrf.mxu2  ;;  %v2828_v51 = vpop.f32.mrf.mxu3 }
 0x2db   : > { %3820 = vmatpush.bf16.msra.mxu2 %v5724_v38  ;;  %v2816_v23 = vadd.f32 %v2815_v45, %v2059_v60 }
 0x2dd   : > { %3846 = vmatpush.bf16.msrb.mxu0 %v5740_v61  ;;  %v2829_v53 = vadd.f32 %v2828_v51, %v2816_v23  ;;  %v5745_v51 = vld [vmem:[%s7507_s7 + $0x2d8] sm:$0xff] }
 0x2df   : > { %v2843_v43 = vpop.f32.mrf.mxu0  ;;  %v2856_v63 = vpop.f32.mrf.mxu1  ;;  %3821 = vmatpush.bf16.msra.mxu2 %v5723_v54  ;;  %v2842_v27 = vadd.f32 %v7362_v36, %v2829_v53  ;;  %v5731_v36 = vld [vmem:[%s7507_s7 + $0x268] sm:$0xff] }
 0x2e0   : > { %v5727_v43 = vld [vmem:[%s7507_s7 + $0x248] sm:$0xff] }
 0x2e1   : > { %3847 = vmatpush.bf16.msrb.mxu0 %v5739_v10  ;;  %v2855_v6 = vadd.f32 %v7364_v25, %v2842_v27  ;;  %v5747_v25 = vld [vmem:[%s7507_s7 + $0x2e8] sm:$0xff]  ;;  %v5744_v10 = vld [vmem:[%s7507_s7 + $0x2d0] sm:$0xff] }
 0x2e2   : > { %v2817_v62 = vpop.f32.mrf.mxu2  ;;  %v2830_v47 = vpop.f32.mrf.mxu3  ;;  %v5743_v63 = vld [vmem:[%s7507_s7 + $0x2c8] sm:$0xff] }
 0x2e3   : > { %3822 = vmatpush.bf16.msra.mxu2 %v5722_v56 }
 0x2e5   : > { %3848 = vmatpush.bf16.msrb.mxu0 %v5738_v28 }
 0x2e6   : > { %3775 = vmatmul.bf16.vlgmr.msrb.gmra.mxu2 %v2938_v13 }
 0x2e7   : > { %3823 = vmatpush.bf16.msra.mxu2 %v5721_v48 }
 0x2e8   : > { %3801 = vmatmul.bf16.vlgmr.msra.gmra.mxu0 %v2940_v9 }
 0x2e9   : > { %3849 = vmatpush.bf16.msrb.mxu0 %v5737_v15 }
 0x2eb   : > { %3824 = vmatpush.bf16.msra.mxu2 %v5720_v21 }
 0x2ed   : > { %3850 = vmatpush.bf16.msrb.mxu0 %v5736_v35 }
 0x2ef   : > { %3825 = vmatpush.bf16.msra.mxu2 %v5719_v57  ;;  %v3138_v57 = vld [vmem:[%s7508_s8] sm:$0x1] }
 0x2f1   : > { %3851 = vmatpush.bf16.msrb.mxu0 %v5735_v18 }
 0x2f3   : > { %3826 = vmatpush.bf16.msra.mxu2 %v5718_v17 }
 0x2f5   : > { %v2893_v29 = vpop.f32.mrf.mxu0  ;;  %3852 = vmatpush.bf16.msrb.mxu0 %v5734_v26 }
 0x2f6   : > { %v2906_v2 = vpop.f32.mrf.mxu1  ;;  %3827 = vmatmul.bf16.vlgmr.msra.gmra.mxu2 %v2942_v44 }
 0x2f8   : > { %3853 = vmatmul.bf16.vlgmr.msrb.gmra.mxu0 %v2944_v31 }
 0x2fa   : > { %v2867_v33 = vpop.f32.mrf.mxu2  ;;  %v2880_v12 = vpop.f32.mrf.mxu3 }
 0x2fb   : > { %v2868_v39 = vadd.f32 %v2867_v33, %v2855_v6 }
 0x2fd   : > { %v2881_v5 = vadd.f32 %v2880_v12, %v2868_v39  ;;  %v2895_v14 = vpop.f32.mrf.mxu0 }
 0x2fe   : > { %v2908_v24 = vpop.f32.mrf.mxu1 }
 0x2ff   : > { %v2894_v37 = vadd.f32 %v2893_v29, %v2881_v5 }
 0x301   : > { %v2907_v7 = vadd.f32 %v2906_v2, %v2894_v37 }
 0x302   : > { %v2869_v59 = vpop.f32.mrf.mxu2  ;;  %v2882_v41 = vpop.f32.mrf.mxu3 }
 0x303   : > { %v2911_v30 = vmax.f32 %v2907_v7, 0.0 }
 0x305   : > { %v2935_v32 = vpack.c.bf16 %v2911_v30, %v2911_v30  ;;  %v2915_v4 = vrot.slane %v2911_v30, 1  ;;  %v2919_v38 = vrot.slane %v2911_v30, 2  ;;  %v2923_v61 = vrot.slane %v2911_v30, 3 }
 0x306   : > { %v2927_v56 = vrot.slane %v2911_v30, 4  ;;  %v2931_v34 = vrot.slane %v2911_v30, 5  ;;  %v3872_v30 = vld [vmem:[%s7509_s9] sm:$0x1] }
 0x307   : > { %3736 = vmatmul.bf16.vlgmr.msra.gmra.mxu3 %v2935_v32  ;;  %v2937_v19 = vpack.c.bf16 %v2915_v4, %v2915_v4  ;;  %v2939_v45 = vpack.c.bf16 %v2919_v38, %v2919_v38  ;;  %v2941_v54 = vpack.c.bf16 %v2923_v61, %v2923_v61 }
 0x308   : > { %3832 = vmatpush.bf16.msra.mxu3 %v5733_v22  ;;  %v2943_v28 = vpack.c.bf16 %v2927_v56, %v2927_v56  ;;  %v2945_v3 = vpack.c.bf16 %v2931_v34, %v2931_v34 }
 0x309   : > { %3762 = vmatmul.bf16.vlgmr.msrb.gmra.mxu1 %v2937_v19  ;;  %v3878_v19 = vld [vmem:[#allocation2] sm:$0x1] }
 0x30a   : > { %3858 = vmatpush.bf16.msrb.mxu1 %v5749_v46 }
 0x30c   : > { %3833 = vmatpush.bf16.msra.mxu3 %v5732_v49 }
 0x30e   : > { %3859 = vmatpush.bf16.msrb.mxu1 %v5748_v0 }
 0x310   : > { %3834 = vmatpush.bf16.msra.mxu3 %v5731_v36 }
 0x312   : > { %3860 = vmatpush.bf16.msrb.mxu1 %v5747_v25 }
 0x314   : > { %3835 = vmatpush.bf16.msra.mxu3 %v5730_v52 }
 0x316   : > { %3861 = vmatpush.bf16.msrb.mxu1 %v5746_v8 }
 0x317   : > { %3788 = vmatmul.bf16.vlgmr.msrb.gmra.mxu3 %v2939_v45 }
 0x318   : > { %3836 = vmatpush.bf16.msra.mxu3 %v5729_v55 }
 0x319   : > { %3814 = vmatmul.bf16.vlgmr.msra.gmra.mxu1 %v2941_v54 }
 0x31a   : > { %3862 = vmatpush.bf16.msrb.mxu1 %v5745_v51 }
 0x31c   : > { %3837 = vmatpush.bf16.msra.mxu3 %v5728_v50 }
 0x31e   : > { %3863 = vmatpush.bf16.msrb.mxu1 %v5744_v10 }
 0x320   : > { %3838 = vmatpush.bf16.msra.mxu3 %v5727_v43 }
 0x322   : > { %3864 = vmatpush.bf16.msrb.mxu1 %v5743_v63 }
 0x324   : > { %3839 = vmatpush.bf16.msra.mxu3 %v5726_v11 }
 0x326   : > { %3865 = vmatpush.bf16.msrb.mxu1 %v5742_v58 }
 0x327   : > { %3840 = vmatmul.bf16.vlgmr.msra.gmra.mxu3 %v2943_v28 }
 0x329   : > { %3866 = vmatmul.bf16.vlgmr.msrb.gmra.mxu1 %v2945_v3 }
 0x355   : > { %v3750_v1 = vpop.f32.mrf.mxu0 }
 0x359   : > { %v3724_v62 = vpop.f32.mrf.mxu2 }
 0x35a   : > { %v3725_v53 = vadd.f32 %v3724_v62, %v3138_v57 }
 0x35d   : > { %v3752_v47 = vpop.f32.mrf.mxu0 }
 0x361   : > { %v3726_v48 = vpop.f32.mrf.mxu2 }
 0x365   : > { %v3802_v13 = vpop.f32.mrf.mxu0 }
 0x369   : > { %v3776_v40 = vpop.f32.mrf.mxu2 }
 0x36d   : > { %v3804_v15 = vpop.f32.mrf.mxu0 }
 0x371   : > { %v3778_v9 = vpop.f32.mrf.mxu2 }
 0x375   : > { %v3854_v42 = vpop.f32.mrf.mxu0 }
 0x379   : > { %v3828_v60 = vpop.f32.mrf.mxu2 }
 0x37d   : > { %v3856_v21 = vpop.f32.mrf.mxu0 }
 0x381   : > { %v3830_v35 = vpop.f32.mrf.mxu2 }
 0x386   : > { %v3763_v23 = vpop.f32.mrf.mxu1 }
 0x38a   : > { %v3737_v18 = vpop.f32.mrf.mxu3 }
 0x38b   : > { %v3738_v20 = vadd.f32 %v3737_v18, %v3725_v53 }
 0x38d   : > { %v3751_v16 = vadd.f32 %v3750_v1, %v3738_v20 }
 0x38e   : > { %v3765_v17 = vpop.f32.mrf.mxu1 }
 0x38f   : > { %v3764_v29 = vadd.f32 %v3763_v23, %v3751_v16 }
 0x391   : > { %v3777_v44 = vadd.f32 %v3776_v40, %v3764_v29 }
 0x392   : > { %v3739_v26 = vpop.f32.mrf.mxu3 }
 0x396   : > { %v3815_v27 = vpop.f32.mrf.mxu1 }
 0x39a   : > { %v3789_v2 = vpop.f32.mrf.mxu3 }
 0x39b   : > { %v3790_v31 = vadd.f32 %v3789_v2, %v3777_v44 }
 0x39d   : > { %v3803_v33 = vadd.f32 %v3802_v13, %v3790_v31 }
 0x39e   : > { %v3817_v6 = vpop.f32.mrf.mxu1 }
 0x39f   : > { %v3816_v39 = vadd.f32 %v3815_v27, %v3803_v33 }
 0x3a1   : > { %v3829_v14 = vadd.f32 %v3828_v60, %v3816_v39 }
 0x3a2   : > { %v3791_v12 = vpop.f32.mrf.mxu3 }
 0x3a6   : > { %v3867_v5 = vpop.f32.mrf.mxu1 }
 0x3aa   : > { %v3841_v24 = vpop.f32.mrf.mxu3 }
 0x3ab   : > { %v3842_v37 = vadd.f32 %v3841_v24, %v3829_v14 }
 0x3ad   : > { %v3855_v7 = vadd.f32 %v3854_v42, %v3842_v37 }
 0x3ae   : > { %v3869_v59 = vpop.f32.mrf.mxu1 }
 0x3af   : > { %v3868_v41 = vadd.f32 %v3867_v5, %v3855_v7 }
 0x3b1   : > { %v3871_v22 = vmax.f32 %v3868_v41, 0.0 }
 0x3b2   : > { %v3843_v32 = vpop.f32.mrf.mxu3 }
 0x3b3   : > { %v3873_v4 = vmul.f32 %v3872_v30, %v3871_v22 }
 0x3b5   : > { %v3875_v46 = vsel %vm3874_vm3, %v3873_v4, 0.0 }
 0x3b6   : > { %3876 = vadd.xlane.f32.xlu0 %v3875_v46 }
 0x429   : > { %v3877_v49 = vpop.xlane.xlu0 %3876 }
 0x42a   : > { %v3879_v0 = vadd.f32 %v3878_v19, %v3877_v49 }
 0x42c   : > { %3881 = vst.msk [vmem:[%s401_s14] sm:$0x1] %vm3880_vm4, %v3879_v0 }
 0x42d PF: > { %s24_s19 = sadd.s32 1, %s5812_s19  }
 0x42e   : > { %p21_p7 = scmp.ge.s32.totalorder %s24_s19, 4  }
 0x430   :  { %23 = sbr.rel (!%p21_p7) target bundleno = 4 (0x4), region = 143 }
 0x435   :  { %3899 = vsyncpa [#allocation4], 1 }
 0x436   :  { %3901 = vsyncpa [#allocation4 + $0x1], 1 }

</bundles_post_ra>
